<compile_context>
chip_gen: v5e
topology: v5e:2x2
jax: 0.10.0
libtpu: 0.0.40
codegen_flags: <defaults>
</compile_context>

<pallas_src>
from functools import partial

import jax
import jax.numpy as jnp
import numpy as np
from jax import lax
from jax.experimental import pallas as pl
from jax.experimental.pallas import tpu as pltpu


def _round_up(n: int, m: int) -> int:
    return ((n + m - 1) // m) * m


# ----------------------------- fused Pallas kernel -----------------------------


def fused_resnet_kernel(*refs, n_blocks: int, has_initial: bool, precision):
    """Full ResNetEmbedding1D forward for one (TB, feat) batch tile.

    Ref order: x, [w0, b0], w1, b1, w2, b2, w3, b3, wf1, bf1, wf2, bf2, wf3, bf3, out.
    Block weights are stacked along a leading n_blocks axis; indexing with a
    static Python loop index is a zero-cost slice. Weights may be bf16
    (cast host-side); biases, residual adds, ReLUs and accumulation stay f32.
    """
    it = iter(refs)
    x_ref = next(it)
    if has_initial:
        w0_ref = next(it)
        b0_ref = next(it)
    w1_ref, b1_ref, w2_ref, b2_ref, w3_ref, b3_ref = (next(it) for _ in range(6))
    wf1_ref, bf1_ref, wf2_ref, bf2_ref, wf3_ref, bf3_ref = (next(it) for _ in range(6))
    o_ref = next(it)

    cdt = w1_ref.dtype  # MXU operand dtype (f32 or bf16); accumulation is f32

    def mm(a, w, b):
        return (
            jnp.dot(a.astype(cdt), w,
                    preferred_element_type=jnp.float32, precision=precision)
            + b.astype(jnp.float32)
        )

    # initial Linear (or Identity)
    h = x_ref[...].astype(jnp.float32)
    if has_initial:
        h = mm(h, w0_ref[...], b0_ref[...])                       # (TB, C)

    # residual blocks: h <- ReLU(fc_net(h) + h), unrolled with static slices
    for i in range(n_blocks):
        a = jnp.maximum(mm(h, w1_ref[i], b1_ref[i]), 0.0)         # (TB, H)
        a = jnp.maximum(mm(a, w2_ref[i], b2_ref[i]), 0.0)         # (TB, H)
        h = jnp.maximum(mm(a, w3_ref[i], b3_ref[i]) + h, 0.0)     # (TB, C)

    # final aggregation MLP (output feature dim is padded lane-dense)
    h = jnp.maximum(mm(h, wf1_ref[...], bf1_ref[...]), 0.0)       # (TB, F)
    h = jnp.maximum(mm(h, wf2_ref[...], bf2_ref[...]), 0.0)       # (TB, F)
    o_ref[...] = mm(h, wf3_ref[...], bf3_ref[...]).astype(o_ref.dtype)


# --------------------------------- wrapper ---------------------------------


def resnet_embedding_1d_forward(params, x, *, block_batch=256,
                                vmem_budget_bytes=40 * 1024 * 1024,
                                precision=None, interpret=False):
    """Batch-gridded fused pallas_call for the full forward pass."""
    B, c_in = x.shape
    w1, b1, w2, b2, w3, b3 = params["blocks"]
    n_blocks, c_internal, c_hidden = w1.shape
    wf1, bf1 = params["final1"]
    wf2, bf2 = params["final2"]
    wf3, bf3 = params["final3"]
    c_hidden_final = wf1.shape[1]
    c_out = wf3.shape[1]
    has_initial = params["initial"] is not None

    w_dtype = w1.dtype
    if precision is None:
        # f32 params -> exact multi-pass; bf16 params -> single-pass MXU.
        precision = (lax.Precision.HIGHEST if w_dtype == jnp.float32
                     else lax.Precision.DEFAULT)

    # --- lane-dense output: pad c_out up to a multiple of 128 (zeros) ---
    c_out_p = _round_up(c_out, 128)
    if c_out_p != c_out:
        wf3 = jnp.pad(wf3, ((0, 0), (0, c_out_p - c_out)))
        bf3 = jnp.pad(bf3, ((0, c_out_p - c_out),))

    # --- pad c_in to a lane multiple when an initial Linear exists ---
    if has_initial:
        w0, b0 = params["initial"]
        c_in_p = _round_up(c_in, 128)
        if c_in_p != c_in:
            x = jnp.pad(x, ((0, 0), (0, c_in_p - c_in)))
            w0 = jnp.pad(w0, ((0, c_in_p - c_in), (0, 0)))
    else:
        c_in_p = c_in  # == c_internal

    # --- VMEM-resident weight footprint (counted 2x for buffering slack) ---
    weight_arrays = ([w0, b0] if has_initial else []) + [
        w1, b1, w2, b2, w3, b3, wf1, bf1, wf2, bf2, wf3, bf3]
    weight_bytes = sum(int(np.prod(a.shape)) * a.dtype.itemsize
                       for a in weight_arrays)

    # --- batch tile: multiple of 8 (f32 sublane), shrunk to fit VMEM budget ---
    max_f = max(c_in_p, c_internal, c_hidden, c_hidden_final, c_out_p)
    tb = max(8, min(_round_up(block_batch, 8), _round_up(B, 8)))

    def _est(t):
        act = 4 * t * max_f * 4                    # in-flight f32 activations
        io = 2 * 2 * t * (c_in_p + c_out_p) * 4    # double-buffered x / out tiles
        return 2 * weight_bytes + act + io

    while tb > 8 and _est(tb) > vmem_budget_bytes:
        tb = _round_up(tb // 2, 8)

    # --- pad batch to a multiple of the tile (zero rows, sliced off later) ---
    B_p = _round_up(B, tb)
    if B_p != B:
        x = jnp.pad(x, ((0, B_p - B), (0, 0)))

    inputs = [x]
    if has_initial:
        inputs += [w0, b0.reshape(1, -1)]
    inputs += [w1, b1, w2, b2, w3, b3,
               wf1, bf1.reshape(1, -1), wf2, bf2.reshape(1, -1),
               wf3, bf3.reshape(1, -1)]

    def const_spec(a):
        nd = a.ndim
        return pl.BlockSpec(a.shape, lambda i, _nd=nd: (0,) * _nd)

    in_specs = [pl.BlockSpec((tb, c_in_p), lambda i: (i, 0))]
    in_specs += [const_spec(a) for a in inputs[1:]]
    out_spec = pl.BlockSpec((tb, c_out_p), lambda i: (i, 0))

    # advisory cost estimate so XLA schedules around the fused call sensibly
    flops = 2 * B_p * (
        (c_in_p * c_internal if has_initial else 0)
        + n_blocks * (c_internal * c_hidden + c_hidden * c_hidden
                      + c_hidden * c_internal)
        + c_internal * c_hidden_final
        + c_hidden_final * c_hidden_final
        + c_hidden_final * c_out_p)
    bytes_accessed = (int(np.prod(x.shape)) * x.dtype.itemsize
                      + weight_bytes + B_p * c_out_p * 4)

    kernel = partial(fused_resnet_kernel, n_blocks=n_blocks,
                     has_initial=has_initial, precision=precision)
    out = pl.pallas_call(
        kernel,
        out_shape=jax.ShapeDtypeStruct((B_p, c_out_p), jnp.float32),
        grid=(B_p // tb,),
        in_specs=in_specs,
        out_specs=out_spec,
        compiler_params=pltpu.CompilerParams(
            dimension_semantics=("parallel",),
            vmem_limit_bytes=int(vmem_budget_bytes)),
        cost_estimate=pl.CostEstimate(flops=flops, transcendentals=0,
                                      bytes_accessed=bytes_accessed),
        interpret=interpret,
    )(*inputs)
    return out[:B, :c_out]


def cast_weights(params, dtype):
    """Cast matmul weight matrices ONCE host-side; biases stay float32."""
    def cw(wb):
        if wb is None:
            return None
        w, b = wb
        return w.astype(dtype), b

    w1, b1, w2, b2, w3, b3 = params["blocks"]
    return {
        "initial": cw(params["initial"]),
        "blocks": (w1.astype(dtype), b1, w2.astype(dtype), b2,
                   w3.astype(dtype), b3),
        "final1": cw(params["final1"]),
        "final2": cw(params["final2"]),
        "final3": cw(params["final3"]),
    }


# ------------------------- parameter construction -------------------------


def init_params(key, c_in, c_out, c_internal, c_hidden, c_hidden_final, n_blocks):
    """Deterministic synthetic parameters (same shapes as the PyTorch module)."""
    def lin(k, fan_in, fan_out):
        kw, kb = jax.random.split(k)
        scale = 1.0 / np.sqrt(fan_in)
        w = jax.random.uniform(kw, (fan_in, fan_out), jnp.float32, -scale, scale)
        b = jax.random.uniform(kb, (fan_out,), jnp.float32, -scale, scale)
        return w, b

    keys = jax.random.split(key, 4 + 3 * n_blocks)
    params = {}
    params["initial"] = None if c_in == c_internal else lin(keys[0], c_in, c_internal)

    w1s, b1s, w2s, b2s, w3s, b3s = [], [], [], [], [], []
    for i in range(n_blocks):
        w1, b1 = lin(keys[4 + 3 * i + 0], c_internal, c_hidden)
        w2, b2 = lin(keys[4 + 3 * i + 1], c_hidden, c_hidden)
        w3, b3 = lin(keys[4 + 3 * i + 2], c_hidden, c_internal)
        w1s.append(w1); b1s.append(b1[None, :])
        w2s.append(w2); b2s.append(b2[None, :])
        w3s.append(w3); b3s.append(b3[None, :])
    params["blocks"] = (jnp.stack(w1s), jnp.stack(b1s),
                        jnp.stack(w2s), jnp.stack(b2s),
                        jnp.stack(w3s), jnp.stack(b3s))

    params["final1"] = lin(keys[1], c_internal, c_hidden_final)
    params["final2"] = lin(keys[2], c_hidden_final, c_hidden_final)
    params["final3"] = lin(keys[3], c_hidden_final, c_out)
    return params


# ------------------------------ reference ------------------------------


def reference_forward(params, x, precision=lax.Precision.HIGHEST):
    """Pure-JAX reference reproducing the PyTorch semantics."""
    dot = partial(jnp.dot, precision=precision)
    h = x
    if params["initial"] is not None:
        w0, b0 = params["initial"]
        h = dot(h, w0) + b0
    w1, b1, w2, b2, w3, b3 = params["blocks"]
    for i in range(w1.shape[0]):
        a = jnp.maximum(dot(h, w1[i]) + b1[i], 0.0)
        a = jnp.maximum(dot(a, w2[i]) + b2[i], 0.0)
        f = dot(a, w3[i]) + b3[i]
        h = jnp.maximum(f + h, 0.0)
    w, b = params["final1"]; h = jnp.maximum(dot(h, w) + b, 0.0)
    w, b = params["final2"]; h = jnp.maximum(dot(h, w) + b, 0.0)
    w, b = params["final3"]
    return dot(h, w) + b


# --------------------------------- main ---------------------------------


if __name__ == "__main__":
    # Small configuration consistent with the module (scaled down).
    # B=20 is deliberately NOT a multiple of the batch tile to exercise
    # remainder padding; c_out=8 exercises the lane-dense padded output path;
    # block_batch=16 gives a 2-step batch grid even at this toy size.
    B, C_IN, C_OUT = 20, 16, 8
    C_INTERNAL, C_HIDDEN, C_HIDDEN_FINAL = 128, 128, 128
    N_BLOCKS = 4
    TB = 16  # production: leave default block_batch=256 (512-1024 on v6e/v7x)

    key = jax.random.PRNGKey(0)
    kx, kp = jax.random.split(key)
    x = jax.random.normal(kx, (B, C_IN), jnp.float32)
    params = init_params(kp, C_IN, C_OUT, C_INTERNAL, C_HIDDEN,
                         C_HIDDEN_FINAL, N_BLOCKS)

    z_ref = jax.block_until_ready(reference_forward(params, x))

    # f32 / HIGHEST path: tight check against the pure-JAX reference.
    z = jax.block_until_ready(
        resnet_embedding_1d_forward(params, x, block_batch=TB))
    assert z.shape == (B, C_OUT)
    np.testing.assert_allclose(np.asarray(z), np.asarray(z_ref),
                               rtol=1e-4, atol=1e-4)

    # Production path: bf16 weights cast once host-side, single-pass MXU with
    # f32 accumulation; checked with a relative-norm tolerance.
    params_bf16 = cast_weights(params, jnp.bfloat16)
    z_bf = jax.block_until_ready(
        resnet_embedding_1d_forward(params_bf16, x, block_batch=TB))
    rel = (np.linalg.norm(np.asarray(z_bf) - np.asarray(z_ref))
           / np.linalg.norm(np.asarray(z_ref)))
    assert rel < 5e-2, f"bf16 path relative error too large: {rel}"

    print("KERNEL_OK")
</pallas_src>

<mosaic_0001>
module attributes {stable_mosaic.version = 11 : i64} {
  func.func @fused_resnet_kernel(%arg0: i32, %arg1: memref<16x128xf32, #tpu.memory_space<vmem>>, %arg2: memref<128x128xf32, #tpu.memory_space<vmem>>, %arg3: memref<1x128xf32, #tpu.memory_space<vmem>>, %arg4: memref<4x128x128xf32, #tpu.memory_space<vmem>>, %arg5: memref<4x1x128xf32, #tpu.memory_space<vmem>>, %arg6: memref<4x128x128xf32, #tpu.memory_space<vmem>>, %arg7: memref<4x1x128xf32, #tpu.memory_space<vmem>>, %arg8: memref<4x128x128xf32, #tpu.memory_space<vmem>>, %arg9: memref<4x1x128xf32, #tpu.memory_space<vmem>>, %arg10: memref<128x128xf32, #tpu.memory_space<vmem>>, %arg11: memref<1x128xf32, #tpu.memory_space<vmem>>, %arg12: memref<128x128xf32, #tpu.memory_space<vmem>>, %arg13: memref<1x128xf32, #tpu.memory_space<vmem>>, %arg14: memref<128x128xf32, #tpu.memory_space<vmem>>, %arg15: memref<1x128xf32, #tpu.memory_space<vmem>>, %arg16: memref<16x128xf32, #tpu.memory_space<vmem>>) attributes {dimension_semantics = [#tpu.dimension_semantics<parallel>], iteration_bounds = array<i64: 2>, scalar_prefetch = 0 : i64, scratch_operands = 0 : i64, tpu.core_type = #tpu.core_type<tc>, window_params = [{transform_indices = @transform_0, window_bounds = array<i64: 16, 128>}, {pipeline_mode = #tpu.pipeline_mode<synchronous>, transform_indices = @transform_1, window_bounds = array<i64: 128, 128>}, {pipeline_mode = #tpu.pipeline_mode<synchronous>, transform_indices = @transform_2, window_bounds = array<i64: 1, 128>}, {pipeline_mode = #tpu.pipeline_mode<synchronous>, transform_indices = @transform_3, window_bounds = array<i64: 4, 128, 128>}, {pipeline_mode = #tpu.pipeline_mode<synchronous>, transform_indices = @transform_4, window_bounds = array<i64: 4, 1, 128>}, {pipeline_mode = #tpu.pipeline_mode<synchronous>, transform_indices = @transform_5, window_bounds = array<i64: 4, 128, 128>}, {pipeline_mode = #tpu.pipeline_mode<synchronous>, transform_indices = @transform_6, window_bounds = array<i64: 4, 1, 128>}, {pipeline_mode = #tpu.pipeline_mode<synchronous>, transform_indices = @transform_7, window_bounds = array<i64: 4, 128, 128>}, {pipeline_mode = #tpu.pipeline_mode<synchronous>, transform_indices = @transform_8, window_bounds = array<i64: 4, 1, 128>}, {pipeline_mode = #tpu.pipeline_mode<synchronous>, transform_indices = @transform_9, window_bounds = array<i64: 128, 128>}, {pipeline_mode = #tpu.pipeline_mode<synchronous>, transform_indices = @transform_10, window_bounds = array<i64: 1, 128>}, {pipeline_mode = #tpu.pipeline_mode<synchronous>, transform_indices = @transform_11, window_bounds = array<i64: 128, 128>}, {pipeline_mode = #tpu.pipeline_mode<synchronous>, transform_indices = @transform_12, window_bounds = array<i64: 1, 128>}, {pipeline_mode = #tpu.pipeline_mode<synchronous>, transform_indices = @transform_13, window_bounds = array<i64: 128, 128>}, {pipeline_mode = #tpu.pipeline_mode<synchronous>, transform_indices = @transform_14, window_bounds = array<i64: 1, 128>}, {transform_indices = @transform_15, window_bounds = array<i64: 16, 128>}]} {
    %c0 = arith.constant 0 : index
    %c0_0 = arith.constant 0 : index
    %0 = vector.load %arg1[%c0, %c0_0] : memref<16x128xf32, #tpu.memory_space<vmem>>, vector<16x128xf32>
    %c0_1 = arith.constant 0 : index
    %c0_2 = arith.constant 0 : index
    %1 = vector.load %arg2[%c0_1, %c0_2] : memref<128x128xf32, #tpu.memory_space<vmem>>, vector<128x128xf32>
    %c0_3 = arith.constant 0 : index
    %c0_4 = arith.constant 0 : index
    %2 = vector.load %arg3[%c0_3, %c0_4] : memref<1x128xf32, #tpu.memory_space<vmem>>, vector<1x128xf32>
    %cst = arith.constant dense<0.000000e+00> : vector<16x128xf32>
    %3 = tpu.matmul %0, %1, %cst {dimension_numbers = #tpu.dot_dimension_numbers<[1], [0], [0], [1], [0, 0, 1, 1], [], []>, precision = #tpu.contract_precision<fp32>} : vector<16x128xf32>, vector<128x128xf32>, vector<16x128xf32> -> vector<16x128xf32>
    %4 = vector.broadcast %2 : vector<1x128xf32> to vector<16x128xf32>
    %5 = arith.addf %3, %4 : vector<16x128xf32>
    %c0_5 = arith.constant 0 : index
    %c0_6 = arith.constant 0 : index
    %c0_7 = arith.constant 0 : index
    %6 = vector.load %arg4[%c0_5, %c0_6, %c0_7] : memref<4x128x128xf32, #tpu.memory_space<vmem>>, vector<1x128x128xf32>
    %7 = vector.shape_cast %6 : vector<1x128x128xf32> to vector<128x128xf32>
    %c0_8 = arith.constant 0 : index
    %c0_9 = arith.constant 0 : index
    %c0_10 = arith.constant 0 : index
    %8 = vector.load %arg5[%c0_8, %c0_9, %c0_10] : memref<4x1x128xf32, #tpu.memory_space<vmem>>, vector<1x1x128xf32>
    %9 = vector.shape_cast %8 : vector<1x1x128xf32> to vector<1x128xf32>
    %cst_11 = arith.constant dense<0.000000e+00> : vector<16x128xf32>
    %10 = tpu.matmul %5, %7, %cst_11 {dimension_numbers = #tpu.dot_dimension_numbers<[1], [0], [0], [1], [0, 0, 1, 1], [], []>, precision = #tpu.contract_precision<fp32>} : vector<16x128xf32>, vector<128x128xf32>, vector<16x128xf32> -> vector<16x128xf32>
    %11 = vector.broadcast %9 : vector<1x128xf32> to vector<16x128xf32>
    %12 = arith.addf %10, %11 : vector<16x128xf32>
    %cst_12 = arith.constant 0.000000e+00 : f32
    %13 = vector.broadcast %cst_12 : f32 to vector<16x128xf32>
    %14 = arith.maximumf %12, %13 : vector<16x128xf32>
    %c0_13 = arith.constant 0 : index
    %c0_14 = arith.constant 0 : index
    %c0_15 = arith.constant 0 : index
    %15 = vector.load %arg6[%c0_13, %c0_14, %c0_15] : memref<4x128x128xf32, #tpu.memory_space<vmem>>, vector<1x128x128xf32>
    %16 = vector.shape_cast %15 : vector<1x128x128xf32> to vector<128x128xf32>
    %c0_16 = arith.constant 0 : index
    %c0_17 = arith.constant 0 : index
    %c0_18 = arith.constant 0 : index
    %17 = vector.load %arg7[%c0_16, %c0_17, %c0_18] : memref<4x1x128xf32, #tpu.memory_space<vmem>>, vector<1x1x128xf32>
    %18 = vector.shape_cast %17 : vector<1x1x128xf32> to vector<1x128xf32>
    %cst_19 = arith.constant dense<0.000000e+00> : vector<16x128xf32>
    %19 = tpu.matmul %14, %16, %cst_19 {dimension_numbers = #tpu.dot_dimension_numbers<[1], [0], [0], [1], [0, 0, 1, 1], [], []>, precision = #tpu.contract_precision<fp32>} : vector<16x128xf32>, vector<128x128xf32>, vector<16x128xf32> -> vector<16x128xf32>
    %20 = vector.broadcast %18 : vector<1x128xf32> to vector<16x128xf32>
    %21 = arith.addf %19, %20 : vector<16x128xf32>
    %cst_20 = arith.constant 0.000000e+00 : f32
    %22 = vector.broadcast %cst_20 : f32 to vector<16x128xf32>
    %23 = arith.maximumf %21, %22 : vector<16x128xf32>
    %c0_21 = arith.constant 0 : index
    %c0_22 = arith.constant 0 : index
    %c0_23 = arith.constant 0 : index
    %24 = vector.load %arg8[%c0_21, %c0_22, %c0_23] : memref<4x128x128xf32, #tpu.memory_space<vmem>>, vector<1x128x128xf32>
    %25 = vector.shape_cast %24 : vector<1x128x128xf32> to vector<128x128xf32>
    %c0_24 = arith.constant 0 : index
    %c0_25 = arith.constant 0 : index
    %c0_26 = arith.constant 0 : index
    %26 = vector.load %arg9[%c0_24, %c0_25, %c0_26] : memref<4x1x128xf32, #tpu.memory_space<vmem>>, vector<1x1x128xf32>
    %27 = vector.shape_cast %26 : vector<1x1x128xf32> to vector<1x128xf32>
    %cst_27 = arith.constant dense<0.000000e+00> : vector<16x128xf32>
    %28 = tpu.matmul %23, %25, %cst_27 {dimension_numbers = #tpu.dot_dimension_numbers<[1], [0], [0], [1], [0, 0, 1, 1], [], []>, precision = #tpu.contract_precision<fp32>} : vector<16x128xf32>, vector<128x128xf32>, vector<16x128xf32> -> vector<16x128xf32>
    %29 = vector.broadcast %27 : vector<1x128xf32> to vector<16x128xf32>
    %30 = arith.addf %28, %29 : vector<16x128xf32>
    %31 = arith.addf %30, %5 : vector<16x128xf32>
    %cst_28 = arith.constant 0.000000e+00 : f32
    %32 = vector.broadcast %cst_28 : f32 to vector<16x128xf32>
    %33 = arith.maximumf %31, %32 : vector<16x128xf32>
    %c1 = arith.constant 1 : index
    %c0_29 = arith.constant 0 : index
    %c0_30 = arith.constant 0 : index
    %34 = vector.load %arg4[%c1, %c0_29, %c0_30] : memref<4x128x128xf32, #tpu.memory_space<vmem>>, vector<1x128x128xf32>
    %35 = vector.shape_cast %34 : vector<1x128x128xf32> to vector<128x128xf32>
    %c1_31 = arith.constant 1 : index
    %c0_32 = arith.constant 0 : index
    %c0_33 = arith.constant 0 : index
    %36 = vector.load %arg5[%c1_31, %c0_32, %c0_33] : memref<4x1x128xf32, #tpu.memory_space<vmem>>, vector<1x1x128xf32>
    %37 = vector.shape_cast %36 : vector<1x1x128xf32> to vector<1x128xf32>
    %cst_34 = arith.constant dense<0.000000e+00> : vector<16x128xf32>
    %38 = tpu.matmul %33, %35, %cst_34 {dimension_numbers = #tpu.dot_dimension_numbers<[1], [0], [0], [1], [0, 0, 1, 1], [], []>, precision = #tpu.contract_precision<fp32>} : vector<16x128xf32>, vector<128x128xf32>, vector<16x128xf32> -> vector<16x128xf32>
    %39 = vector.broadcast %37 : vector<1x128xf32> to vector<16x128xf32>
    %40 = arith.addf %38, %39 : vector<16x128xf32>
    %cst_35 = arith.constant 0.000000e+00 : f32
    %41 = vector.broadcast %cst_35 : f32 to vector<16x128xf32>
    %42 = arith.maximumf %40, %41 : vector<16x128xf32>
    %c1_36 = arith.constant 1 : index
    %c0_37 = arith.constant 0 : index
    %c0_38 = arith.constant 0 : index
    %43 = vector.load %arg6[%c1_36, %c0_37, %c0_38] : memref<4x128x128xf32, #tpu.memory_space<vmem>>, vector<1x128x128xf32>
    %44 = vector.shape_cast %43 : vector<1x128x128xf32> to vector<128x128xf32>
    %c1_39 = arith.constant 1 : index
    %c0_40 = arith.constant 0 : index
    %c0_41 = arith.constant 0 : index
    %45 = vector.load %arg7[%c1_39, %c0_40, %c0_41] : memref<4x1x128xf32, #tpu.memory_space<vmem>>, vector<1x1x128xf32>
    %46 = vector.shape_cast %45 : vector<1x1x128xf32> to vector<1x128xf32>
    %cst_42 = arith.constant dense<0.000000e+00> : vector<16x128xf32>
    %47 = tpu.matmul %42, %44, %cst_42 {dimension_numbers = #tpu.dot_dimension_numbers<[1], [0], [0], [1], [0, 0, 1, 1], [], []>, precision = #tpu.contract_precision<fp32>} : vector<16x128xf32>, vector<128x128xf32>, vector<16x128xf32> -> vector<16x128xf32>
    %48 = vector.broadcast %46 : vector<1x128xf32> to vector<16x128xf32>
    %49 = arith.addf %47, %48 : vector<16x128xf32>
    %cst_43 = arith.constant 0.000000e+00 : f32
    %50 = vector.broadcast %cst_43 : f32 to vector<16x128xf32>
    %51 = arith.maximumf %49, %50 : vector<16x128xf32>
    %c1_44 = arith.constant 1 : index
    %c0_45 = arith.constant 0 : index
    %c0_46 = arith.constant 0 : index
    %52 = vector.load %arg8[%c1_44, %c0_45, %c0_46] : memref<4x128x128xf32, #tpu.memory_space<vmem>>, vector<1x128x128xf32>
    %53 = vector.shape_cast %52 : vector<1x128x128xf32> to vector<128x128xf32>
    %c1_47 = arith.constant 1 : index
    %c0_48 = arith.constant 0 : index
    %c0_49 = arith.constant 0 : index
    %54 = vector.load %arg9[%c1_47, %c0_48, %c0_49] : memref<4x1x128xf32, #tpu.memory_space<vmem>>, vector<1x1x128xf32>
    %55 = vector.shape_cast %54 : vector<1x1x128xf32> to vector<1x128xf32>
    %cst_50 = arith.constant dense<0.000000e+00> : vector<16x128xf32>
    %56 = tpu.matmul %51, %53, %cst_50 {dimension_numbers = #tpu.dot_dimension_numbers<[1], [0], [0], [1], [0, 0, 1, 1], [], []>, precision = #tpu.contract_precision<fp32>} : vector<16x128xf32>, vector<128x128xf32>, vector<16x128xf32> -> vector<16x128xf32>
    %57 = vector.broadcast %55 : vector<1x128xf32> to vector<16x128xf32>
    %58 = arith.addf %56, %57 : vector<16x128xf32>
    %59 = arith.addf %58, %33 : vector<16x128xf32>
    %cst_51 = arith.constant 0.000000e+00 : f32
    %60 = vector.broadcast %cst_51 : f32 to vector<16x128xf32>
    %61 = arith.maximumf %59, %60 : vector<16x128xf32>
    %c2 = arith.constant 2 : index
    %c0_52 = arith.constant 0 : index
    %c0_53 = arith.constant 0 : index
    %62 = vector.load %arg4[%c2, %c0_52, %c0_53] : memref<4x128x128xf32, #tpu.memory_space<vmem>>, vector<1x128x128xf32>
    %63 = vector.shape_cast %62 : vector<1x128x128xf32> to vector<128x128xf32>
    %c2_54 = arith.constant 2 : index
    %c0_55 = arith.constant 0 : index
    %c0_56 = arith.constant 0 : index
    %64 = vector.load %arg5[%c2_54, %c0_55, %c0_56] : memref<4x1x128xf32, #tpu.memory_space<vmem>>, vector<1x1x128xf32>
    %65 = vector.shape_cast %64 : vector<1x1x128xf32> to vector<1x128xf32>
    %cst_57 = arith.constant dense<0.000000e+00> : vector<16x128xf32>
    %66 = tpu.matmul %61, %63, %cst_57 {dimension_numbers = #tpu.dot_dimension_numbers<[1], [0], [0], [1], [0, 0, 1, 1], [], []>, precision = #tpu.contract_precision<fp32>} : vector<16x128xf32>, vector<128x128xf32>, vector<16x128xf32> -> vector<16x128xf32>
    %67 = vector.broadcast %65 : vector<1x128xf32> to vector<16x128xf32>
    %68 = arith.addf %66, %67 : vector<16x128xf32>
    %cst_58 = arith.constant 0.000000e+00 : f32
    %69 = vector.broadcast %cst_58 : f32 to vector<16x128xf32>
    %70 = arith.maximumf %68, %69 : vector<16x128xf32>
    %c2_59 = arith.constant 2 : index
    %c0_60 = arith.constant 0 : index
    %c0_61 = arith.constant 0 : index
    %71 = vector.load %arg6[%c2_59, %c0_60, %c0_61] : memref<4x128x128xf32, #tpu.memory_space<vmem>>, vector<1x128x128xf32>
    %72 = vector.shape_cast %71 : vector<1x128x128xf32> to vector<128x128xf32>
    %c2_62 = arith.constant 2 : index
    %c0_63 = arith.constant 0 : index
    %c0_64 = arith.constant 0 : index
    %73 = vector.load %arg7[%c2_62, %c0_63, %c0_64] : memref<4x1x128xf32, #tpu.memory_space<vmem>>, vector<1x1x128xf32>
    %74 = vector.shape_cast %73 : vector<1x1x128xf32> to vector<1x128xf32>
    %cst_65 = arith.constant dense<0.000000e+00> : vector<16x128xf32>
    %75 = tpu.matmul %70, %72, %cst_65 {dimension_numbers = #tpu.dot_dimension_numbers<[1], [0], [0], [1], [0, 0, 1, 1], [], []>, precision = #tpu.contract_precision<fp32>} : vector<16x128xf32>, vector<128x128xf32>, vector<16x128xf32> -> vector<16x128xf32>
    %76 = vector.broadcast %74 : vector<1x128xf32> to vector<16x128xf32>
    %77 = arith.addf %75, %76 : vector<16x128xf32>
    %cst_66 = arith.constant 0.000000e+00 : f32
    %78 = vector.broadcast %cst_66 : f32 to vector<16x128xf32>
    %79 = arith.maximumf %77, %78 : vector<16x128xf32>
    %c2_67 = arith.constant 2 : index
    %c0_68 = arith.constant 0 : index
    %c0_69 = arith.constant 0 : index
    %80 = vector.load %arg8[%c2_67, %c0_68, %c0_69] : memref<4x128x128xf32, #tpu.memory_space<vmem>>, vector<1x128x128xf32>
    %81 = vector.shape_cast %80 : vector<1x128x128xf32> to vector<128x128xf32>
    %c2_70 = arith.constant 2 : index
    %c0_71 = arith.constant 0 : index
    %c0_72 = arith.constant 0 : index
    %82 = vector.load %arg9[%c2_70, %c0_71, %c0_72] : memref<4x1x128xf32, #tpu.memory_space<vmem>>, vector<1x1x128xf32>
    %83 = vector.shape_cast %82 : vector<1x1x128xf32> to vector<1x128xf32>
    %cst_73 = arith.constant dense<0.000000e+00> : vector<16x128xf32>
    %84 = tpu.matmul %79, %81, %cst_73 {dimension_numbers = #tpu.dot_dimension_numbers<[1], [0], [0], [1], [0, 0, 1, 1], [], []>, precision = #tpu.contract_precision<fp32>} : vector<16x128xf32>, vector<128x128xf32>, vector<16x128xf32> -> vector<16x128xf32>
    %85 = vector.broadcast %83 : vector<1x128xf32> to vector<16x128xf32>
    %86 = arith.addf %84, %85 : vector<16x128xf32>
    %87 = arith.addf %86, %61 : vector<16x128xf32>
    %cst_74 = arith.constant 0.000000e+00 : f32
    %88 = vector.broadcast %cst_74 : f32 to vector<16x128xf32>
    %89 = arith.maximumf %87, %88 : vector<16x128xf32>
    %c3 = arith.constant 3 : index
    %c0_75 = arith.constant 0 : index
    %c0_76 = arith.constant 0 : index
    %90 = vector.load %arg4[%c3, %c0_75, %c0_76] : memref<4x128x128xf32, #tpu.memory_space<vmem>>, vector<1x128x128xf32>
    %91 = vector.shape_cast %90 : vector<1x128x128xf32> to vector<128x128xf32>
    %c3_77 = arith.constant 3 : index
    %c0_78 = arith.constant 0 : index
    %c0_79 = arith.constant 0 : index
    %92 = vector.load %arg5[%c3_77, %c0_78, %c0_79] : memref<4x1x128xf32, #tpu.memory_space<vmem>>, vector<1x1x128xf32>
    %93 = vector.shape_cast %92 : vector<1x1x128xf32> to vector<1x128xf32>
    %cst_80 = arith.constant dense<0.000000e+00> : vector<16x128xf32>
    %94 = tpu.matmul %89, %91, %cst_80 {dimension_numbers = #tpu.dot_dimension_numbers<[1], [0], [0], [1], [0, 0, 1, 1], [], []>, precision = #tpu.contract_precision<fp32>} : vector<16x128xf32>, vector<128x128xf32>, vector<16x128xf32> -> vector<16x128xf32>
    %95 = vector.broadcast %93 : vector<1x128xf32> to vector<16x128xf32>
    %96 = arith.addf %94, %95 : vector<16x128xf32>
    %cst_81 = arith.constant 0.000000e+00 : f32
    %97 = vector.broadcast %cst_81 : f32 to vector<16x128xf32>
    %98 = arith.maximumf %96, %97 : vector<16x128xf32>
    %c3_82 = arith.constant 3 : index
    %c0_83 = arith.constant 0 : index
    %c0_84 = arith.constant 0 : index
    %99 = vector.load %arg6[%c3_82, %c0_83, %c0_84] : memref<4x128x128xf32, #tpu.memory_space<vmem>>, vector<1x128x128xf32>
    %100 = vector.shape_cast %99 : vector<1x128x128xf32> to vector<128x128xf32>
    %c3_85 = arith.constant 3 : index
    %c0_86 = arith.constant 0 : index
    %c0_87 = arith.constant 0 : index
    %101 = vector.load %arg7[%c3_85, %c0_86, %c0_87] : memref<4x1x128xf32, #tpu.memory_space<vmem>>, vector<1x1x128xf32>
    %102 = vector.shape_cast %101 : vector<1x1x128xf32> to vector<1x128xf32>
    %cst_88 = arith.constant dense<0.000000e+00> : vector<16x128xf32>
    %103 = tpu.matmul %98, %100, %cst_88 {dimension_numbers = #tpu.dot_dimension_numbers<[1], [0], [0], [1], [0, 0, 1, 1], [], []>, precision = #tpu.contract_precision<fp32>} : vector<16x128xf32>, vector<128x128xf32>, vector<16x128xf32> -> vector<16x128xf32>
    %104 = vector.broadcast %102 : vector<1x128xf32> to vector<16x128xf32>
    %105 = arith.addf %103, %104 : vector<16x128xf32>
    %cst_89 = arith.constant 0.000000e+00 : f32
    %106 = vector.broadcast %cst_89 : f32 to vector<16x128xf32>
    %107 = arith.maximumf %105, %106 : vector<16x128xf32>
    %c3_90 = arith.constant 3 : index
    %c0_91 = arith.constant 0 : index
    %c0_92 = arith.constant 0 : index
    %108 = vector.load %arg8[%c3_90, %c0_91, %c0_92] : memref<4x128x128xf32, #tpu.memory_space<vmem>>, vector<1x128x128xf32>
    %109 = vector.shape_cast %108 : vector<1x128x128xf32> to vector<128x128xf32>
    %c3_93 = arith.constant 3 : index
    %c0_94 = arith.constant 0 : index
    %c0_95 = arith.constant 0 : index
    %110 = vector.load %arg9[%c3_93, %c0_94, %c0_95] : memref<4x1x128xf32, #tpu.memory_space<vmem>>, vector<1x1x128xf32>
    %111 = vector.shape_cast %110 : vector<1x1x128xf32> to vector<1x128xf32>
    %cst_96 = arith.constant dense<0.000000e+00> : vector<16x128xf32>
    %112 = tpu.matmul %107, %109, %cst_96 {dimension_numbers = #tpu.dot_dimension_numbers<[1], [0], [0], [1], [0, 0, 1, 1], [], []>, precision = #tpu.contract_precision<fp32>} : vector<16x128xf32>, vector<128x128xf32>, vector<16x128xf32> -> vector<16x128xf32>
    %113 = vector.broadcast %111 : vector<1x128xf32> to vector<16x128xf32>
    %114 = arith.addf %112, %113 : vector<16x128xf32>
    %115 = arith.addf %114, %89 : vector<16x128xf32>
    %cst_97 = arith.constant 0.000000e+00 : f32
    %116 = vector.broadcast %cst_97 : f32 to vector<16x128xf32>
    %117 = arith.maximumf %115, %116 : vector<16x128xf32>
    %c0_98 = arith.constant 0 : index
    %c0_99 = arith.constant 0 : index
    %118 = vector.load %arg10[%c0_98, %c0_99] : memref<128x128xf32, #tpu.memory_space<vmem>>, vector<128x128xf32>
    %c0_100 = arith.constant 0 : index
    %c0_101 = arith.constant 0 : index
    %119 = vector.load %arg11[%c0_100, %c0_101] : memref<1x128xf32, #tpu.memory_space<vmem>>, vector<1x128xf32>
    %cst_102 = arith.constant dense<0.000000e+00> : vector<16x128xf32>
    %120 = tpu.matmul %117, %118, %cst_102 {dimension_numbers = #tpu.dot_dimension_numbers<[1], [0], [0], [1], [0, 0, 1, 1], [], []>, precision = #tpu.contract_precision<fp32>} : vector<16x128xf32>, vector<128x128xf32>, vector<16x128xf32> -> vector<16x128xf32>
    %121 = vector.broadcast %119 : vector<1x128xf32> to vector<16x128xf32>
    %122 = arith.addf %120, %121 : vector<16x128xf32>
    %cst_103 = arith.constant 0.000000e+00 : f32
    %123 = vector.broadcast %cst_103 : f32 to vector<16x128xf32>
    %124 = arith.maximumf %122, %123 : vector<16x128xf32>
    %c0_104 = arith.constant 0 : index
    %c0_105 = arith.constant 0 : index
    %125 = vector.load %arg12[%c0_104, %c0_105] : memref<128x128xf32, #tpu.memory_space<vmem>>, vector<128x128xf32>
    %c0_106 = arith.constant 0 : index
    %c0_107 = arith.constant 0 : index
    %126 = vector.load %arg13[%c0_106, %c0_107] : memref<1x128xf32, #tpu.memory_space<vmem>>, vector<1x128xf32>
    %cst_108 = arith.constant dense<0.000000e+00> : vector<16x128xf32>
    %127 = tpu.matmul %124, %125, %cst_108 {dimension_numbers = #tpu.dot_dimension_numbers<[1], [0], [0], [1], [0, 0, 1, 1], [], []>, precision = #tpu.contract_precision<fp32>} : vector<16x128xf32>, vector<128x128xf32>, vector<16x128xf32> -> vector<16x128xf32>
    %128 = vector.broadcast %126 : vector<1x128xf32> to vector<16x128xf32>
    %129 = arith.addf %127, %128 : vector<16x128xf32>
    %cst_109 = arith.constant 0.000000e+00 : f32
    %130 = vector.broadcast %cst_109 : f32 to vector<16x128xf32>
    %131 = arith.maximumf %129, %130 : vector<16x128xf32>
    %c0_110 = arith.constant 0 : index
    %c0_111 = arith.constant 0 : index
    %132 = vector.load %arg14[%c0_110, %c0_111] : memref<128x128xf32, #tpu.memory_space<vmem>>, vector<128x128xf32>
    %c0_112 = arith.constant 0 : index
    %c0_113 = arith.constant 0 : index
    %133 = vector.load %arg15[%c0_112, %c0_113] : memref<1x128xf32, #tpu.memory_space<vmem>>, vector<1x128xf32>
    %cst_114 = arith.constant dense<0.000000e+00> : vector<16x128xf32>
    %134 = tpu.matmul %131, %132, %cst_114 {dimension_numbers = #tpu.dot_dimension_numbers<[1], [0], [0], [1], [0, 0, 1, 1], [], []>, precision = #tpu.contract_precision<fp32>} : vector<16x128xf32>, vector<128x128xf32>, vector<16x128xf32> -> vector<16x128xf32>
    %135 = vector.broadcast %133 : vector<1x128xf32> to vector<16x128xf32>
    %136 = arith.addf %134, %135 : vector<16x128xf32>
    %c0_115 = arith.constant 0 : index
    %c0_116 = arith.constant 0 : index
    %137 = vector.load %arg16[%c0_115, %c0_116] : memref<16x128xf32, #tpu.memory_space<vmem>>, vector<16x128xf32>
    tpu.vector_store %arg16[%c0_115, %c0_116], %136 {strides = array<i32>} : memref<16x128xf32, #tpu.memory_space<vmem>>, vector<16x128xf32>,
    return
  }
  func.func @transform_0(%arg0: i32) -> (i32, i32) {
    %c0_i32 = arith.constant 0 : i32
    %c0_i32_0 = arith.constant 0 : i32
    return %arg0, %c0_i32 : i32, i32
  }
  func.func @transform_1(%arg0: i32) -> (i32, i32) {
    %c0_i32 = arith.constant 0 : i32
    %c0_i32_0 = arith.constant 0 : i32
    %c0_i32_1 = arith.constant 0 : i32
    return %c0_i32, %c0_i32_0 : i32, i32
  }
  func.func @transform_2(%arg0: i32) -> (i32, i32) {
    %c0_i32 = arith.constant 0 : i32
    %c0_i32_0 = arith.constant 0 : i32
    %c0_i32_1 = arith.constant 0 : i32
    return %c0_i32, %c0_i32_0 : i32, i32
  }
  func.func @transform_3(%arg0: i32) -> (i32, i32, i32) {
    %c0_i32 = arith.constant 0 : i32
    %c0_i32_0 = arith.constant 0 : i32
    %c0_i32_1 = arith.constant 0 : i32
    %c0_i32_2 = arith.constant 0 : i32
    return %c0_i32, %c0_i32_0, %c0_i32_1 : i32, i32, i32
  }
  func.func @transform_4(%arg0: i32) -> (i32, i32, i32) {
    %c0_i32 = arith.constant 0 : i32
    %c0_i32_0 = arith.constant 0 : i32
    %c0_i32_1 = arith.constant 0 : i32
    %c0_i32_2 = arith.constant 0 : i32
    return %c0_i32, %c0_i32_0, %c0_i32_1 : i32, i32, i32
  }
  func.func @transform_5(%arg0: i32) -> (i32, i32, i32) {
    %c0_i32 = arith.constant 0 : i32
    %c0_i32_0 = arith.constant 0 : i32
    %c0_i32_1 = arith.constant 0 : i32
    %c0_i32_2 = arith.constant 0 : i32
    return %c0_i32, %c0_i32_0, %c0_i32_1 : i32, i32, i32
  }
  func.func @transform_6(%arg0: i32) -> (i32, i32, i32) {
    %c0_i32 = arith.constant 0 : i32
    %c0_i32_0 = arith.constant 0 : i32
    %c0_i32_1 = arith.constant 0 : i32
    %c0_i32_2 = arith.constant 0 : i32
    return %c0_i32, %c0_i32_0, %c0_i32_1 : i32, i32, i32
  }
  func.func @transform_7(%arg0: i32) -> (i32, i32, i32) {
    %c0_i32 = arith.constant 0 : i32
    %c0_i32_0 = arith.constant 0 : i32
    %c0_i32_1 = arith.constant 0 : i32
    %c0_i32_2 = arith.constant 0 : i32
    return %c0_i32, %c0_i32_0, %c0_i32_1 : i32, i32, i32
  }
  func.func @transform_8(%arg0: i32) -> (i32, i32, i32) {
    %c0_i32 = arith.constant 0 : i32
    %c0_i32_0 = arith.constant 0 : i32
    %c0_i32_1 = arith.constant 0 : i32
    %c0_i32_2 = arith.constant 0 : i32
    return %c0_i32, %c0_i32_0, %c0_i32_1 : i32, i32, i32
  }
  func.func @transform_9(%arg0: i32) -> (i32, i32) {
    %c0_i32 = arith.constant 0 : i32
    %c0_i32_0 = arith.constant 0 : i32
    %c0_i32_1 = arith.constant 0 : i32
    return %c0_i32, %c0_i32_0 : i32, i32
  }
  func.func @transform_10(%arg0: i32) -> (i32, i32) {
    %c0_i32 = arith.constant 0 : i32
    %c0_i32_0 = arith.constant 0 : i32
    %c0_i32_1 = arith.constant 0 : i32
    return %c0_i32, %c0_i32_0 : i32, i32
  }
  func.func @transform_11(%arg0: i32) -> (i32, i32) {
    %c0_i32 = arith.constant 0 : i32
    %c0_i32_0 = arith.constant 0 : i32
    %c0_i32_1 = arith.constant 0 : i32
    return %c0_i32, %c0_i32_0 : i32, i32
  }
  func.func @transform_12(%arg0: i32) -> (i32, i32) {
    %c0_i32 = arith.constant 0 : i32
    %c0_i32_0 = arith.constant 0 : i32
    %c0_i32_1 = arith.constant 0 : i32
    return %c0_i32, %c0_i32_0 : i32, i32
  }
  func.func @transform_13(%arg0: i32) -> (i32, i32) {
    %c0_i32 = arith.constant 0 : i32
    %c0_i32_0 = arith.constant 0 : i32
    %c0_i32_1 = arith.constant 0 : i32
    return %c0_i32, %c0_i32_0 : i32, i32
  }
  func.func @transform_14(%arg0: i32) -> (i32, i32) {
    %c0_i32 = arith.constant 0 : i32
    %c0_i32_0 = arith.constant 0 : i32
    %c0_i32_1 = arith.constant 0 : i32
    return %c0_i32, %c0_i32_0 : i32, i32
  }
  func.func @transform_15(%arg0: i32) -> (i32, i32) {
    %c0_i32 = arith.constant 0 : i32
    %c0_i32_0 = arith.constant 0 : i32
    return %arg0, %c0_i32 : i32, i32
  }
}

</mosaic_0001>

<bundles_post_ra>
// kernel: tpu_custom_call.1
= control target key start
LH: loop header
LB: loop body
LE: loop exit
PB: predicated region body
PF: predicated region fallthrough
CT: control target
= control target key end

     0   :  { %s11602_s0 = inlined_call_operand.hbm [shape: f32[32,128], index: 0, kind: input, shape index: {}]   ;;  %s11603_s1 = inlined_call_operand.hbm [shape: f32[128,128], index: 1, kind: input, shape index: {}]   ;;  %s11604_s2 = inlined_call_operand.vmem [shape: f32[1,128], index: 2, kind: input, shape index: {}]   ;;  %s11605_s3 = inlined_call_operand.hbm [shape: f32[4,128,128], index: 3, kind: input, shape index: {}]   ;;  %s11606_s4 = inlined_call_operand.hbm [shape: f32[4,1,128], index: 4, kind: input, shape index: {}]   ;;  %s11607_s5 = inlined_call_operand.hbm [shape: f32[4,128,128], index: 5, kind: input, shape index: {}]   ;;  %s11608_s6 = inlined_call_operand.vmem [shape: f32[4,1,128], index: 6, kind: input, shape index: {}]   ;;  %s11609_s7 = inlined_call_operand.hbm [shape: f32[4,128,128], index: 7, kind: input, shape index: {}]   ;;  %s11610_s8 = inlined_call_operand.hbm [shape: f32[4,1,128], index: 8, kind: input, shape index: {}]   ;;  %s11611_s9 = inlined_call_operand.hbm [shape: f32[128,128], index: 9, kind: input, shape index: {}]   ;;  %s11612_s10 = inlined_call_operand.vmem [shape: f32[1,128], index: 10, kind: input, shape index: {}]   ;;  %s11613_s11 = inlined_call_operand.hbm [shape: f32[128,128], index: 11, kind: input, shape index: {}]   ;;  %s11614_s12 = inlined_call_operand.vmem [shape: f32[1,128], index: 12, kind: input, shape index: {}]   ;;  %s11615_s13 = inlined_call_operand.hbm [shape: f32[128,128], index: 13, kind: input, shape index: {}]   ;;  %s11616_s14 = inlined_call_operand.vmem [shape: f32[1,128], index: 14, kind: input, shape index: {}]   ;;  %s11617_s15 = inlined_call_operand.hbm [shape: f32[32,128], index: 15, kind: output, shape index: {}]  }
   0x1   :  { %11623 = sst [smem:[#allocation27_spill]] %s11603_s1 }
   0x2   :  { %11624 = sst [smem:[#allocation28_spill]] %s11605_s3 }
   0x3   :  { %11625 = sst [smem:[#allocation29_spill]] %s11606_s4 }
   0x4   :  { %11626 = sst [smem:[#allocation30_spill]] %s11607_s5 }
   0x5   :  { %11627 = sst [smem:[#allocation31_spill]] %s11609_s7 }
   0x6   :  { %11628 = sst [smem:[#allocation32_spill]] %s11612_s10 }
   0x7   :  { %11629 = sst [smem:[#allocation33_spill]] %s11614_s12 }
   0x8   :  { %11630 = sst [smem:[#allocation34_spill]] %s11616_s14 }
   0x9   :  { %11631 = sst [smem:[#allocation35_spill]] %s11617_s15 }
   0xa   :  { %20 = vsyncpa [#allocation3], 0 }
   0xb   :  { %22 = vsyncpa [#allocation3 + $0x1], 0 }
   0xc   :  { %23 = vsyncpa [#allocation6], 0 }
   0xd   :  { %24 = vsyncpa [#allocation9], 0 }
   0xe   :  { %25 = vsyncpa [#allocation12], 0 }
   0xf   :  { %26 = vsyncpa [#allocation15], 0 }
  0x10   :  { %27 = vsyncpa [#allocation18], 0 }
  0x11   :  { %28 = vsyncpa [#allocation4], 0 }
  0x12   :  { %30 = vsyncpa [#allocation4 + $0x1], 0  ;;  %s7850_s18 = smov 0   ;;  %s7852_s19 = smov 0  }
  0x13   :  { %s7854_s20 = smov 0   ;;  %s7856_s21 = smov 0  }
  0x14 LB: > { %s11632_s1 = sld [smem:[#allocation27_spill]]  ;;  %s7874_s25 = sadd.s32 4294967295, %s7753_s21   ;;  %s7753_s21 = sphi %s7856_s21, %s11655_s21   ;;  %s7749_s20 = sphi %s7854_s20, %s11654_s20   ;;  %s7745_s19 = sphi %s7852_s19, %s11653_s19   ;;  %s7741_s18 = sphi %s7850_s18, %s11652_s18  }
  0x15   : > { %p7172_p0 = scmp.ge.s32.totalorder %s7753_s21, 1  ;;  %p57_p1 = scmp.eq.s32.totalorder %s7874_s25, 0 }
  0x16   : > { %p387_p2 = scmp.lt.s32.totalorder %s7753_s21, 3  ;;  %s7755_s27 = smov [#allocation5]  }
  0x17   : > { %s400_s28 = sshll.u32 %s7755_s27, 4  ;;  %s11634_s4 = sld [smem:[#allocation29_spill]]  ;;  %s401_s28 = int_to_ptr.vmem [resolvable:$true] %s400_s28 }
  0x18   : > { %p7879_p3 = pnand %p7172_p0, %p387_p2  ;;  %s7756_s22 = smov [#allocation8]  }
  0x19   : > { %s431_s23 = sshll.u32 %s7756_s22, 4  ;;  %s11621_s27 = smov 128   ;;  %s432_s23 = int_to_ptr.vmem [resolvable:$true] %s431_s23 }
  0x1a   : > { %s398_s24 = sshll.u32 %s11632_s1, 4  ;;  %p7248_p4 = pneg %p7879_p3  ;;  %s399_s24 = int_to_ptr.hbm [resolvable:$true] %s398_s24 }
  0x1b   : > { %s11622_s1 = smov 8   ;;  %s11619_s29 = smov 16  }
  0x1c   : > { %p7891_p6 = pnand %p7248_p4, %p57_p1  ;;  %s11620_s30 = smov 1  }
  0x1d   : > { %s429_s16 = sshll.u32 %s11634_s4, 4  ;;  %s11636_s7 = sld [smem:[#allocation31_spill]]  ;;  %s430_s16 = int_to_ptr.hbm [resolvable:$true] %s429_s16 }
  0x1e   : > { %7251 = dma.hbm_to_vmem [thread:$0]  (!%p7891_p6), %s399_s24, 2048, %s401_s28, [#allocation6], %s11621_s27, %s11621_s27, %s11622_s1  }
  0x1f   : > { %7257 = dma.hbm_to_vmem [thread:$0]  (!%p7891_p6), %s430_s16, 64, %s432_s23, [#allocation9], %s11619_s29, %s11619_s29, %s11620_s30  }
  0x20   : > { %s7761_s14 = smov [#allocation11]   ;;  %s488_s28 = sshll.u32 %s11611_s9, 4  ;;  %s489_s28 = int_to_ptr.hbm [resolvable:$true] %s488_s28 }
  0x21   : > { %s462_s12 = sshll.u32 %s7761_s14, 4  ;;  %s7762_s16 = smov [#allocation14]   ;;  %s463_s12 = int_to_ptr.vmem [resolvable:$true] %s462_s12 }
  0x22   : > { %s490_s23 = sshll.u32 %s7762_s16, 4  ;;  %s11637_s3 = sld [smem:[#allocation28_spill]]  ;;  %s491_s23 = int_to_ptr.vmem [resolvable:$true] %s490_s23 }
  0x23   : > { %s460_s22 = sshll.u32 %s11636_s7, 4  ;;  %s11638_s5 = sld [smem:[#allocation30_spill]]  ;;  %s461_s22 = int_to_ptr.hbm [resolvable:$true] %s460_s22 }
  0x24   : > { %7263 = dma.hbm_to_vmem [thread:$0]  (!%p7891_p6), %s461_s22, 8192, %s463_s12, [#allocation12], %s11621_s27, %s11621_s27, %s11622_s1  }
  0x25   : > { %7269 = dma.hbm_to_vmem [thread:$0]  (!%p7891_p6), %s489_s28, 2048, %s491_s23, [#allocation15], %s11621_s27, %s11621_s27, %s11622_s1  }
  0x26   : > { %s7763_s12 = smov [#allocation7]   ;;  %s7764_s29 = smov [#allocation10]  }
  0x27   : > { %s417_s22 = sshll.u32 %s7763_s12, 4  ;;  %s445_s16 = sshll.u32 %s7764_s29, 4  ;;  %s418_s22 = int_to_ptr.vmem [resolvable:$true] %s417_s22  ;;  %s446_s16 = int_to_ptr.vmem [resolvable:$true] %s445_s16 }
  0x28   : > { %s415_s15 = sshll.u32 %s11637_s3, 4  ;;  %s474_s28 = sshll.u32 %s11610_s8, 4  ;;  %s416_s15 = int_to_ptr.hbm [resolvable:$true] %s415_s15  ;;  %s475_s28 = int_to_ptr.hbm [resolvable:$true] %s474_s28 }
  0x29   : > { %s443_s24 = sshll.u32 %s11638_s5, 4  ;;  %s505_s14 = sshll.u32 %s11613_s11, 4  ;;  %s444_s24 = int_to_ptr.hbm [resolvable:$true] %s443_s24  ;;  %s506_s14 = int_to_ptr.hbm [resolvable:$true] %s505_s14 }
  0x2a   : > { %7254 = dma.hbm_to_vmem [thread:$0]  (!%p7891_p6), %s416_s15, 8192, %s418_s22, [#allocation6], %s11621_s27, %s11621_s27, %s11622_s1  }
  0x2b   : > { %7260 = dma.hbm_to_vmem [thread:$0]  (!%p7891_p6), %s444_s24, 8192, %s446_s16, [#allocation9], %s11621_s27, %s11621_s27, %s11622_s1  }
  0x2c   : > { %s7765_s15 = smov [#allocation13]   ;;  %s11639_s30 = smov 1  }
  0x2d   : > { %s476_s12 = sshll.u32 %s7765_s15, 4  ;;  %s11640_s22 = smov 16   ;;  %s477_s12 = int_to_ptr.vmem [resolvable:$true] %s476_s12 }
  0x2e   : > { %7266 = dma.hbm_to_vmem [thread:$0]  (!%p7891_p6), %s475_s28, 64, %s477_s12, [#allocation12], %s11640_s22, %s11640_s22, %s11639_s30  }
  0x2f   : > { %s7766_s24 = smov [#allocation16]   ;;  %s522_s23 = sshll.u32 %s11615_s13, 4  ;;  %s523_s23 = int_to_ptr.hbm [resolvable:$true] %s522_s23 }
  0x30   : > { %s507_s29 = sshll.u32 %s7766_s24, 4  ;;  %s7767_s28 = smov [#allocation17]   ;;  %s508_s29 = int_to_ptr.vmem [resolvable:$true] %s507_s29 }
  0x31   : > { %7272 = dma.hbm_to_vmem [thread:$0]  (!%p7891_p6), %s506_s14, 2048, %s508_s29, [#allocation15], %s11621_s27, %s11621_s27, %s11622_s1  }
  0x32   : > { %s524_s10 = sshll.u32 %s7767_s28, 4  ;;  %s7171_s15 = sadd.s32 4294967294, %s7753_s21   ;;  %s525_s10 = int_to_ptr.vmem [resolvable:$true] %s524_s10 }
  0x33   : > { %7275 = dma.hbm_to_vmem [thread:$0]  (!%p7891_p6), %s523_s23, 2048, %s525_s10, [#allocation18], %s11621_s27, %s11621_s27, %s11622_s1  }
  0x34   : > { %s7963_s12 = sadd.s32 1, %s7753_s21   ;;  %s43_s30 = sadd.s32 1, %s7749_s20 }
  0x35   : > { %s40_s22 = ssub.s32 %s7753_s21, %s7963_s12  ;;  %p50_p7 = scmp.ne.s32.totalorder %s7749_s20, %s7745_s19 }
  0x36   : > { %p41_p8 = scmp.eq.s32.totalorder %s40_s22, 0  ;;  %p51_p9 = scmp.eq.s32.totalorder %s7753_s21, 0 }
  0x37   : > { %p56_p10 = scmp.ne.s32.totalorder %s7745_s19, %s7741_s18  ;;  %p374_p11 = scmp.eq.s32.totalorder %s7874_s25, 1 }
  0x38   : > { %s7975_s14 = scalar_select %p41_p8, %s7749_s20, %s43_s30  }
  0x39   : > { %p7979_p12 = por %p57_p1, %p56_p10  ;;  %p7983_p13 = por %p374_p11, %p50_p7 }
  0x3a   : > { %p380_p0 = scmp.eq.s32.totalorder %s7171_s15, 1  ;;  %p52_p2 = por %p51_p9, %p50_p7 }
  0x3b   : > { %s541_s29 = sand.u32 1, %s7749_s20   ;;  %p7293_p6 = scmp.lt.s32.totalorder %s7753_s21, 2 }
  0x3c   : > { %p7988_p4 = por %p380_p0, %p56_p10  ;;  %s7183_s4 = sshll.u32 %s541_s29, 4 }
  0x3d   : > { %s7206_s23 = sshll.u32 %s7753_s21, 4  ;;  %s545_s27 = scalar_lea.vmem [#allocation2], %s7183_s4 }
  0x3e   : > { %s550_s30 = scalar_lea.hbm %s11602_s0, %s7206_s23  ;;  %s553_s1 = sshll.u32 %s545_s27, 4  ;;  %s554_s1 = int_to_ptr.vmem [resolvable:$true] %s553_s1 }
  0x3f   : > { %s551_s22 = sshll.u32 %s550_s30, 4  ;;  %p7997_p8 = pnand %p7293_p6, %p52_p2  ;;  %s552_s22 = int_to_ptr.hbm [resolvable:$true] %s551_s22 }
  0x40   : > { %s542_s3 = scalar_lea.sflag [#allocation3], %s541_s29  ;;  %s7637_s5 = sshra.s32 %s552_s22, 4  ;;  %s7638_s5 = int_to_ptr.hbm [resolvable:$true] %s7637_s5 }
  0x41   : > { %s7639_s7 = scalar_lea.hbm %s7638_s5, 16  ;;  %p7641_p9 = pneg %p7997_p8 }
  0x42   : > { %p7640_p7 = scmp.ne.s32.totalorder %s7638_s5, %s7639_s7  ;;  %s7644_s27 = scalar_lea.hbm %s11602_s0, 32 }
  0x43   : > { %p7645_p0 = scmp.lt.s32.totalorder %s7638_s5, %s11602_s0  ;;  %p7646_p2 = scmp.lt.s32.totalorder %s7644_s27, %s7639_s7 }
  0x44   : > { %p7642_p10 = pnand %p7641_p9, %p7640_p7 }
  0x45   : > { %p7647_p6 = por %p7646_p2, %p7645_p0 }
  0x46   : > { %p7643_p11 = pneg %p7642_p10 }
  0x48   : > { %p7648_p5 = pnand %p7647_p6, %p7643_p11 }
  0x4a   : > { %7651 = shalt.err (!%p7648_p5)
}
  0x4b   : > { %s11645_s29 = smov 8   ;;  %s11646_s30 = smov 128  }
  0x4c   : > { %7279 = dma.hbm_to_vmem [thread:$0]  (!%p7997_p8), %s552_s22, 256, %s554_s1, %s542_s3, %s11646_s30, %s11646_s30, %s11645_s29  }
  0x4d   : > { %565 = sbr.rel (%p7879_p3) target bundleno = 2731 (0xaab), region = 80  ;;  %s8017_s23 = sand.u32 (!%p7879_p3), 1, %s7745_s19  }
  0x4e   : > { %s7187_s5 = sshll.u32 (!%p7879_p3), %s8017_s23, 4  ;;  %s568_s7 = scalar_lea.sflag (!%p7879_p3), [#allocation3], %s8017_s23 }
  0x4f   : > { %s8023_s28 = scalar_lea.vmem (!%p7879_p3), [#allocation2], %s7187_s5 }
  0x52   : > { %7712 = dma.done.wait (%p7979_p12), %s568_s7, 256  }
  0x53   : > { %7714 = vsyncadd (%p7979_p12), %s568_s7, 4294967040 }
  0x54   : > { %7716 = dma.done.wait (%p57_p1), [#allocation6], 10240  }
  0x55   : > { %7718 = vsyncadd (%p57_p1), [#allocation6], 4294957056 }
  0x56   : > { %7720 = dma.done.wait (%p57_p1), [#allocation9], 8256  }
  0x57   : > { %7722 = vsyncadd (%p57_p1), [#allocation9], 4294959040 }
  0x58   : > { %7724 = dma.done.wait (%p57_p1), [#allocation12], 8256  }
  0x59   : > { %7726 = vsyncadd (%p57_p1), [#allocation12], 4294959040 }
  0x5a   : > { %7728 = dma.done.wait (%p57_p1), [#allocation15], 4096  }
  0x5b   : > { %7730 = vsyncadd (%p57_p1), [#allocation15], 4294963200 }
  0x5c   : > { %7732 = dma.done.wait (%p57_p1), [#allocation18], 2048  }
  0x5d   : > { %7734 = vsyncadd (%p57_p1), [#allocation18], 4294965248  ;;  %v683_v0 = vld [vmem:[#allocation5 + $0x78] sm:$0xff]  ;;  %v682_v1 = vld [vmem:[#allocation5 + $0x70] sm:$0xff]  ;;  %s11648_s26 = sld [smem:[#allocation33_spill]]  ;;  %s7207_s27 = sshll.u32 %s7874_s25, 4 }
  0x5e   : > { %v681_v2 = vld [vmem:[#allocation5 + $0x68] sm:$0xff]  ;;  %v8049_v3 = vand.u32 4294901760, %v683_v0  ;;  %v8051_v4 = vand.u32 4294901760, %v682_v1  ;;  %v680_v6 = vld [vmem:[#allocation5 + $0x60] sm:$0xff]  ;;  %v679_v7 = vld [vmem:[#allocation5 + $0x58] sm:$0xff]  ;;  %s11649_s15 = sld [smem:[#allocation34_spill]] }
  0x5f   : > { %v8053_v5 = vand.u32 4294901760, %v681_v2  ;;  %v678_v8 = vld [vmem:[#allocation5 + $0x50] sm:$0xff]  ;;  %v8055_v9 = vand.u32 4294901760, %v680_v6  ;;  %v8057_v10 = vand.u32 4294901760, %v679_v7  ;;  %v677_v12 = vld [vmem:[#allocation5 + $0x48] sm:$0xff]  ;;  %v676_v13 = vld [vmem:[#allocation5 + $0x40] sm:$0xff] }
  0x60   : > { %v8059_v11 = vand.u32 4294901760, %v678_v8  ;;  %689 = vmatpush.msra.mxu0 %v8049_v3  ;;  %v8063_v14 = vsub.f32 %v683_v0, %v8049_v3  ;;  %v8066_v15 = vsub.f32 %v682_v1, %v8051_v4  ;;  %v8068_v16 = vand.u32 4294901760, %v677_v12  ;;  %v675_v18 = vld [vmem:[#allocation5 + $0x38] sm:$0xff]  ;;  %902 = vmatpush.msra.mxu3 %v8049_v3  ;;  %v674_v25 = vld [vmem:[#allocation5 + $0x30] sm:$0xff]  ;;  %v673_v30 = vld [vmem:[#allocation5 + $0x28] sm:$0xff]  ;;  %s11650_s29 = sld [smem:[#allocation35_spill]] }
  0x61   : > { %v8071_v17 = vsub.f32 %v681_v2, %v8053_v5  ;;  %v8075_v19 = vsub.f32 %v680_v6, %v8055_v9  ;;  %v8078_v20 = vsub.f32 %v679_v7, %v8057_v10  ;;  %v8084_v24 = vand.u32 4294901760, %v676_v13  ;;  %v672_v40 = vld [vmem:[#allocation5 + $0x20] sm:$0xff]  ;;  %v671_v43 = vld [vmem:[#allocation5 + $0x18] sm:$0xff]  ;;  %v670_v52 = vld [vmem:[#allocation5 + $0x10] sm:$0xff]  ;;  %s663_s7 = scalar_lea.vmem [#allocation19], %s7187_s5  ;;  %s6997_s25 = scalar_lea.sflag [#allocation4], %s8017_s23 }
  0x62   : > { %691 = vmatpush.msra.mxu0 %v8051_v4  ;;  %v739_v21 = vand.u32 4294901760, %v8063_v14  ;;  %v745_v22 = vand.u32 4294901760, %v8066_v15  ;;  %844 = vmatpush.msra.mxu2 %v8063_v14  ;;  %v8088_v27 = vand.u32 4294901760, %v675_v18  ;;  %v8092_v29 = vsub.f32 %v678_v8, %v8059_v11  ;;  %v669_v58 = vld [vmem:[#allocation5 + $0x8] sm:$0xff]  ;;  %v666_v61 = vld [vmem:[%s8023_s28] sm:$0xff] }
  0x63   : > { %v751_v23 = vand.u32 4294901760, %v8071_v17  ;;  %v757_v26 = vand.u32 4294901760, %v8075_v19  ;;  %v763_v28 = vand.u32 4294901760, %v8078_v20  ;;  %904 = vmatpush.msra.mxu3 %v8051_v4  ;;  %v8106_v34 = vsub.f32 %v677_v12, %v8068_v16  ;;  %v668_v1 = vld [vmem:[#allocation5] sm:$0xff] }
  0x64   : > { %693 = vmatpush.msra.mxu0 %v8053_v5  ;;  %v740_v31 = vsub.f32 %v8063_v14, %v739_v21  ;;  %v746_v32 = vsub.f32 %v8066_v15, %v745_v22  ;;  %v8108_v35 = vand.u32 4294901760, %v674_v25  ;;  %847 = vmatpush.msra.mxu2 %v8066_v15  ;;  %v769_v39 = vand.u32 4294901760, %v8092_v29  ;;  %v1074_v15 = vld [vmem:[#allocation7 + $0x70] sm:$0xff] }
  0x65   : > { %v752_v33 = vsub.f32 %v8071_v17, %v751_v23  ;;  %906 = vmatpush.msra.mxu3 %v8053_v5  ;;  %v758_v38 = vsub.f32 %v8075_v19, %v757_v26  ;;  %v8117_v41 = vand.u32 4294901760, %v673_v30  ;;  %v8120_v42 = vsub.f32 %v676_v13, %v8084_v24 }
  0x66   : > { %695 = vmatpush.msra.mxu0 %v8055_v9  ;;  %v741_v36 = vand.u32 4294901760, %v740_v31  ;;  %v747_v37 = vand.u32 4294901760, %v746_v32  ;;  %850 = vmatpush.msra.mxu2 %v8071_v17  ;;  %v764_v45 = vsub.f32 %v8078_v20, %v763_v28  ;;  %v775_v46 = vand.u32 4294901760, %v8106_v34  ;;  %v667_v31 = vld [vmem:[%s8023_s28 + $0x8] sm:$0xff]  ;;  %s11647_s28 = sld [smem:[#allocation32_spill]]  ;;  %s7008_s30 = scalar_lea.hbm %s11650_s29, %s7207_s27 }
  0x67   : > { %908 = vmatpush.msra.mxu3 %v8055_v9  ;;  %v753_v44 = vand.u32 4294901760, %v752_v33  ;;  %v8130_v47 = vsub.f32 %v675_v18, %v8088_v27  ;;  %v8132_v48 = vand.u32 4294901760, %v672_v40  ;;  %v759_v49 = vand.u32 4294901760, %v758_v38  ;;  %v1073_v17 = vld [vmem:[#allocation7 + $0x68] sm:$0xff]  ;;  %s7011_s1 = sshll.u32 %s7008_s30, 4  ;;  %s7687_s22 = scalar_lea.hbm %s11650_s29, 32  ;;  %s7012_s1 = int_to_ptr.hbm [resolvable:$true] %s7011_s1 }
  0x68   : > { %697 = vmatpush.msra.mxu0 %v8057_v10  ;;  %742 = vmatpush.msra.mxu1 %v741_v36  ;;  %v770_v50 = vsub.f32 %v8092_v29, %v769_v39  ;;  %v781_v51 = vand.u32 4294901760, %v8120_v42  ;;  %v8142_v53 = vsub.f32 %v674_v25, %v8108_v35  ;;  %v8144_v54 = vand.u32 4294901760, %v671_v43  ;;  %s7681_s3 = sshra.s32 %s7012_s1, 4  ;;  %s7682_s3 = int_to_ptr.hbm [resolvable:$true] %s7681_s3 }
  0x69   : > { %853 = vmatpush.msra.mxu2 %v8075_v19  ;;  %910 = vmatpush.msra.mxu3 %v8057_v10  ;;  %v765_v55 = vand.u32 4294901760, %v764_v45  ;;  %v776_v56 = vsub.f32 %v8106_v34, %v775_v46  ;;  %v787_v57 = vand.u32 4294901760, %v8130_v47  ;;  %v8154_v59 = vsub.f32 %v673_v30, %v8117_v41  ;;  %p7688_p12 = scmp.lt.s32.totalorder %s7682_s3, %s11650_s29 }
  0x6a   : > { %699 = vmatpush.msra.mxu0 %v8059_v11  ;;  %748 = vmatpush.msra.mxu1 %v747_v37  ;;  %v8156_v60 = vand.u32 4294901760, %v670_v52  ;;  %v771_v62 = vand.u32 4294901760, %v770_v50  ;;  %v782_v63 = vsub.f32 %v8120_v42, %v781_v51  ;;  %v793_v0 = vand.u32 4294901760, %v8142_v53 }
  0x6b   : > { %856 = vmatpush.msra.mxu2 %v8078_v20  ;;  %912 = vmatpush.msra.mxu3 %v8059_v11  ;;  %v8167_v2 = vsub.f32 %v672_v40, %v8132_v48  ;;  %v8169_v6 = vand.u32 4294901760, %v669_v58  ;;  %v8173_v7 = vsub.f32 %v671_v43, %v8144_v54  ;;  %v777_v8 = vand.u32 4294901760, %v776_v56 }
  0x6c   : > { %701 = vmatpush.msra.mxu0 %v8068_v16  ;;  %754 = vmatpush.msra.mxu1 %v753_v44  ;;  %v788_v12 = vsub.f32 %v8130_v47, %v787_v57  ;;  %v799_v13 = vand.u32 4294901760, %v8154_v59  ;;  %v8181_v18 = vand.u32 4294901760, %v666_v61  ;;  %v8183_v25 = vand.u32 4294901760, %v668_v1 }
  0x6d   : > { %859 = vmatpush.msra.mxu2 %v8092_v29  ;;  %914 = vmatpush.msra.mxu3 %v8068_v16  ;;  %v8187_v30 = vsub.f32 %v670_v52, %v8156_v60  ;;  %v783_v32 = vand.u32 4294901760, %v782_v63  ;;  %v794_v33 = vsub.f32 %v8142_v53, %v793_v0  ;;  %v805_v36 = vand.u32 4294901760, %v8167_v2 }
  0x6e   : > { %703 = vmatpush.msra.mxu0 %v8084_v24  ;;  %760 = vmatpush.msra.mxu1 %v759_v49  ;;  %v8197_v37 = vsub.f32 %v666_v61, %v8181_v18  ;;  %v811_v38 = vand.u32 4294901760, %v8173_v7  ;;  %v8202_v40 = vsub.f32 %v669_v58, %v8169_v6  ;;  %v789_v43 = vand.u32 4294901760, %v788_v12 }
  0x6f   : > { %862 = vmatpush.msra.mxu2 %v8106_v34  ;;  %916 = vmatpush.msra.mxu3 %v8084_v24  ;;  %v800_v44 = vsub.f32 %v8154_v59, %v799_v13  ;;  %v8210_v49 = vand.u32 4294901760, %v667_v31  ;;  %v795_v50 = vand.u32 4294901760, %v794_v33  ;;  %v806_v52 = vsub.f32 %v8167_v2, %v805_v36 }
  0x70   : > { %705 = vmatpush.msra.mxu0 %v8088_v27  ;;  %766 = vmatpush.msra.mxu1 %v765_v55  ;;  %v722_v45 = vand.u32 4294901760, %v8197_v37  ;;  %v817_v55 = vand.u32 4294901760, %v8187_v30  ;;  %v8220_v56 = vsub.f32 %v668_v1, %v8183_v25  ;;  %v823_v58 = vand.u32 4294901760, %v8202_v40 }
  0x71   : > { %865 = vmatpush.msra.mxu2 %v8120_v42  ;;  %918 = vmatpush.msra.mxu3 %v8088_v27  ;;  %v801_v61 = vand.u32 4294901760, %v800_v44  ;;  %v807_v1 = vand.u32 4294901760, %v806_v52  ;;  %v8280_v19 = vand.u32 4294901760, %v1074_v15  ;;  %v8282_v20 = vand.u32 4294901760, %v1073_v17 }
  0x72   : > { %707 = vmatpush.msra.mxu0 %v8108_v35  ;;  %772 = vmatpush.msra.mxu1 %v771_v62  ;;  %v812_v62 = vsub.f32 %v8173_v7, %v811_v38  ;;  %v723_v63 = vsub.f32 %v8197_v37, %v722_v45  ;;  %v818_v12 = vsub.f32 %v8187_v30, %v817_v55 }
  0x73   : > { %868 = vmatpush.msra.mxu2 %v8130_v47  ;;  %920 = vmatpush.msra.mxu3 %v8108_v35  ;;  %v824_v33 = vsub.f32 %v8202_v40, %v823_v58  ;;  %v8298_v29 = vsub.f32 %v1074_v15, %v8280_v19  ;;  %v8301_v34 = vsub.f32 %v1073_v17, %v8282_v20 }
  0x74   : > { %709 = vmatpush.msra.mxu0 %v8117_v41  ;;  %778 = vmatpush.msra.mxu1 %v777_v8  ;;  %v729_v8 = vsub.f32 %v667_v31, %v8210_v49  ;;  %v813_v31 = vand.u32 4294901760, %v812_v62 }
  0x75   : > { %871 = vmatpush.msra.mxu2 %v8142_v53  ;;  %922 = vmatpush.msra.mxu3 %v8117_v41  ;;  %v1137_v47 = vand.u32 4294901760, %v8298_v29 }
  0x76   : > { %711 = vmatpush.msra.mxu0 %v8132_v48  ;;  %784 = vmatpush.msra.mxu1 %v783_v32  ;;  %v829_v32 = vand.u32 4294901760, %v8220_v56  ;;  %v730_v44 = vand.u32 4294901760, %v729_v8 }
  0x77   : > { %874 = vmatpush.msra.mxu2 %v8154_v59  ;;  %924 = vmatpush.msra.mxu3 %v8132_v48  ;;  %v1138_v59 = vsub.f32 %v8298_v29, %v1137_v47 }
  0x78   : > { %713 = vmatpush.msra.mxu0 %v8144_v54  ;;  %790 = vmatpush.msra.mxu1 %v789_v43  ;;  %v724_v43 = vand.u32 4294901760, %v723_v63  ;;  %v830_v52 = vsub.f32 %v8220_v56, %v829_v32  ;;  %v731_v62 = vsub.f32 %v729_v8, %v730_v44 }
  0x79   : > { %877 = vmatpush.msra.mxu2 %v8167_v2  ;;  %926 = vmatpush.msra.mxu3 %v8144_v54  ;;  %v1067_v2 = vld [vmem:[#allocation7 + $0x38] sm:$0xff] }
  0x7a   : > { %715 = vmatpush.msra.mxu0 %v8156_v60  ;;  %796 = vmatpush.msra.mxu1 %v795_v50  ;;  %v819_v50 = vand.u32 4294901760, %v818_v12  ;;  %v831_v63 = vand.u32 4294901760, %v830_v52  ;;  %v732_v14 = vand.u32 4294901760, %v731_v62 }
  0x7b   : > { %880 = vmatpush.msra.mxu2 %v8173_v7  ;;  %928 = vmatpush.msra.mxu3 %v8156_v60  ;;  %v8356_v7 = vand.u32 4294901760, %v1067_v2 }
  0x7c   : > { %717 = vmatpush.msra.mxu0 %v8169_v6  ;;  %802 = vmatpush.msra.mxu1 %v801_v61  ;;  %v825_v61 = vand.u32 4294901760, %v824_v33 }
  0x7d   : > { %883 = vmatpush.msra.mxu2 %v8187_v30  ;;  %930 = vmatpush.msra.mxu3 %v8169_v6  ;;  %v8367_v30 = vsub.f32 %v1067_v2, %v8356_v7 }
  0x7e   : > { %719 = vmatpush.msra.mxu0 %v8183_v25  ;;  %808 = vmatpush.msra.mxu1 %v807_v1 }
  0x7f   : > { %886 = vmatpush.msra.mxu2 %v8202_v40  ;;  %725 = vmatmul.f32.vlgmr.msra.gmra.mxu0 %v724_v43  ;;  %v1179_v43 = vand.u32 4294901760, %v8367_v30 }
  0x80   : > { %949 = vmatpush.msrb.mxu0 %v739_v21  ;;  %814 = vmatpush.msra.mxu1 %v813_v31  ;;  %v1071_v21 = vld [vmem:[#allocation7 + $0x58] sm:$0xff] }
  0x81   : > { %889 = vmatpush.msra.mxu2 %v8220_v56  ;;  %932 = vmatpush.msra.mxu3 %v8183_v25 }
  0x82   : > { %953 = vmatpush.msrb.mxu0 %v745_v22  ;;  %820 = vmatpush.msra.mxu1 %v819_v50  ;;  %v1070_v22 = vld [vmem:[#allocation7 + $0x50] sm:$0xff] }
  0x83   : > { %892 = vmatmul.f32.vlgmr.msra.gmra.mxu2 %v8197_v37  ;;  %936 = vmatmul.f32.vlgmr.msra.gmra.mxu3 %v722_v45 }
  0x84   : > { %957 = vmatpush.msrb.mxu0 %v751_v23  ;;  %826 = vmatpush.msra.mxu1 %v825_v61  ;;  %v8287_v23 = vand.u32 4294901760, %v1071_v21  ;;  %v1063_v61 = vld [vmem:[#allocation7 + $0x18] sm:$0xff] }
  0x85   : > { %v8422_v62 = vand.u32 4294901760, %v1063_v61 }
  0x86   : > { %961 = vmatpush.msrb.mxu0 %v757_v26  ;;  %832 = vmatpush.msra.mxu1 %v831_v63  ;;  %v8289_v26 = vand.u32 4294901760, %v1070_v22  ;;  %v8308_v42 = vsub.f32 %v1071_v21, %v8287_v23 }
  0x87   : > { %733 = vmatmul.f32.gmra.mxu0 %v732_v14  ;;  %834 = vmatmul.f32.vlgmr.msra.gmra.mxu1 %v8181_v18  ;;  %v8436_v15 = vsub.f32 %v1063_v61, %v8422_v62 }
  0x88   : > { %965 = vmatpush.msrb.mxu0 %v763_v28  ;;  %1020 = vmatpush.msrb.mxu1 %v8049_v3  ;;  %v1075_v3 = vld [vmem:[#allocation7 + $0x78] sm:$0xff]  ;;  %v1069_v28 = vld [vmem:[#allocation7 + $0x48] sm:$0xff]  ;;  %v1155_v45 = vand.u32 4294901760, %v8308_v42 }
  0x89   : > { %v8316_v53 = vand.u32 4294901760, %v1069_v28 }
  0x8a   : > { %969 = vmatpush.msrb.mxu0 %v769_v39  ;;  %1022 = vmatpush.msrb.mxu1 %v8051_v4  ;;  %v8278_v4 = vand.u32 4294901760, %v1075_v3  ;;  %v1156_v31 = vsub.f32 %v8308_v42, %v1155_v45 }
  0x8b   : > { %897 = vmatmul.f32.gmra.mxu2 %v729_v8  ;;  %942 = vmatmul.f32.gmra.mxu3 %v730_v44  ;;  %v1139_v8 = vand.u32 4294901760, %v1138_v59  ;;  %v1064_v44 = vld [vmem:[#allocation7 + $0x20] sm:$0xff]  ;;  %v1062_v59 = vld [vmem:[#allocation7 + $0x10] sm:$0xff] }
  0x8c   : > { %973 = vmatpush.msrb.mxu0 %v775_v46  ;;  %1024 = vmatpush.msrb.mxu1 %v8053_v5  ;;  %v1072_v5 = vld [vmem:[#allocation7 + $0x60] sm:$0xff]  ;;  %v1157_v40 = vand.u32 4294901760, %v1156_v31  ;;  %v8420_v52 = vand.u32 4294901760, %v1064_v44 }
  0x8d   : > { %1081 = vmatpush.msrb.mxu2 %v8278_v4  ;;  %v1068_v46 = vld [vmem:[#allocation7 + $0x40] sm:$0xff] }
  0x8e   : > { %977 = vmatpush.msrb.mxu0 %v781_v51  ;;  %1026 = vmatpush.msrb.mxu1 %v8055_v9  ;;  %v8285_v9 = vand.u32 4294901760, %v1072_v5  ;;  %v1143_v51 = vand.u32 4294901760, %v8301_v34 }
  0x8f   : > { %838 = vmatmul.f32.gmra.mxu1 %v8210_v49  ;;  %1083 = vmatpush.msrb.mxu2 %v8280_v19 }
  0x90   : > { %981 = vmatpush.msrb.mxu0 %v787_v57  ;;  %1028 = vmatpush.msrb.mxu1 %v8057_v10  ;;  %v8295_v10 = vsub.f32 %v1075_v3, %v8278_v4  ;;  %v8304_v39 = vsub.f32 %v1072_v5, %v8285_v9  ;;  %v1144_v37 = vsub.f32 %v8301_v34, %v1143_v51 }
  0x91   : > { %1085 = vmatpush.msrb.mxu2 %v8282_v20  ;;  %v8431_v3 = vsub.f32 %v1064_v44, %v8420_v52 }
  0x92   : > { %985 = vmatpush.msrb.mxu0 %v793_v0  ;;  %1030 = vmatpush.msrb.mxu1 %v8059_v11  ;;  %v1131_v11 = vand.u32 4294901760, %v8295_v10  ;;  %v1149_v57 = vand.u32 4294901760, %v8304_v39  ;;  %v8321_v0 = vsub.f32 %v1070_v22, %v8289_v26  ;;  %v1203_v22 = vand.u32 4294901760, %v8436_v15 }
  0x93   : > { %1087 = vmatpush.msrb.mxu2 %v8285_v9  ;;  %v1197_v21 = vand.u32 4294901760, %v8431_v3 }
  0x94   : > { %989 = vmatpush.msrb.mxu0 %v799_v13  ;;  %1032 = vmatpush.msrb.mxu1 %v8068_v16  ;;  %v1132_v16 = vsub.f32 %v8295_v10, %v1131_v11  ;;  %v8332_v13 = vand.u32 4294901760, %v1068_v46  ;;  %v1150_v1 = vsub.f32 %v8304_v39, %v1149_v57  ;;  %v1161_v12 = vand.u32 4294901760, %v8321_v0 }
  0x95   : > { %1089 = vmatpush.msrb.mxu2 %v8287_v23 }
  0x96   : > { %993 = vmatpush.msrb.mxu0 %v805_v36  ;;  %1034 = vmatpush.msrb.mxu1 %v8084_v24  ;;  %v1133_v24 = vand.u32 4294901760, %v1132_v16  ;;  %v8343_v36 = vsub.f32 %v1069_v28, %v8316_v53  ;;  %v1162_v33 = vsub.f32 %v8321_v0, %v1161_v12  ;;  %v1198_v16 = vsub.f32 %v8431_v3, %v1197_v21 }
  0x97   : > { %1091 = vmatpush.msrb.mxu2 %v8289_v26 }
  0x98   : > { %997 = vmatpush.msrb.mxu0 %v811_v38  ;;  %1036 = vmatpush.msrb.mxu1 %v8088_v27  ;;  %v8354_v27 = vsub.f32 %v1068_v46, %v8332_v13  ;;  %v1145_v38 = vand.u32 4294901760, %v1144_v37  ;;  %v1163_v56 = vand.u32 4294901760, %v1162_v33  ;;  %v1060_v33 = vld [vmem:[#allocation7] sm:$0xff] }
  0x99   : > { %1134 = vmatpush.msrb.mxu3 %v1133_v24  ;;  %1093 = vmatpush.msrb.mxu2 %v8316_v53  ;;  %v1204_v24 = vsub.f32 %v8436_v15, %v1203_v22 }
  0x9a   : > { %1001 = vmatpush.msrb.mxu0 %v817_v55  ;;  %1038 = vmatpush.msrb.mxu1 %v8108_v35  ;;  %v1167_v35 = vand.u32 4294901760, %v8343_v36  ;;  %v1151_v55 = vand.u32 4294901760, %v1150_v1  ;;  %v1061_v1 = vld [vmem:[#allocation7 + $0x8] sm:$0xff] }
  0x9b   : > { %1140 = vmatpush.msrb.mxu3 %v1139_v8  ;;  %1095 = vmatpush.msrb.mxu2 %v8332_v13  ;;  %v8460_v8 = vand.u32 4294901760, %v1062_v59 }
  0x9c   : > { %1005 = vmatpush.msrb.mxu0 %v823_v58  ;;  %1040 = vmatpush.msrb.mxu1 %v8117_v41  ;;  %v1173_v41 = vand.u32 4294901760, %v8354_v27  ;;  %v1168_v58 = vsub.f32 %v8343_v36, %v1167_v35 }
  0x9d   : > { %1146 = vmatpush.msrb.mxu3 %v1145_v38  ;;  %1097 = vmatpush.msrb.mxu2 %v8356_v7  ;;  %v1199_v38 = vand.u32 4294901760, %v1198_v16  ;;  %v1208_v31 = vsub.f32 %v1062_v59, %v8460_v8 }
  0x9e   : > { %1009 = vmatpush.msrb.mxu0 %v829_v32  ;;  %1042 = vmatpush.msrb.mxu1 %v8132_v48  ;;  %v1174_v48 = vsub.f32 %v8354_v27, %v1173_v41  ;;  %v1180_v32 = vsub.f32 %v8367_v30, %v1179_v43 }
  0x9f   : > { %1011 = vmatmul.f32.vlgmr.msrb.gmra.mxu0 %v8181_v18  ;;  %1152 = vmatpush.msrb.mxu3 %v1151_v55  ;;  %v8466_v55 = vand.u32 4294901760, %v1061_v1 }
  0xa0   : > { %1044 = vmatpush.msrb.mxu1 %v8144_v54  ;;  %1236 = vmatpush.msra.mxu0 %v8295_v10  ;;  %v1169_v54 = vand.u32 4294901760, %v1168_v58  ;;  %v1209_v58 = vand.u32 4294901760, %v1208_v31 }
  0xa1   : > { %1158 = vmatpush.msrb.mxu3 %v1157_v40  ;;  %v1205_v40 = vand.u32 4294901760, %v1204_v24 }
  0xa2   : > { %1046 = vmatpush.msrb.mxu1 %v8156_v60  ;;  %1239 = vmatpush.msra.mxu0 %v8298_v29  ;;  %v1175_v60 = vand.u32 4294901760, %v1174_v48  ;;  %v1110_v48 = vand.u32 4294901760, %v1060_v33 }
  0xa3   : > { %1164 = vmatpush.msrb.mxu3 %v1163_v56  ;;  %v1214_v56 = vsub.f32 %v1061_v1, %v8466_v55 }
  0xa4   : > { %1048 = vmatpush.msrb.mxu1 %v8169_v6  ;;  %1242 = vmatpush.msra.mxu0 %v8301_v34  ;;  %v1181_v6 = vand.u32 4294901760, %v1180_v32 }
  0xa5   : > { %1170 = vmatpush.msrb.mxu3 %v1169_v54  ;;  %v1210_v54 = vsub.f32 %v1208_v31, %v1209_v58  ;;  %v1215_v32 = vand.u32 4294901760, %v1214_v56 }
  0xa6   : > { %1050 = vmatpush.msrb.mxu1 %v8183_v25  ;;  %1245 = vmatpush.msra.mxu0 %v8304_v39  ;;  %v1065_v25 = vld [vmem:[#allocation7 + $0x28] sm:$0xff] }
  0xa7   : > { %1015 = vmatmul.f32.gmra.mxu0 %v8210_v49  ;;  %1052 = vmatmul.f32.vlgmr.msrb.gmra.mxu1 %v8181_v18  ;;  %v1066_v18 = vld [vmem:[#allocation7 + $0x30] sm:$0xff] }
  0xa8   : > { %1294 = vmatpush.msra.mxu1 %v8278_v4  ;;  %1248 = vmatpush.msra.mxu0 %v8308_v42  ;;  %v8416_v50 = vand.u32 4294901760, %v1066_v18 }
  0xa9   : > { %1176 = vmatpush.msrb.mxu3 %v1175_v60  ;;  %v1220_v60 = vsub.f32 %v1060_v33, %v1110_v48 }
  0xaa   : > { %1296 = vmatpush.msra.mxu1 %v8280_v19  ;;  %1251 = vmatpush.msra.mxu0 %v8321_v0  ;;  %v8425_v63 = vsub.f32 %v1066_v18, %v8416_v50  ;;  %v1216_v18 = vsub.f32 %v1214_v56, %v1215_v32 }
  0xab   : > { %1182 = vmatpush.msrb.mxu3 %v1181_v6  ;;  %1099 = vmatpush.msrb.mxu2 %v8416_v50  ;;  %v1211_v6 = vand.u32 4294901760, %v1210_v54 }
  0xac   : > { %1298 = vmatpush.msra.mxu1 %v8282_v20  ;;  %1254 = vmatpush.msra.mxu0 %v8343_v36  ;;  %v1185_v17 = vand.u32 4294901760, %v8425_v63  ;;  %v1217_v44 = vand.u32 4294901760, %v1216_v18 }
  0xae   : > { %1300 = vmatpush.msra.mxu1 %v8285_v9  ;;  %1257 = vmatpush.msra.mxu0 %v8354_v27  ;;  %v1186_v28 = vsub.f32 %v8425_v63, %v1185_v17 }
  0xaf   : > { %1056 = vmatmul.f32.gmra.mxu1 %v8210_v49  ;;  %v8418_v49 = vand.u32 4294901760, %v1065_v25 }
  0xb0   : > { %1302 = vmatpush.msra.mxu1 %v8287_v23  ;;  %1260 = vmatpush.msra.mxu0 %v8367_v30  ;;  %v1187_v37 = vand.u32 4294901760, %v1186_v28  ;;  %v1469_v30 = vld [vmem:[#allocation10 + $0x78] sm:$0xff] }
  0xb1   : > { %v8428_v14 = vsub.f32 %v1065_v25, %v8418_v49  ;;  %1101 = vmatpush.msrb.mxu2 %v8418_v49  ;;  %v1221_v25 = vand.u32 4294901760, %v1220_v60 }
  0xb2   : > { %1304 = vmatpush.msra.mxu1 %v8289_v26  ;;  %1263 = vmatpush.msra.mxu0 %v8425_v63  ;;  %v1465_v63 = vld [vmem:[#allocation10 + $0x58] sm:$0xff] }
  0xb3   : > { %v1191_v5 = vand.u32 4294901760, %v8428_v14  ;;  %1103 = vmatpush.msrb.mxu2 %v8420_v52  ;;  %1188 = vmatpush.msrb.mxu3 %v1187_v37  ;;  %v1222_v61 = vsub.f32 %v1220_v60, %v1221_v25 }
  0xb4   : > { %1306 = vmatpush.msra.mxu1 %v8316_v53  ;;  %1266 = vmatpush.msra.mxu0 %v8428_v14 }
  0xb5   : > { %v1192_v46 = vsub.f32 %v8428_v14, %v1191_v5  ;;  %1105 = vmatpush.msrb.mxu2 %v8422_v62  ;;  %v1223_v28 = vand.u32 4294901760, %v1222_v61 }
  0xb6   : > { %1308 = vmatpush.msra.mxu1 %v8332_v13  ;;  %1269 = vmatpush.msra.mxu0 %v8431_v3 }
  0xb7   : > { %v1193_v2 = vand.u32 4294901760, %v1192_v46  ;;  %1107 = vmatpush.msrb.mxu2 %v8460_v8 }
  0xb8   : > { %1310 = vmatpush.msra.mxu1 %v8356_v7  ;;  %1272 = vmatpush.msra.mxu0 %v8436_v15 }
  0xb9   : > { %1194 = vmatpush.msrb.mxu3 %v1193_v2  ;;  %1109 = vmatpush.msrb.mxu2 %v8466_v55 }
  0xba   : > { %1312 = vmatpush.msra.mxu1 %v8416_v50  ;;  %1275 = vmatpush.msra.mxu0 %v1208_v31 }
  0xbb   : > { %1200 = vmatpush.msrb.mxu3 %v1199_v38  ;;  %1111 = vmatpush.msrb.mxu2 %v1110_v48 }
  0xbc   : > { %1314 = vmatpush.msra.mxu1 %v8418_v49  ;;  %1278 = vmatpush.msra.mxu0 %v1214_v56 }
  0xbd   : > { %1341 = vmatpush.msra.mxu2 %v1131_v11  ;;  %1206 = vmatpush.msrb.mxu3 %v1205_v40 }
  0xbe   : > { %1316 = vmatpush.msra.mxu1 %v8420_v52  ;;  %1281 = vmatpush.msra.mxu0 %v1220_v60 }
  0xbf   : > { %1345 = vmatpush.msra.mxu2 %v1137_v47  ;;  %1212 = vmatpush.msrb.mxu3 %v1211_v6 }
  0xc0   : > { %1318 = vmatpush.msra.mxu1 %v8422_v62 }
  0xc1   : > { %1349 = vmatpush.msra.mxu2 %v1143_v51  ;;  %1218 = vmatpush.msrb.mxu3 %v1217_v44 }
  0xc2   : > { %1320 = vmatpush.msra.mxu1 %v8460_v8 }
  0xc3   : > { %1353 = vmatpush.msra.mxu2 %v1149_v57  ;;  %1224 = vmatpush.msrb.mxu3 %v1223_v28 }
  0xc4   : > { %1322 = vmatpush.msra.mxu1 %v8466_v55 }
  0xc5   : > { %1412 = vmatpush.msra.mxu3 %v8278_v4  ;;  %1357 = vmatpush.msra.mxu2 %v1155_v45 }
  0xc6   : > { %1324 = vmatpush.msra.mxu1 %v1110_v48 }
  0xc7   : > { %1414 = vmatpush.msra.mxu3 %v8280_v19  ;;  %1361 = vmatpush.msra.mxu2 %v1161_v12 }
  0xc9   : > { %1416 = vmatpush.msra.mxu3 %v8282_v20  ;;  %1365 = vmatpush.msra.mxu2 %v1167_v35  ;;  %v7351_v20 = vld [vmem:[%s11604_s2] ss:$0 sm:$0xff] }
  0xcb   : > { %1418 = vmatpush.msra.mxu3 %v8285_v9  ;;  %1369 = vmatpush.msra.mxu2 %v1173_v41  ;;  %v1468_v41 = vld [vmem:[#allocation10 + $0x70] sm:$0xff] }
  0xcd   : > { %1420 = vmatpush.msra.mxu3 %v8287_v23  ;;  %1373 = vmatpush.msra.mxu2 %v1179_v43  ;;  %v1467_v43 = vld [vmem:[#allocation10 + $0x68] sm:$0xff] }
  0xcf   : > { %1422 = vmatpush.msra.mxu3 %v8289_v26  ;;  %1377 = vmatpush.msra.mxu2 %v1185_v17  ;;  %v8534_v17 = vand.u32 4294901760, %v1465_v63 }
  0xd1   : > { %1424 = vmatpush.msra.mxu3 %v8316_v53  ;;  %1381 = vmatpush.msra.mxu2 %v1191_v5  ;;  %v8553_v2 = vsub.f32 %v1465_v63, %v8534_v17  ;;  %v1458_v63 = vld [vmem:[#allocation10 + $0x20] sm:$0xff] }
  0xd3   : > { %1426 = vmatpush.msra.mxu3 %v8332_v13  ;;  %1385 = vmatpush.msra.mxu2 %v1197_v21  ;;  %v1549_v56 = vand.u32 4294901760, %v8553_v2 }
  0xd5   : > { %1428 = vmatpush.msra.mxu3 %v8356_v7  ;;  %1389 = vmatpush.msra.mxu2 %v1203_v22 }
  0xd7   : > { %1430 = vmatpush.msra.mxu3 %v8416_v50  ;;  %1393 = vmatpush.msra.mxu2 %v1209_v58  ;;  %v8526_v50 = vand.u32 4294901760, %v1469_v30 }
  0xd9   : > { %1432 = vmatpush.msra.mxu3 %v8418_v49  ;;  %1397 = vmatpush.msra.mxu2 %v1215_v32  ;;  %v8528_v49 = vand.u32 4294901760, %v1468_v41  ;;  %v8537_v21 = vsub.f32 %v1469_v30, %v8526_v50 }
  0xda   : > { %1475 = vmatpush.msrb.mxu0 %v8526_v50 }
  0xdb   : > { %1434 = vmatpush.msra.mxu3 %v8420_v52  ;;  %1401 = vmatpush.msra.mxu2 %v1221_v25  ;;  %v8530_v52 = vand.u32 4294901760, %v1467_v43  ;;  %v8540_v22 = vsub.f32 %v1468_v41, %v8528_v49  ;;  %v1525_v24 = vand.u32 4294901760, %v8537_v21  ;;  %v1550_v25 = vsub.f32 %v8553_v2, %v1549_v56 }
  0xdc   : > { %1477 = vmatpush.msrb.mxu0 %v8528_v49 }
  0xdd   : > { %1436 = vmatpush.msra.mxu3 %v8422_v62  ;;  %v1466_v62 = vld [vmem:[#allocation10 + $0x60] sm:$0xff]  ;;  %v8543_v46 = vsub.f32 %v1467_v43, %v8530_v52  ;;  %v1526_v33 = vsub.f32 %v8537_v21, %v1525_v24 }
  0xde   : > { %v8532_v15 = vand.u32 4294901760, %v1466_v62  ;;  %1479 = vmatpush.msrb.mxu0 %v8530_v52 }
  0xdf   : > { %1438 = vmatpush.msra.mxu3 %v8460_v8  ;;  %v1531_v8 = vand.u32 4294901760, %v8540_v22  ;;  %v1537_v1 = vand.u32 4294901760, %v8543_v46  ;;  %v1527_v54 = vand.u32 4294901760, %v1526_v33 }
  0xe0   : > { %v8550_v37 = vsub.f32 %v1466_v62, %v8532_v15  ;;  %1481 = vmatpush.msrb.mxu0 %v8532_v15 }
  0xe1   : > { %1440 = vmatpush.msra.mxu3 %v8466_v55  ;;  %v1532_v40 = vsub.f32 %v8540_v22, %v1531_v8  ;;  %v1538_v58 = vsub.f32 %v8543_v46, %v1537_v1  ;;  %1528 = vmatpush.msrb.mxu1 %v1527_v54 }
  0xe2   : > { %v1543_v55 = vand.u32 4294901760, %v8550_v37  ;;  %1483 = vmatpush.msrb.mxu0 %v8534_v17 }
  0xe3   : > { %1442 = vmatpush.msra.mxu3 %v1110_v48  ;;  %v1533_v32 = vand.u32 4294901760, %v1532_v40  ;;  %v1539_v18 = vand.u32 4294901760, %v1538_v58 }
  0xe4   : > { %v1544_v60 = vsub.f32 %v8550_v37, %v1543_v55 }
  0xe5   : > { %1534 = vmatpush.msrb.mxu1 %v1533_v32  ;;  %v1456_v32 = vld [vmem:[#allocation10 + $0x10] sm:$0xff] }
  0xe6   : > { %v1545_v61 = vand.u32 4294901760, %v1544_v60 }
  0xe7   : > { %1540 = vmatpush.msrb.mxu1 %v1539_v18 }
  0xe9   : > { %1546 = vmatpush.msrb.mxu1 %v1545_v61  ;;  %v1455_v61 = vld [vmem:[#allocation10 + $0x8] sm:$0xff] }
  0xfc   : > { %v726_v4 = vpop.f32.mrf.mxu0 }
  0xfd   : > { %v727_v23 = vadd.f32 %v7351_v20, %v726_v4  ;;  %v1551_v4 = vand.u32 4294901760, %v1550_v25  ;;  %v8676_v25 = vand.u32 4294901760, %v1456_v32 }
  0xff   : > { %1552 = vmatpush.msrb.mxu1 %v1551_v4 }
 0x104   : > { %v835_v19 = vpop.f32.mrf.mxu1  ;;  %v734_v9 = vpop.f32.mrf.mxu0 }
 0x105   : > { %v836_v10 = vadd.f32 %v835_v19, %v727_v23  ;;  %v735_v39 = vadd.f32 %v7351_v20, %v734_v9  ;;  %v1464_v19 = vld [vmem:[#allocation10 + $0x50] sm:$0xff]  ;;  %v1463_v9 = vld [vmem:[#allocation10 + $0x48] sm:$0xff] }
 0x106   : > { %v893_v26 = vpop.f32.mrf.mxu2  ;;  %v937_v34 = vpop.f32.mrf.mxu3  ;;  %v8592_v20 = vand.u32 4294901760, %v1464_v19 }
 0x107   : > { %v894_v42 = vadd.f32 %v893_v26, %v836_v10  ;;  %v8597_v26 = vand.u32 4294901760, %v1463_v9  ;;  %v1462_v10 = vld [vmem:[#allocation10 + $0x40] sm:$0xff] }
 0x108   : > { %v8595_v23 = vsub.f32 %v1464_v19, %v8592_v20  ;;  %1485 = vmatpush.msrb.mxu0 %v8592_v20 }
 0x109   : > { %v938_v47 = vadd.f32 %v937_v34, %v894_v42  ;;  %v8603_v34 = vsub.f32 %v1463_v9, %v8597_v26  ;;  %v1461_v42 = vld [vmem:[#allocation10 + $0x38] sm:$0xff]  ;;  %v1602_v9 = vsub.f32 %v1456_v32, %v8676_v25 }
 0x10a   : > { %1487 = vmatpush.msrb.mxu0 %v8597_v26 }
 0x10c   : > { %v839_v29 = vpop.f32.mrf.mxu1 }
 0x10d   : > { %v840_v51 = vadd.f32 %v839_v29, %v735_v39  ;;  %v1555_v29 = vand.u32 4294901760, %v8595_v23  ;;  %v8605_v39 = vand.u32 4294901760, %v1462_v10 }
 0x10e   : > { %v898_v53 = vpop.f32.mrf.mxu2  ;;  %v943_v36 = vpop.f32.mrf.mxu3 }
 0x10f   : > { %v899_v13 = vadd.f32 %v898_v53, %v840_v51  ;;  %v8615_v51 = vsub.f32 %v1462_v10, %v8605_v39  ;;  %v8617_v53 = vand.u32 4294901760, %v1461_v42  ;;  %1489 = vmatpush.msrb.mxu0 %v8605_v39  ;;  %v8687_v10 = vand.u32 4294901760, %v1455_v61 }
 0x111   : > { %v944_v7 = vadd.f32 %v943_v36, %v899_v13  ;;  %v1567_v36 = vand.u32 4294901760, %v8615_v51  ;;  %1491 = vmatpush.msrb.mxu0 %v8617_v53 }
 0x113   : > { %v1568_v30 = vsub.f32 %v8615_v51, %v1567_v36 }
 0x11c   : > { %v1012_v11 = vpop.f32.mrf.mxu0 }
 0x11d   : > { %v1013_v57 = vadd.f32 %v1012_v11, %v938_v47  ;;  %v1556_v11 = vsub.f32 %v8595_v23, %v1555_v29  ;;  %v1561_v47 = vand.u32 4294901760, %v8603_v34 }
 0x11f   : > { %v1562_v13 = vsub.f32 %v8603_v34, %v1561_v47 }
 0x124   : > { %v1053_v0 = vpop.f32.mrf.mxu1  ;;  %v1016_v27 = vpop.f32.mrf.mxu0 }
 0x125   : > { %v8518_v45 = vadd.f32 %v1053_v0, %v1013_v57  ;;  %v1017_v14 = vadd.f32 %v1016_v27, %v944_v7  ;;  %v1460_v57 = vld [vmem:[#allocation10 + $0x30] sm:$0xff]  ;;  %v1557_v0 = vand.u32 4294901760, %v1556_v11  ;;  %v1459_v7 = vld [vmem:[#allocation10 + $0x28] sm:$0xff] }
 0x126   : > { %v8631_v27 = vand.u32 4294901760, %v1460_v57  ;;  %v8638_v43 = vand.u32 4294901760, %v1459_v7 }
 0x127   : > { %v8521_v12 = vand.u32 4294901760, %v8518_v45  ;;  %1558 = vmatpush.msrb.mxu1 %v1557_v0  ;;  %v1603_v0 = vand.u32 4294901760, %v1602_v9 }
 0x128   : > { %v8642_v62 = vsub.f32 %v1460_v57, %v8631_v27  ;;  %1493 = vmatpush.msrb.mxu0 %v8631_v27 }
 0x129   : > { %v1113_v35 = vsub.f32 %v8518_v45, %v8521_v12  ;;  %1226 = vmatmul.f32.vlgmr.msrb.gmra.mxu3 %v8521_v12 }
 0x12a   : > { %1688 = vmatpush.msrb.mxu3 %v8526_v50  ;;  %1495 = vmatpush.msrb.mxu0 %v8638_v43 }
 0x12b   : > { %1284 = vmatmul.f32.vlgmr.msra.gmra.mxu0 %v1113_v35  ;;  %v1114_v3 = vand.u32 4294901760, %v1113_v35 }
 0x12c   : > { %v1057_v5 = vpop.f32.mrf.mxu1  ;;  %1690 = vmatpush.msrb.mxu3 %v8528_v49 }
 0x12d   : > { %v8547_v16 = vadd.f32 %v1057_v5, %v1017_v14  ;;  %1328 = vmatmul.f32.vlgmr.msra.gmra.mxu1 %v1114_v3  ;;  %v1115_v59 = vsub.f32 %v1113_v35, %v1114_v3  ;;  %v1563_v35 = vand.u32 4294901760, %v1562_v13  ;;  %v1569_v14 = vand.u32 4294901760, %v1568_v30 }
 0x12e   : > { %1692 = vmatpush.msrb.mxu3 %v8530_v52  ;;  %v8650_v5 = vsub.f32 %v1459_v7, %v8638_v43  ;;  %v1608_v7 = vsub.f32 %v1455_v61, %v8687_v10  ;;  %v1604_v30 = vsub.f32 %v1602_v9, %v1603_v0 }
 0x12f   : > { %v1120_v38 = vand.u32 4294901760, %v8547_v16  ;;  %v1116_v31 = vand.u32 4294901760, %v1115_v59  ;;  %1564 = vmatpush.msrb.mxu1 %v1563_v35  ;;  %v8652_v59 = vand.u32 4294901760, %v1458_v63 }
 0x130   : > { %1694 = vmatpush.msrb.mxu3 %v8532_v15  ;;  %v1585_v40 = vand.u32 4294901760, %v8650_v5 }
 0x131   : > { %1117 = vmatmul.f32.vlgmr.msrb.gmra.mxu2 %v1116_v31  ;;  %1230 = vmatmul.f32.gmra.mxu3 %v1120_v38  ;;  %v1121_v48 = vsub.f32 %v8547_v16, %v1120_v38  ;;  %v1457_v31 = vld [vmem:[#allocation10 + $0x18] sm:$0xff]  ;;  %v8659_v58 = vsub.f32 %v1458_v63, %v8652_v59 }
 0x132   : > { %1630 = vmatpush.msrb.mxu2 %v8537_v21  ;;  %1696 = vmatpush.msrb.mxu3 %v8534_v17  ;;  %v1586_v60 = vsub.f32 %v8650_v5, %v1585_v40 }
 0x133   : > { %1289 = vmatmul.f32.gmra.mxu0 %v1121_v48  ;;  %v1122_v6 = vand.u32 4294901760, %v1121_v48  ;;  %1570 = vmatpush.msrb.mxu1 %v1569_v14  ;;  %v1609_v14 = vand.u32 4294901760, %v1608_v7 }
 0x134   : > { %1633 = vmatpush.msrb.mxu2 %v8540_v22  ;;  %1698 = vmatpush.msrb.mxu3 %v8592_v20 }
 0x135   : > { %1334 = vmatmul.f32.gmra.mxu1 %v1122_v6  ;;  %v1123_v44 = vsub.f32 %v1121_v48, %v1122_v6  ;;  %v8661_v48 = vand.u32 4294901760, %v1457_v31  ;;  %1497 = vmatpush.msrb.mxu0 %v8652_v59  ;;  %v1591_v6 = vand.u32 4294901760, %v8659_v58 }
 0x136   : > { %1636 = vmatpush.msrb.mxu2 %v8543_v46  ;;  %1700 = vmatpush.msrb.mxu3 %v8597_v26 }
 0x137   : > { %v1124_v28 = vand.u32 4294901760, %v1123_v44  ;;  %v8674_v18 = vsub.f32 %v1457_v31, %v8661_v48  ;;  %1499 = vmatpush.msrb.mxu0 %v8661_v48  ;;  %v1592_v4 = vsub.f32 %v8659_v58, %v1591_v6 }
 0x138   : > { %1639 = vmatpush.msrb.mxu2 %v8550_v37  ;;  %1702 = vmatpush.msrb.mxu3 %v8605_v39 }
 0x139   : > { %1125 = vmatmul.f32.gmra.mxu2 %v1124_v28  ;;  %1444 = vmatmul.f32.vlgmr.msra.gmra.mxu3 %v8521_v12  ;;  %v1587_v28 = vand.u32 4294901760, %v1586_v60  ;;  %v1597_v19 = vand.u32 4294901760, %v8674_v18  ;;  %v1593_v11 = vand.u32 4294901760, %v1592_v4 }
 0x13a   : > { %1642 = vmatpush.msrb.mxu2 %v8553_v2  ;;  %1704 = vmatpush.msrb.mxu3 %v8617_v53 }
 0x13b   : > { %1501 = vmatpush.msrb.mxu0 %v8676_v25  ;;  %v1598_v57 = vsub.f32 %v8674_v18, %v1597_v19 }
 0x13c   : > { %1645 = vmatpush.msrb.mxu2 %v8595_v23  ;;  %1706 = vmatpush.msrb.mxu3 %v8631_v27 }
 0x13d   : > { %1503 = vmatpush.msrb.mxu0 %v8687_v10  ;;  %v1599_v35 = vand.u32 4294901760, %v1598_v57 }
 0x13e   : > { %1648 = vmatpush.msrb.mxu2 %v8603_v34  ;;  %1708 = vmatpush.msrb.mxu3 %v8638_v43 }
 0x140   : > { %1651 = vmatpush.msrb.mxu2 %v8615_v51  ;;  %1710 = vmatpush.msrb.mxu3 %v8652_v59 }
 0x141   : > { %1403 = vmatmul.f32.vlgmr.msra.gmra.mxu2 %v8521_v12  ;;  %1448 = vmatmul.f32.gmra.mxu3 %v1120_v38  ;;  %v8627_v12 = vsub.f32 %v1461_v42, %v8617_v53  ;;  %v1454_v42 = vld [vmem:[#allocation10] sm:$0xff] }
 0x142   : > { %1712 = vmatpush.msrb.mxu3 %v8661_v48  ;;  %v8691_v13 = vand.u32 4294901760, %v1454_v42 }
 0x143   : > { %v1573_v41 = vand.u32 4294901760, %v8627_v12  ;;  %1654 = vmatpush.msrb.mxu2 %v8627_v12 }
 0x144   : > { %1714 = vmatpush.msrb.mxu3 %v8676_v25  ;;  %v1614_v63 = vsub.f32 %v1454_v42, %v8691_v13  ;;  %1505 = vmatpush.msrb.mxu0 %v8691_v13 }
 0x145   : > { %v1574_v3 = vsub.f32 %v8627_v12, %v1573_v41  ;;  %1657 = vmatpush.msrb.mxu2 %v8642_v62 }
 0x146   : > { %1716 = vmatpush.msrb.mxu3 %v8687_v10  ;;  %v1615_v31 = vand.u32 4294901760, %v1614_v63  ;;  %1735 = vmatpush.msra.mxu0 %v1525_v24 }
 0x147   : > { %v1575_v33 = vand.u32 4294901760, %v1574_v3  ;;  %1660 = vmatpush.msrb.mxu2 %v8650_v5  ;;  %v1605_v3 = vand.u32 4294901760, %v1604_v30 }
 0x148   : > { %1718 = vmatpush.msrb.mxu3 %v8691_v13  ;;  %1739 = vmatpush.msra.mxu0 %v1531_v8 }
 0x149   : > { %1407 = vmatmul.f32.gmra.mxu2 %v1120_v38  ;;  %v1579_v38 = vand.u32 4294901760, %v8642_v62  ;;  %1576 = vmatpush.msrb.mxu1 %v1575_v33  ;;  %v1610_v33 = vsub.f32 %v1608_v7, %v1609_v14 }
 0x14a   : > { %1663 = vmatpush.msrb.mxu2 %v8659_v58  ;;  %1743 = vmatpush.msra.mxu0 %v1537_v1  ;;  %v1859_v58 = vld [vmem:[#allocation11 + $0x58] sm:$0xff] }
 0x14b   : > { %v1580_v54 = vsub.f32 %v8642_v62, %v1579_v38  ;;  %v1611_v32 = vand.u32 4294901760, %v1610_v33 }
 0x14c   : > { %1666 = vmatpush.msrb.mxu2 %v8674_v18  ;;  %1747 = vmatpush.msra.mxu0 %v1543_v55 }
 0x14d   : > { %v1581_v44 = vand.u32 4294901760, %v1580_v54  ;;  %v1616_v54 = vsub.f32 %v1614_v63, %v1615_v31 }
 0x14e   : > { %1669 = vmatpush.msrb.mxu2 %v1602_v9  ;;  %1751 = vmatpush.msra.mxu0 %v1549_v56 }
 0x14f   : > { %1582 = vmatpush.msrb.mxu1 %v1581_v44  ;;  %v1617_v60 = vand.u32 4294901760, %v1616_v54  ;;  %v8753_v44 = vand.u32 4294901760, %v1859_v58 }
 0x150   : > { %1672 = vmatpush.msrb.mxu2 %v1608_v7  ;;  %1755 = vmatpush.msra.mxu0 %v1555_v29 }
 0x151   : > { %1588 = vmatpush.msrb.mxu1 %v1587_v28 }
 0x152   : > { %1675 = vmatpush.msrb.mxu2 %v1614_v63  ;;  %1759 = vmatpush.msra.mxu0 %v1561_v47 }
 0x153   : > { %1594 = vmatpush.msrb.mxu1 %v1593_v11  ;;  %v8772_v11 = vsub.f32 %v1859_v58, %v8753_v44 }
 0x154   : > { %1763 = vmatpush.msra.mxu0 %v1567_v36 }
 0x155   : > { %1600 = vmatpush.msrb.mxu1 %v1599_v35  ;;  %v1857_v35 = vld [vmem:[#allocation11 + $0x48] sm:$0xff]  ;;  %v1943_v54 = vand.u32 4294901760, %v8772_v11 }
 0x156   : > { %1767 = vmatpush.msra.mxu0 %v1573_v41  ;;  %v1862_v41 = vld [vmem:[#allocation11 + $0x70] sm:$0xff] }
 0x157   : > { %1606 = vmatpush.msrb.mxu1 %v1605_v3 }
 0x158   : > { %1771 = vmatpush.msra.mxu0 %v1579_v38 }
 0x159   : > { %1612 = vmatpush.msrb.mxu1 %v1611_v32 }
 0x15a   : > { %1775 = vmatpush.msra.mxu0 %v1585_v40  ;;  %v1860_v40 = vld [vmem:[#allocation11 + $0x60] sm:$0xff] }
 0x15b   : > { %1618 = vmatpush.msrb.mxu1 %v1617_v60  ;;  %v8795_v60 = vand.u32 4294901760, %v1857_v35 }
 0x15c   : > { %1779 = vmatpush.msra.mxu0 %v1591_v6 }
 0x15d   : > { %1806 = vmatpush.msra.mxu1 %v8526_v50 }
 0x15e   : > { %1783 = vmatpush.msra.mxu0 %v1597_v19 }
 0x15f   : > { %1808 = vmatpush.msra.mxu1 %v8528_v49  ;;  %v7352_v49 = vld [vmem:[#allocation8] ss:$0 sm:$0xff] }
 0x160   : > { %1787 = vmatpush.msra.mxu0 %v1603_v0 }
 0x161   : > { %1810 = vmatpush.msra.mxu1 %v8530_v52 }
 0x162   : > { %1791 = vmatpush.msra.mxu0 %v1609_v14 }
 0x163   : > { %1812 = vmatpush.msra.mxu1 %v8532_v15 }
 0x164   : > { %1795 = vmatpush.msra.mxu0 %v1615_v31 }
 0x165   : > { %1814 = vmatpush.msra.mxu1 %v8534_v17 }
 0x167   : > { %1816 = vmatpush.msra.mxu1 %v8592_v20 }
 0x169   : > { %1818 = vmatpush.msra.mxu1 %v8597_v26 }
 0x16b   : > { %1820 = vmatpush.msra.mxu1 %v8605_v39 }
 0x16d   : > { %1822 = vmatpush.msra.mxu1 %v8617_v53 }
 0x16f   : > { %1824 = vmatpush.msra.mxu1 %v8631_v27  ;;  %v1863_v27 = vld [vmem:[#allocation11 + $0x78] sm:$0xff] }
 0x170   : > { %v8745_v5 = vand.u32 4294901760, %v1863_v27 }
 0x171   : > { %1826 = vmatpush.msra.mxu1 %v8638_v43  ;;  %v1861_v43 = vld [vmem:[#allocation11 + $0x68] sm:$0xff] }
 0x172   : > { %v8749_v38 = vand.u32 4294901760, %v1861_v43  ;;  %v8756_v61 = vsub.f32 %v1863_v27, %v8745_v5  ;;  %1869 = vmatpush.msra.mxu2 %v8745_v5  ;;  %v1853_v27 = vld [vmem:[#allocation11 + $0x28] sm:$0xff] }
 0x173   : > { %1828 = vmatpush.msra.mxu1 %v8652_v59  ;;  %v8747_v59 = vand.u32 4294901760, %v1862_v41 }
 0x174   : > { %v8762_v4 = vsub.f32 %v1861_v43, %v8749_v38  ;;  %v1919_v57 = vand.u32 4294901760, %v8756_v61 }
 0x175   : > { %1830 = vmatpush.msra.mxu1 %v8661_v48  ;;  %v1858_v48 = vld [vmem:[#allocation11 + $0x50] sm:$0xff]  ;;  %v8759_v28 = vsub.f32 %v1862_v41, %v8747_v59  ;;  %1871 = vmatpush.msra.mxu2 %v8747_v59 }
 0x176   : > { %v8765_v19 = vand.u32 4294901760, %v1858_v48  ;;  %v1920_v3 = vsub.f32 %v8756_v61, %v1919_v57 }
 0x177   : > { %1832 = vmatpush.msra.mxu1 %v8676_v25  ;;  %v8751_v25 = vand.u32 4294901760, %v1860_v40  ;;  %v1925_v0 = vand.u32 4294901760, %v8759_v28  ;;  %1873 = vmatpush.msra.mxu2 %v8749_v38 }
 0x178   : > { %v8779_v7 = vsub.f32 %v1858_v48, %v8765_v19 }
 0x179   : > { %1834 = vmatpush.msra.mxu1 %v8687_v10  ;;  %v8769_v42 = vsub.f32 %v1860_v40, %v8751_v25  ;;  %v1926_v31 = vsub.f32 %v8759_v28, %v1925_v0  ;;  %1875 = vmatpush.msra.mxu2 %v8751_v25  ;;  %v8856_v40 = vand.u32 4294901760, %v1853_v27 }
 0x17b   : > { %1836 = vmatpush.msra.mxu1 %v8691_v13  ;;  %v1931_v13 = vand.u32 4294901760, %v8762_v4  ;;  %v1937_v14 = vand.u32 4294901760, %v8769_v42  ;;  %1877 = vmatpush.msra.mxu2 %v8753_v44 }
 0x17d   : > { %v1932_v33 = vsub.f32 %v8762_v4, %v1931_v13  ;;  %1879 = vmatpush.msra.mxu2 %v8765_v19 }
 0x17f   : > { %1881 = vmatpush.msra.mxu2 %v8795_v60 }
 0x1a8   : > { %v1285_v22 = vpop.f32.mrf.mxu0 }
 0x1aa   : > { %v1329_v24 = vpop.f32.mrf.mxu1 }
 0x1ac   : > { %v1227_v50 = vpop.f32.mrf.mxu3 }
 0x1b0   : > { %v1290_v23 = vpop.f32.mrf.mxu0 }
 0x1b2   : > { %v1335_v39 = vpop.f32.mrf.mxu1 }
 0x1b4   : > { %v1118_v52 = vpop.f32.mrf.mxu2  ;;  %v1231_v17 = vpop.f32.mrf.mxu3 }
 0x1b5   : > { %v1119_v15 = vadd.f32 %v7352_v49, %v1118_v52  ;;  %v1938_v52 = vsub.f32 %v8769_v42, %v1937_v14 }
 0x1b7   : > { %v1228_v21 = vadd.f32 %v1227_v50, %v1119_v15  ;;  %v1921_v50 = vand.u32 4294901760, %v1920_v3  ;;  %v1949_v15 = vand.u32 4294901760, %v8779_v7  ;;  %v1851_v3 = vld [vmem:[#allocation11 + $0x18] sm:$0xff] }
 0x1b9   : > { %v1286_v2 = vadd.f32 %v1285_v22, %v1228_v21  ;;  %v8804_v21 = vsub.f32 %v1857_v35, %v8795_v60  ;;  %1922 = vmatpush.msra.mxu3 %v1921_v50  ;;  %v1933_v22 = vand.u32 4294901760, %v1932_v33  ;;  %v8881_v33 = vand.u32 4294901760, %v1851_v3 }
 0x1bb   : > { %v1330_v1 = vadd.f32 %v1329_v24, %v1286_v2  ;;  %v1955_v2 = vand.u32 4294901760, %v8804_v21  ;;  %v1939_v24 = vand.u32 4294901760, %v1938_v52 }
 0x1bc   : > { %v1126_v46 = vpop.f32.mrf.mxu2  ;;  %v1445_v55 = vpop.f32.mrf.mxu3 }
 0x1bd   : > { %v1127_v37 = vadd.f32 %v7352_v49, %v1126_v46  ;;  %v1927_v49 = vand.u32 4294901760, %v1926_v31  ;;  %v1944_v46 = vsub.f32 %v8772_v11, %v1943_v54 }
 0x1bf   : > { %v1232_v8 = vadd.f32 %v1231_v17, %v1127_v37  ;;  %1928 = vmatpush.msra.mxu3 %v1927_v49  ;;  %v1850_v49 = vld [vmem:[#allocation11 + $0x10] sm:$0xff] }
 0x1c1   : > { %v1291_v29 = vadd.f32 %v1290_v23, %v1232_v8  ;;  %v1950_v8 = vsub.f32 %v8779_v7, %v1949_v15  ;;  %1934 = vmatpush.msra.mxu3 %v1933_v22  ;;  %v8892_v22 = vand.u32 4294901760, %v1850_v49 }
 0x1c3   : > { %v1336_v51 = vadd.f32 %v1335_v39, %v1291_v29  ;;  %1940 = vmatpush.msra.mxu3 %v1939_v24 }
 0x1c4   : > { %v1404_v56 = vpop.f32.mrf.mxu2  ;;  %v1449_v62 = vpop.f32.mrf.mxu3 }
 0x1c5   : > { %v1405_v20 = vadd.f32 %v1404_v56, %v1330_v1  ;;  %v1956_v56 = vsub.f32 %v8804_v21, %v1955_v2 }
 0x1c7   : > { %v1446_v26 = vadd.f32 %v1445_v55, %v1405_v20  ;;  %v1945_v55 = vand.u32 4294901760, %v1944_v46  ;;  %v1951_v20 = vand.u32 4294901760, %v1950_v8  ;;  %v1957_v23 = vand.u32 4294901760, %v1956_v56  ;;  %v1848_v56 = vld [vmem:[#allocation11] sm:$0xff] }
 0x1c9   : > { %v1452_v34 = vmax.f32 %v1446_v26, 0.0  ;;  %1946 = vmatpush.msra.mxu3 %v1945_v55  ;;  %v1856_v26 = vld [vmem:[#allocation11 + $0x40] sm:$0xff] }
 0x1ca   : > { %v8831_v29 = vand.u32 4294901760, %v1856_v26 }
 0x1cb   : > { %v8741_v47 = vand.u32 4294901760, %v1452_v34  ;;  %1952 = vmatpush.msra.mxu3 %v1951_v20 }
 0x1cc   : > { %v1408_v53 = vpop.f32.mrf.mxu2  ;;  %v8834_v39 = vsub.f32 %v1856_v26, %v8831_v29  ;;  %1883 = vmatpush.msra.mxu2 %v8831_v29 }
 0x1cd   : > { %v1507_v36 = vsub.f32 %v1452_v34, %v8741_v47  ;;  %v1409_v12 = vadd.f32 %v1408_v53, %v1336_v51  ;;  %1620 = vmatmul.f32.vlgmr.msrb.gmra.mxu1 %v8741_v47  ;;  %1958 = vmatpush.msra.mxu3 %v1957_v23  ;;  %v1855_v34 = vld [vmem:[#allocation11 + $0x38] sm:$0xff]  ;;  %v1854_v53 = vld [vmem:[#allocation11 + $0x30] sm:$0xff] }
 0x1ce   : > { %2082 = vmatpush.msrb.mxu1 %v8745_v5  ;;  %v8836_v51 = vand.u32 4294901760, %v1855_v34 }
 0x1cf   : > { %v1450_v6 = vadd.f32 %v1449_v62, %v1409_v12  ;;  %1678 = vmatmul.f32.vlgmr.msrb.gmra.mxu2 %v1507_v36  ;;  %v1508_v18 = vand.u32 4294901760, %v1507_v36  ;;  %v8844_v12 = vand.u32 4294901760, %v1854_v53 }
 0x1d0   : > { %2084 = vmatpush.msrb.mxu1 %v8747_v59  ;;  %1885 = vmatpush.msra.mxu2 %v8836_v51 }
 0x1d1   : > { %v1453_v9 = vmax.f32 %v1450_v6, 0.0  ;;  %1722 = vmatmul.f32.vlgmr.msrb.gmra.mxu3 %v1508_v18  ;;  %v1509_v10 = vsub.f32 %v1507_v36, %v1508_v18  ;;  %v1961_v36 = vand.u32 4294901760, %v8834_v39  ;;  %v8854_v62 = vsub.f32 %v1854_v53, %v8844_v12 }
 0x1d2   : > { %2086 = vmatpush.msrb.mxu1 %v8749_v38  ;;  %1887 = vmatpush.msra.mxu2 %v8844_v12  ;;  %v8866_v18 = vsub.f32 %v1853_v27, %v8856_v40  ;;  %v1898_v53 = vand.u32 4294901760, %v1848_v56 }
 0x1d3   : > { %v1514_v30 = vand.u32 4294901760, %v1453_v9  ;;  %v1510_v63 = vand.u32 4294901760, %v1509_v10  ;;  %v1962_v41 = vsub.f32 %v8834_v39, %v1961_v36  ;;  %v1973_v6 = vand.u32 4294901760, %v8854_v62 }
 0x1d4   : > { %2088 = vmatpush.msrb.mxu1 %v8751_v25  ;;  %1889 = vmatpush.msra.mxu2 %v8856_v40 }
 0x1d5   : > { %1511 = vmatmul.f32.vlgmr.msrb.gmra.mxu0 %v1510_v63  ;;  %1624 = vmatmul.f32.gmra.mxu1 %v1514_v30  ;;  %v1515_v32 = vsub.f32 %v1453_v9, %v1514_v30  ;;  %v1963_v58 = vand.u32 4294901760, %v1962_v41  ;;  %v1852_v9 = vld [vmem:[#allocation11 + $0x20] sm:$0xff]  ;;  %v1979_v63 = vand.u32 4294901760, %v8866_v18 }
 0x1d6   : > { %2024 = vmatpush.msrb.mxu0 %v8756_v61  ;;  %2090 = vmatpush.msrb.mxu1 %v8753_v44  ;;  %v8870_v10 = vand.u32 4294901760, %v1852_v9 }
 0x1d7   : > { %1683 = vmatmul.f32.gmra.mxu2 %v1515_v32  ;;  %v1516_v17 = vand.u32 4294901760, %v1515_v32  ;;  %1964 = vmatpush.msra.mxu3 %v1963_v58  ;;  %v1980_v50 = vsub.f32 %v8866_v18, %v1979_v63 }
 0x1d8   : > { %2027 = vmatpush.msrb.mxu0 %v8759_v28  ;;  %2092 = vmatpush.msrb.mxu1 %v8765_v19  ;;  %v8879_v31 = vsub.f32 %v1852_v9, %v8870_v10 }
 0x1d9   : > { %1728 = vmatmul.f32.gmra.mxu3 %v1516_v17  ;;  %v1517_v37 = vsub.f32 %v1515_v32, %v1516_v17  ;;  %1891 = vmatpush.msra.mxu2 %v8870_v10  ;;  %v8890_v17 = vsub.f32 %v1851_v3, %v8881_v33  ;;  %v1981_v46 = vand.u32 4294901760, %v1980_v50 }
 0x1da   : > { %2030 = vmatpush.msrb.mxu0 %v8762_v4  ;;  %2094 = vmatpush.msrb.mxu1 %v8795_v60  ;;  %v1985_v52 = vand.u32 4294901760, %v8879_v31 }
 0x1db   : > { %v1518_v1 = vand.u32 4294901760, %v1517_v37  ;;  %1893 = vmatpush.msra.mxu2 %v8881_v33  ;;  %v1849_v37 = vld [vmem:[#allocation11 + $0x8] sm:$0xff]  ;;  %v1991_v8 = vand.u32 4294901760, %v8890_v17 }
 0x1dc   : > { %2033 = vmatpush.msrb.mxu0 %v8769_v42  ;;  %2096 = vmatpush.msrb.mxu1 %v8831_v29  ;;  %v1986_v24 = vsub.f32 %v8879_v31, %v1985_v52  ;;  %v8902_v55 = vand.u32 4294901760, %v1849_v37 }
 0x1dd   : > { %1519 = vmatmul.f32.gmra.mxu0 %v1518_v1  ;;  %1838 = vmatmul.f32.vlgmr.msra.gmra.mxu1 %v8741_v47  ;;  %v1996_v1 = vsub.f32 %v1850_v49, %v8892_v22  ;;  %v1992_v23 = vsub.f32 %v8890_v17, %v1991_v8 }
 0x1de   : > { %2036 = vmatpush.msrb.mxu0 %v8772_v11  ;;  %2098 = vmatpush.msrb.mxu1 %v8836_v51  ;;  %v1987_v20 = vand.u32 4294901760, %v1986_v24 }
 0x1df   : > { %1895 = vmatpush.msra.mxu2 %v8892_v22  ;;  %v1997_v26 = vand.u32 4294901760, %v1996_v1  ;;  %v1993_v27 = vand.u32 4294901760, %v1992_v23 }
 0x1e0   : > { %2039 = vmatpush.msrb.mxu0 %v8779_v7  ;;  %2100 = vmatpush.msrb.mxu1 %v8844_v12 }
 0x1e1   : > { %1897 = vmatpush.msra.mxu2 %v8902_v55  ;;  %v1998_v41 = vsub.f32 %v1996_v1, %v1997_v26 }
 0x1e2   : > { %2042 = vmatpush.msrb.mxu0 %v8804_v21  ;;  %2102 = vmatpush.msrb.mxu1 %v8856_v40 }
 0x1e3   : > { %1899 = vmatpush.msra.mxu2 %v1898_v53  ;;  %v1999_v9 = vand.u32 4294901760, %v1998_v41 }
 0x1e4   : > { %2045 = vmatpush.msrb.mxu0 %v8834_v39  ;;  %2104 = vmatpush.msrb.mxu1 %v8870_v10 }
 0x1e5   : > { %1797 = vmatmul.f32.vlgmr.msra.gmra.mxu0 %v8741_v47  ;;  %1842 = vmatmul.f32.gmra.mxu1 %v1514_v30  ;;  %v8842_v47 = vsub.f32 %v1855_v34, %v8836_v51  ;;  %v2002_v34 = vsub.f32 %v1849_v37, %v8902_v55 }
 0x1e6   : > { %2106 = vmatpush.msrb.mxu1 %v8881_v33  ;;  %2129 = vmatpush.msrb.mxu2 %v1919_v57 }
 0x1e7   : > { %v1967_v43 = vand.u32 4294901760, %v8842_v47  ;;  %2048 = vmatpush.msrb.mxu0 %v8842_v47  ;;  %v2003_v58 = vand.u32 4294901760, %v2002_v34 }
 0x1e8   : > { %2108 = vmatpush.msrb.mxu1 %v8892_v22  ;;  %2133 = vmatpush.msrb.mxu2 %v1925_v0 }
 0x1e9   : > { %v1968_v48 = vsub.f32 %v8842_v47, %v1967_v43  ;;  %2051 = vmatpush.msrb.mxu0 %v8854_v62 }
 0x1ea   : > { %2110 = vmatpush.msrb.mxu1 %v8902_v55  ;;  %2137 = vmatpush.msrb.mxu2 %v1931_v13 }
 0x1eb   : > { %v1969_v35 = vand.u32 4294901760, %v1968_v48  ;;  %2054 = vmatpush.msrb.mxu0 %v8866_v18  ;;  %v2008_v48 = vsub.f32 %v1848_v56, %v1898_v53 }
 0x1ec   : > { %2112 = vmatpush.msrb.mxu1 %v1898_v53  ;;  %2141 = vmatpush.msrb.mxu2 %v1937_v14 }
 0x1ed   : > { %1801 = vmatmul.f32.gmra.mxu0 %v1514_v30  ;;  %v1974_v30 = vsub.f32 %v8854_v62, %v1973_v6  ;;  %1970 = vmatpush.msra.mxu3 %v1969_v35  ;;  %v2004_v35 = vsub.f32 %v2002_v34, %v2003_v58  ;;  %v2258_v62 = vld [vmem:[#allocation7 + $0xe8] sm:$0xff] }
 0x1ee   : > { %2057 = vmatpush.msrb.mxu0 %v8879_v31  ;;  %2145 = vmatpush.msrb.mxu2 %v1943_v54 }
 0x1ef   : > { %v1975_v32 = vand.u32 4294901760, %v1974_v30  ;;  %v2009_v30 = vand.u32 4294901760, %v2008_v48  ;;  %v2005_v3 = vand.u32 4294901760, %v2004_v35 }
 0x1f0   : > { %2060 = vmatpush.msrb.mxu0 %v8890_v17  ;;  %2149 = vmatpush.msrb.mxu2 %v1949_v15 }
 0x1f1   : > { %1976 = vmatpush.msra.mxu3 %v1975_v32  ;;  %v2010_v32 = vsub.f32 %v2008_v48, %v2009_v30 }
 0x1f2   : > { %2063 = vmatpush.msrb.mxu0 %v1996_v1  ;;  %2153 = vmatpush.msrb.mxu2 %v1955_v2 }
 0x1f3   : > { %1982 = vmatpush.msra.mxu3 %v1981_v46  ;;  %v2011_v50 = vand.u32 4294901760, %v2010_v32 }
 0x1f4   : > { %2066 = vmatpush.msrb.mxu0 %v2002_v34  ;;  %2157 = vmatpush.msrb.mxu2 %v1961_v36 }
 0x1f5   : > { %1988 = vmatpush.msra.mxu3 %v1987_v20 }
 0x1f6   : > { %2069 = vmatpush.msrb.mxu0 %v2008_v48  ;;  %2161 = vmatpush.msrb.mxu2 %v1967_v43  ;;  %v2259_v43 = vld [vmem:[#allocation7 + $0xf0] sm:$0xff] }
 0x1f7   : > { %1994 = vmatpush.msra.mxu3 %v1993_v27  ;;  %v8959_v18 = vand.u32 4294901760, %v2259_v43 }
 0x1f8   : > { %2165 = vmatpush.msrb.mxu2 %v1973_v6 }
 0x1f9   : > { %2000 = vmatpush.msra.mxu3 %v1999_v9  ;;  %v8969_v17 = vsub.f32 %v2259_v43, %v8959_v18 }
 0x1fa   : > { %2169 = vmatpush.msrb.mxu2 %v1979_v63  ;;  %v2257_v63 = vld [vmem:[#allocation7 + $0xe0] sm:$0xff] }
 0x1fb   : > { %2006 = vmatpush.msra.mxu3 %v2005_v3  ;;  %v8963_v49 = vand.u32 4294901760, %v2257_v63  ;;  %v2323_v1 = vand.u32 4294901760, %v8969_v17 }
 0x1fc   : > { %2173 = vmatpush.msrb.mxu2 %v1985_v52 }
 0x1fd   : > { %2012 = vmatpush.msra.mxu3 %v2011_v50  ;;  %v8977_v24 = vsub.f32 %v2257_v63, %v8963_v49  ;;  %v2324_v34 = vsub.f32 %v8969_v17, %v2323_v1  ;;  %v2256_v50 = vld [vmem:[#allocation7 + $0xd8] sm:$0xff] }
 0x1fe   : > { %2177 = vmatpush.msrb.mxu2 %v1991_v8 }
 0x1ff   : > { %2200 = vmatpush.msrb.mxu3 %v8745_v5  ;;  %v2335_v23 = vand.u32 4294901760, %v8977_v24 }
 0x200   : > { %2181 = vmatpush.msrb.mxu2 %v1997_v26 }
 0x201   : > { %2202 = vmatpush.msrb.mxu3 %v8747_v59  ;;  %v7353_v59 = vld [vmem:[%s11608_s6] ss:$0 sm:$0xff]  ;;  %v2336_v48 = vsub.f32 %v8977_v24, %v2335_v23 }
 0x202   : > { %2185 = vmatpush.msrb.mxu2 %v2003_v58  ;;  %v2325_v58 = vand.u32 4294901760, %v2324_v34 }
 0x203   : > { %2204 = vmatpush.msrb.mxu3 %v8749_v38  ;;  %v2337_v3 = vand.u32 4294901760, %v2336_v48  ;;  %v2247_v48 = vld [vmem:[#allocation7 + $0x90] sm:$0xff] }
 0x204   : > { %2189 = vmatpush.msrb.mxu2 %v2009_v30 }
 0x205   : > { %2206 = vmatpush.msrb.mxu3 %v8751_v25 }
 0x207   : > { %2208 = vmatpush.msrb.mxu3 %v8753_v44 }
 0x209   : > { %2210 = vmatpush.msrb.mxu3 %v8765_v19 }
 0x20b   : > { %2212 = vmatpush.msrb.mxu3 %v8795_v60 }
 0x20d   : > { %2214 = vmatpush.msrb.mxu3 %v8831_v29 }
 0x20f   : > { %2216 = vmatpush.msrb.mxu3 %v8836_v51 }
 0x211   : > { %2218 = vmatpush.msrb.mxu3 %v8844_v12  ;;  %v2260_v12 = vld [vmem:[#allocation7 + $0xf8] sm:$0xff] }
 0x212   : > { %v8957_v6 = vand.u32 4294901760, %v2260_v12 }
 0x213   : > { %2220 = vmatpush.msrb.mxu3 %v8856_v40 }
 0x214   : > { %v8966_v52 = vsub.f32 %v2260_v12, %v8957_v6  ;;  %2267 = vmatpush.msra.mxu0 %v8957_v6 }
 0x215   : > { %2222 = vmatpush.msrb.mxu3 %v8870_v10  ;;  %v8961_v10 = vand.u32 4294901760, %v2258_v62 }
 0x216   : > { %v2317_v8 = vand.u32 4294901760, %v8966_v52  ;;  %2269 = vmatpush.msra.mxu0 %v8959_v18 }
 0x217   : > { %2224 = vmatpush.msrb.mxu3 %v8881_v33 }
 0x218   : > { %v2318_v26 = vsub.f32 %v8966_v52, %v2317_v8  ;;  %2271 = vmatpush.msra.mxu0 %v8961_v10 }
 0x219   : > { %2226 = vmatpush.msrb.mxu3 %v8892_v22  ;;  %v8972_v22 = vsub.f32 %v2258_v62, %v8961_v10 }
 0x21a   : > { %v2319_v41 = vand.u32 4294901760, %v2318_v26  ;;  %2273 = vmatpush.msra.mxu0 %v8963_v49  ;;  %v2248_v26 = vld [vmem:[#allocation7 + $0x98] sm:$0xff] }
 0x21b   : > { %2228 = vmatpush.msrb.mxu3 %v8902_v55  ;;  %v2329_v55 = vand.u32 4294901760, %v8972_v22 }
 0x21c   : > { %2320 = vmatpush.msra.mxu1 %v2319_v41  ;;  %v9091_v41 = vand.u32 4294901760, %v2248_v26 }
 0x21d   : > { %2230 = vmatpush.msrb.mxu3 %v1898_v53  ;;  %v2330_v53 = vsub.f32 %v8972_v22, %v2329_v55 }
 0x21e   : > { %2326 = vmatpush.msra.mxu1 %v2325_v58 }
 0x21f   : > { %v2331_v35 = vand.u32 4294901760, %v2330_v53 }
 0x221   : > { %2332 = vmatpush.msra.mxu1 %v2331_v35 }
 0x223   : > { %2338 = vmatpush.msra.mxu1 %v2337_v3  ;;  %v9101_v3 = vsub.f32 %v2248_v26, %v9091_v41 }
 0x24a   : > { %v1621_v5 = vpop.f32.mrf.mxu1 }
 0x252   : > { %v1512_v38 = vpop.f32.mrf.mxu0  ;;  %v1625_v44 = vpop.f32.mrf.mxu1 }
 0x253   : > { %v1513_v25 = vadd.f32 %v7353_v59, %v1512_v38  ;;  %v1679_v28 = vpop.f32.mrf.mxu2 }
 0x254   : > { %v1723_v11 = vpop.f32.mrf.mxu3 }
 0x255   : > { %v1622_v61 = vadd.f32 %v1621_v5, %v1513_v25  ;;  %v9007_v5 = vand.u32 4294901760, %v2256_v50 }
 0x257   : > { %v1680_v19 = vadd.f32 %v1679_v28, %v1622_v61  ;;  %v9010_v38 = vsub.f32 %v2256_v50, %v9007_v5  ;;  %2275 = vmatpush.msra.mxu0 %v9007_v5  ;;  %v2246_v50 = vld [vmem:[#allocation7 + $0x88] sm:$0xff] }
 0x259   : > { %v1724_v57 = vadd.f32 %v1723_v11, %v1680_v19  ;;  %v2341_v61 = vand.u32 4294901760, %v9010_v38  ;;  %v2253_v19 = vld [vmem:[#allocation7 + $0xc0] sm:$0xff] }
 0x25a   : > { %v1520_v4 = vpop.f32.mrf.mxu0  ;;  %v1839_v13 = vpop.f32.mrf.mxu1 }
 0x25b   : > { %v1521_v42 = vadd.f32 %v7353_v59, %v1520_v4  ;;  %v1684_v54 = vpop.f32.mrf.mxu2  ;;  %v2255_v59 = vld [vmem:[#allocation7 + $0xd0] sm:$0xff] }
 0x25c   : > { %v1729_v2 = vpop.f32.mrf.mxu3  ;;  %v9012_v25 = vand.u32 4294901760, %v2255_v59 }
 0x25d   : > { %v1626_v0 = vadd.f32 %v1625_v44, %v1521_v42  ;;  %v2254_v44 = vld [vmem:[#allocation7 + $0xc8] sm:$0xff]  ;;  %v2342_v42 = vsub.f32 %v9010_v38, %v2341_v61 }
 0x25e   : > { %v9018_v28 = vsub.f32 %v2255_v59, %v9012_v25  ;;  %v9020_v4 = vand.u32 4294901760, %v2254_v44  ;;  %2277 = vmatpush.msra.mxu0 %v9012_v25 }
 0x25f   : > { %v1685_v60 = vadd.f32 %v1684_v54, %v1626_v0  ;;  %v9032_v0 = vand.u32 4294901760, %v2253_v19 }
 0x260   : > { %v2347_v11 = vand.u32 4294901760, %v9018_v28  ;;  %2279 = vmatpush.msra.mxu0 %v9020_v4 }
 0x261   : > { %v1730_v29 = vadd.f32 %v1729_v2, %v1685_v60  ;;  %v9042_v60 = vsub.f32 %v2253_v19, %v9032_v0  ;;  %v2389_v19 = vand.u32 4294901760, %v9101_v3 }
 0x262   : > { %v1798_v7 = vpop.f32.mrf.mxu0  ;;  %v1843_v40 = vpop.f32.mrf.mxu1  ;;  %2281 = vmatpush.msra.mxu0 %v9032_v0 }
 0x263   : > { %v1799_v14 = vadd.f32 %v1798_v7, %v1724_v57  ;;  %v9030_v57 = vsub.f32 %v2254_v44, %v9020_v4  ;;  %v2343_v7 = vand.u32 4294901760, %v2342_v42  ;;  %v9111_v42 = vand.u32 4294901760, %v2246_v50 }
 0x265   : > { %v1840_v15 = vadd.f32 %v1839_v13, %v1799_v14  ;;  %v2252_v13 = vld [vmem:[#allocation7 + $0xb8] sm:$0xff]  ;;  %v2348_v14 = vsub.f32 %v9018_v28, %v2347_v11  ;;  %v2353_v54 = vand.u32 4294901760, %v9030_v57  ;;  %2344 = vmatpush.msra.mxu1 %v2343_v7  ;;  %v2245_v7 = vld [vmem:[#allocation7 + $0x80] sm:$0xff] }
 0x267   : > { %v1846_v21 = vmax.f32 %v1840_v15, 0.0  ;;  %v9046_v15 = vand.u32 4294901760, %v2252_v13  ;;  %v2349_v2 = vand.u32 4294901760, %v2348_v14 }
 0x269   : > { %v8953_v39 = vand.u32 4294901760, %v1846_v21  ;;  %2283 = vmatpush.msra.mxu0 %v9046_v15  ;;  %2350 = vmatpush.msra.mxu1 %v2349_v2  ;;  %v2400_v2 = vsub.f32 %v2246_v50, %v9111_v42 }
 0x26a   : > { %v1802_v51 = vpop.f32.mrf.mxu0 }
 0x26b   : > { %v1901_v36 = vsub.f32 %v1846_v21, %v8953_v39  ;;  %v1803_v47 = vadd.f32 %v1802_v51, %v1730_v29  ;;  %2014 = vmatmul.f32.vlgmr.msra.gmra.mxu3 %v8953_v39  ;;  %v2251_v21 = vld [vmem:[#allocation7 + $0xb0] sm:$0xff]  ;;  %v2354_v29 = vsub.f32 %v9030_v57, %v2353_v54 }
 0x26c   : > { %2480 = vmatpush.msra.mxu3 %v8957_v6  ;;  %v9053_v51 = vand.u32 4294901760, %v2251_v21 }
 0x26d   : > { %v1844_v31 = vadd.f32 %v1843_v40, %v1803_v47  ;;  %2072 = vmatmul.f32.vlgmr.msrb.gmra.mxu0 %v1901_v36  ;;  %v1902_v33 = vand.u32 4294901760, %v1901_v36  ;;  %v2250_v47 = vld [vmem:[#allocation7 + $0xa8] sm:$0xff]  ;;  %v2355_v12 = vand.u32 4294901760, %v2354_v29  ;;  %v9119_v29 = vand.u32 4294901760, %v2245_v7 }
 0x26e   : > { %2482 = vmatpush.msra.mxu3 %v8959_v18  ;;  %v9065_v62 = vsub.f32 %v2251_v21, %v9053_v51  ;;  %v9067_v40 = vand.u32 4294901760, %v2250_v47  ;;  %2285 = vmatpush.msra.mxu0 %v9053_v51  ;;  %v2390_v21 = vsub.f32 %v9101_v3, %v2389_v19 }
 0x26f   : > { %v1847_v46 = vmax.f32 %v1844_v31, 0.0  ;;  %2116 = vmatmul.f32.vlgmr.msrb.gmra.mxu1 %v1902_v33  ;;  %v1903_v37 = vsub.f32 %v1901_v36, %v1902_v33  ;;  %v9057_v36 = vsub.f32 %v2252_v13, %v9046_v15  ;;  %v2249_v31 = vld [vmem:[#allocation7 + $0xa0] sm:$0xff] }
 0x270   : > { %2484 = vmatpush.msra.mxu3 %v8961_v10  ;;  %2356 = vmatpush.msra.mxu1 %v2355_v12  ;;  %v2391_v12 = vand.u32 4294901760, %v2390_v21 }
 0x271   : > { %v1908_v56 = vand.u32 4294901760, %v1847_v46  ;;  %v1904_v20 = vand.u32 4294901760, %v1903_v37  ;;  %v2365_v63 = vand.u32 4294901760, %v9057_v36  ;;  %v9074_v37 = vsub.f32 %v2250_v47, %v9067_v40  ;;  %2287 = vmatpush.msra.mxu0 %v9067_v40 }
 0x272   : > { %2486 = vmatpush.msra.mxu3 %v8963_v49 }
 0x273   : > { %1905 = vmatmul.f32.vlgmr.msra.gmra.mxu2 %v1904_v20  ;;  %2018 = vmatmul.f32.gmra.mxu3 %v1908_v56  ;;  %v1909_v27 = vsub.f32 %v1847_v46, %v1908_v56  ;;  %v2371_v46 = vand.u32 4294901760, %v9065_v62  ;;  %v2366_v20 = vsub.f32 %v9057_v36, %v2365_v63  ;;  %v2377_v53 = vand.u32 4294901760, %v9074_v37 }
 0x274   : > { %2422 = vmatpush.msra.mxu2 %v8966_v52  ;;  %2488 = vmatpush.msra.mxu3 %v9007_v5 }
 0x275   : > { %2077 = vmatmul.f32.gmra.mxu0 %v1909_v27  ;;  %v1910_v9 = vand.u32 4294901760, %v1909_v27  ;;  %v2372_v34 = vsub.f32 %v9065_v62, %v2371_v46  ;;  %v2367_v58 = vand.u32 4294901760, %v2366_v20  ;;  %v2378_v35 = vsub.f32 %v9074_v37, %v2377_v53 }
 0x276   : > { %2425 = vmatpush.msra.mxu2 %v8969_v17  ;;  %2490 = vmatpush.msra.mxu3 %v9012_v25 }
 0x277   : > { %2122 = vmatmul.f32.gmra.mxu1 %v1910_v9  ;;  %v1911_v30 = vsub.f32 %v1909_v27, %v1910_v9  ;;  %v2373_v9 = vand.u32 4294901760, %v2372_v34  ;;  %v2379_v59 = vand.u32 4294901760, %v2378_v35  ;;  %v2651_v35 = vld [vmem:[#allocation10 + $0xd0] sm:$0xff] }
 0x278   : > { %2428 = vmatpush.msra.mxu2 %v8972_v22  ;;  %2492 = vmatpush.msra.mxu3 %v9020_v4 }
 0x279   : > { %v1912_v32 = vand.u32 4294901760, %v1911_v30 }
 0x27a   : > { %2431 = vmatpush.msra.mxu2 %v8977_v24  ;;  %2494 = vmatpush.msra.mxu3 %v9032_v0 }
 0x27b   : > { %1913 = vmatmul.f32.gmra.mxu2 %v1912_v32  ;;  %2232 = vmatmul.f32.vlgmr.msrb.gmra.mxu3 %v8953_v39  ;;  %v9104_v32 = vand.u32 4294901760, %v2247_v48 }
 0x27c   : > { %2434 = vmatpush.msra.mxu2 %v9010_v38  ;;  %2496 = vmatpush.msra.mxu3 %v9046_v15 }
 0x27d   : > { %v2394_v13 = vsub.f32 %v2247_v48, %v9104_v32 }
 0x27e   : > { %2437 = vmatpush.msra.mxu2 %v9018_v28  ;;  %2498 = vmatpush.msra.mxu3 %v9053_v51 }
 0x27f   : > { %v2395_v47 = vand.u32 4294901760, %v2394_v13 }
 0x280   : > { %2440 = vmatpush.msra.mxu2 %v9030_v57  ;;  %2500 = vmatpush.msra.mxu3 %v9067_v40 }
 0x282   : > { %2443 = vmatpush.msra.mxu2 %v9042_v60 }
 0x283   : > { %2191 = vmatmul.f32.vlgmr.msrb.gmra.mxu2 %v8953_v39  ;;  %2236 = vmatmul.f32.gmra.mxu3 %v1908_v56  ;;  %v2359_v39 = vand.u32 4294901760, %v9042_v60 }
 0x284   : > { %2446 = vmatpush.msra.mxu2 %v9057_v36 }
 0x285   : > { %v2360_v43 = vsub.f32 %v9042_v60, %v2359_v39 }
 0x286   : > { %2449 = vmatpush.msra.mxu2 %v9065_v62 }
 0x287   : > { %v2361_v33 = vand.u32 4294901760, %v2360_v43  ;;  %v2401_v43 = vand.u32 4294901760, %v2400_v2 }
 0x288   : > { %2452 = vmatpush.msra.mxu2 %v9074_v37  ;;  %v2654_v37 = vld [vmem:[#allocation10 + $0xe8] sm:$0xff] }
 0x289   : > { %2362 = vmatpush.msra.mxu1 %v2361_v33  ;;  %v2396_v33 = vsub.f32 %v2394_v13, %v2395_v47  ;;  %v2402_v20 = vsub.f32 %v2400_v2, %v2401_v43 }
 0x28b   : > { %2195 = vmatmul.f32.gmra.mxu2 %v1908_v56  ;;  %v9076_v56 = vand.u32 4294901760, %v2249_v31  ;;  %2368 = vmatpush.msra.mxu1 %v2367_v58  ;;  %v2397_v34 = vand.u32 4294901760, %v2396_v33  ;;  %v2403_v58 = vand.u32 4294901760, %v2402_v20 }
 0x28d   : > { %v9089_v27 = vsub.f32 %v2249_v31, %v9076_v56  ;;  %2289 = vmatpush.msra.mxu0 %v9076_v56  ;;  %2502 = vmatpush.msra.mxu3 %v9076_v56  ;;  %v2406_v31 = vsub.f32 %v2245_v7, %v9119_v29 }
 0x28e   : > { %2374 = vmatpush.msra.mxu1 %v2373_v9 }
 0x28f   : > { %v2383_v30 = vand.u32 4294901760, %v9089_v27  ;;  %2291 = vmatpush.msra.mxu0 %v9091_v41  ;;  %2455 = vmatpush.msra.mxu2 %v9089_v27  ;;  %v2407_v26 = vand.u32 4294901760, %v2406_v31 }
 0x290   : > { %2504 = vmatpush.msra.mxu3 %v9091_v41  ;;  %2380 = vmatpush.msra.mxu1 %v2379_v59 }
 0x291   : > { %v2384_v44 = vsub.f32 %v9089_v27, %v2383_v30  ;;  %2293 = vmatpush.msra.mxu0 %v9104_v32  ;;  %2458 = vmatpush.msra.mxu2 %v9101_v3  ;;  %v2408_v48 = vsub.f32 %v2406_v31, %v2407_v26  ;;  %v2653_v27 = vld [vmem:[#allocation10 + $0xe0] sm:$0xff] }
 0x292   : > { %2506 = vmatpush.msra.mxu3 %v9104_v32 }
 0x293   : > { %v2385_v14 = vand.u32 4294901760, %v2384_v44  ;;  %2295 = vmatpush.msra.mxu0 %v9111_v42  ;;  %2461 = vmatpush.msra.mxu2 %v2394_v13  ;;  %v2409_v9 = vand.u32 4294901760, %v2408_v48 }
 0x294   : > { %2508 = vmatpush.msra.mxu3 %v9111_v42 }
 0x295   : > { %2386 = vmatpush.msra.mxu1 %v2385_v14  ;;  %2297 = vmatpush.msra.mxu0 %v9119_v29 }
 0x296   : > { %2464 = vmatpush.msra.mxu2 %v2400_v2  ;;  %2510 = vmatpush.msra.mxu3 %v9119_v29 }
 0x297   : > { %2527 = vmatpush.msrb.mxu0 %v2317_v8  ;;  %2392 = vmatpush.msra.mxu1 %v2391_v12  ;;  %v2650_v12 = vld [vmem:[#allocation10 + $0xc8] sm:$0xff] }
 0x298   : > { %2467 = vmatpush.msra.mxu2 %v2406_v31 }
 0x299   : > { %2531 = vmatpush.msrb.mxu0 %v2323_v1  ;;  %2398 = vmatpush.msra.mxu1 %v2397_v34 }
 0x29b   : > { %2535 = vmatpush.msrb.mxu0 %v2329_v55  ;;  %2404 = vmatpush.msra.mxu1 %v2403_v58 }
 0x29d   : > { %2539 = vmatpush.msrb.mxu0 %v2335_v23  ;;  %2410 = vmatpush.msra.mxu1 %v2409_v9  ;;  %v9232_v9 = vand.u32 4294901760, %v2650_v12 }
 0x29f   : > { %2598 = vmatpush.msrb.mxu1 %v8957_v6  ;;  %2543 = vmatpush.msrb.mxu0 %v2341_v61 }
 0x2a1   : > { %2600 = vmatpush.msrb.mxu1 %v8959_v18  ;;  %2547 = vmatpush.msrb.mxu0 %v2347_v11  ;;  %v7354_v18 = vld [vmem:[#allocation13] ss:$0 sm:$0xff] }
 0x2a3   : > { %2602 = vmatpush.msrb.mxu1 %v8961_v10  ;;  %2551 = vmatpush.msrb.mxu0 %v2353_v54 }
 0x2a5   : > { %2604 = vmatpush.msrb.mxu1 %v8963_v49  ;;  %2555 = vmatpush.msrb.mxu0 %v2359_v39 }
 0x2a7   : > { %2606 = vmatpush.msrb.mxu1 %v9007_v5  ;;  %2559 = vmatpush.msrb.mxu0 %v2365_v63  ;;  %v2656_v63 = vld [vmem:[#allocation10 + $0xf8] sm:$0xff] }
 0x2a9   : > { %2608 = vmatpush.msrb.mxu1 %v9012_v25  ;;  %2563 = vmatpush.msrb.mxu0 %v2371_v46  ;;  %v2655_v46 = vld [vmem:[#allocation10 + $0xf0] sm:$0xff] }
 0x2ab   : > { %2610 = vmatpush.msrb.mxu1 %v9020_v4  ;;  %2567 = vmatpush.msrb.mxu0 %v2377_v53  ;;  %v9181_v53 = vand.u32 4294901760, %v2654_v37 }
 0x2ad   : > { %2612 = vmatpush.msrb.mxu1 %v9032_v0  ;;  %2571 = vmatpush.msrb.mxu0 %v2383_v30 }
 0x2af   : > { %2614 = vmatpush.msrb.mxu1 %v9046_v15  ;;  %2575 = vmatpush.msrb.mxu0 %v2389_v19  ;;  %v9195_v19 = vsub.f32 %v2654_v37, %v9181_v53 }
 0x2b1   : > { %2616 = vmatpush.msrb.mxu1 %v9053_v51  ;;  %2579 = vmatpush.msrb.mxu0 %v2395_v47 }
 0x2b3   : > { %2618 = vmatpush.msrb.mxu1 %v9067_v40  ;;  %2583 = vmatpush.msrb.mxu0 %v2401_v43 }
 0x2b5   : > { %2620 = vmatpush.msrb.mxu1 %v9076_v56  ;;  %2587 = vmatpush.msrb.mxu0 %v2407_v26  ;;  %v9179_v56 = vand.u32 4294901760, %v2655_v46 }
 0x2b7   : > { %2622 = vmatpush.msrb.mxu1 %v9091_v41  ;;  %v2652_v41 = vld [vmem:[#allocation10 + $0xd8] sm:$0xff]  ;;  %v9192_v44 = vsub.f32 %v2655_v46, %v9179_v56 }
 0x2b8   : > { %v9186_v50 = vand.u32 4294901760, %v2652_v41 }
 0x2b9   : > { %2624 = vmatpush.msrb.mxu1 %v9104_v32  ;;  %v9184_v32 = vand.u32 4294901760, %v2653_v27  ;;  %v2719_v2 = vand.u32 4294901760, %v9192_v44 }
 0x2ba   : > { %v9207_v14 = vsub.f32 %v2652_v41, %v9186_v50 }
 0x2bb   : > { %2626 = vmatpush.msrb.mxu1 %v9111_v42  ;;  %v9198_v42 = vand.u32 4294901760, %v2651_v35  ;;  %v9204_v7 = vsub.f32 %v2653_v27, %v9184_v32  ;;  %v2720_v26 = vsub.f32 %v9192_v44, %v2719_v2  ;;  %v2645_v27 = vld [vmem:[#allocation10 + $0xa0] sm:$0xff] }
 0x2bc   : > { %v2737_v58 = vand.u32 4294901760, %v9207_v14 }
 0x2bd   : > { %2628 = vmatpush.msrb.mxu1 %v9119_v29  ;;  %v2725_v29 = vand.u32 4294901760, %v9195_v19  ;;  %v9214_v47 = vsub.f32 %v2651_v35, %v9198_v42  ;;  %v2731_v33 = vand.u32 4294901760, %v9204_v7 }
 0x2bf   : > { %v2726_v34 = vsub.f32 %v9195_v19, %v2725_v29 }
 0x2ea   : > { %v2073_v22 = vpop.f32.mrf.mxu0 }
 0x2ec   : > { %v2117_v55 = vpop.f32.mrf.mxu1 }
 0x2ee   : > { %v2015_v6 = vpop.f32.mrf.mxu3 }
 0x2f2   : > { %v2078_v28 = vpop.f32.mrf.mxu0 }
 0x2f4   : > { %v2123_v0 = vpop.f32.mrf.mxu1 }
 0x2f6   : > { %v1906_v10 = vpop.f32.mrf.mxu2  ;;  %v2019_v52 = vpop.f32.mrf.mxu3 }
 0x2f7   : > { %v1907_v49 = vadd.f32 %v7354_v18, %v1906_v10  ;;  %v2732_v10 = vsub.f32 %v9204_v7, %v2731_v33 }
 0x2f9   : > { %v2016_v17 = vadd.f32 %v2015_v6, %v1907_v49  ;;  %v2743_v49 = vand.u32 4294901760, %v9214_v47 }
 0x2fb   : > { %v2074_v1 = vadd.f32 %v2073_v22, %v2016_v17  ;;  %v9241_v17 = vsub.f32 %v2650_v12, %v9232_v9  ;;  %v2727_v22 = vand.u32 4294901760, %v2726_v34  ;;  %v2644_v12 = vld [vmem:[#allocation10 + $0x98] sm:$0xff] }
 0x2fd   : > { %v2118_v5 = vadd.f32 %v2117_v55, %v2074_v1  ;;  %v2749_v1 = vand.u32 4294901760, %v9241_v17  ;;  %v2733_v55 = vand.u32 4294901760, %v2732_v10 }
 0x2fe   : > { %v1914_v24 = vpop.f32.mrf.mxu2  ;;  %v2233_v38 = vpop.f32.mrf.mxu3 }
 0x2ff   : > { %v1915_v8 = vadd.f32 %v7354_v18, %v1914_v24  ;;  %v2721_v18 = vand.u32 4294901760, %v2720_v26  ;;  %v2738_v24 = vsub.f32 %v9207_v14, %v2737_v58  ;;  %v9314_v26 = vand.u32 4294901760, %v2644_v12 }
 0x301   : > { %v2020_v23 = vadd.f32 %v2019_v52, %v1915_v8  ;;  %v9326_v10 = vsub.f32 %v2644_v12, %v9314_v26 }
 0x303   : > { %v2079_v11 = vadd.f32 %v2078_v28, %v2020_v23  ;;  %v2744_v23 = vsub.f32 %v9214_v47, %v2743_v49 }
 0x305   : > { %v2124_v60 = vadd.f32 %v2123_v0, %v2079_v11 }
 0x306   : > { %v2192_v25 = vpop.f32.mrf.mxu2  ;;  %v2237_v36 = vpop.f32.mrf.mxu3 }
 0x307   : > { %v2193_v61 = vadd.f32 %v2192_v25, %v2118_v5  ;;  %v2750_v25 = vsub.f32 %v9241_v17, %v2749_v1 }
 0x309   : > { %v2234_v4 = vadd.f32 %v2233_v38, %v2193_v61  ;;  %v2739_v38 = vand.u32 4294901760, %v2738_v24  ;;  %v2745_v61 = vand.u32 4294901760, %v2744_v23  ;;  %v2751_v28 = vand.u32 4294901760, %v2750_v25  ;;  %v2642_v24 = vld [vmem:[#allocation10 + $0x88] sm:$0xff]  ;;  %v2641_v25 = vld [vmem:[#allocation10 + $0x80] sm:$0xff] }
 0x30b   : > { %v2240_v57 = vadd.f32 %v2234_v4, %v8518_v45  ;;  %v9177_v45 = vand.u32 4294901760, %v2656_v63  ;;  %v2649_v4 = vld [vmem:[#allocation10 + $0xc0] sm:$0xff] }
 0x30c   : > { %v9268_v11 = vand.u32 4294901760, %v2649_v4 }
 0x30d   : > { %v9169_v54 = vmax.f32 %v2240_v57, 0.0  ;;  %v9189_v59 = vsub.f32 %v2656_v63, %v9177_v45  ;;  %2663 = vmatpush.msrb.mxu2 %v9177_v45  ;;  %v2648_v57 = vld [vmem:[#allocation10 + $0xb8] sm:$0xff] }
 0x30e   : > { %v2196_v15 = vpop.f32.mrf.mxu2  ;;  %v9271_v0 = vsub.f32 %v2649_v4, %v9268_v11 }
 0x30f   : > { %v2197_v39 = vadd.f32 %v2196_v15, %v2124_v60  ;;  %v9172_v51 = vand.u32 4294901760, %v9169_v54  ;;  %v2713_v21 = vand.u32 4294901760, %v9189_v59  ;;  %2665 = vmatpush.msrb.mxu2 %v9179_v56  ;;  %v9273_v60 = vand.u32 4294901760, %v2648_v57  ;;  %v2647_v15 = vld [vmem:[#allocation10 + $0xb0] sm:$0xff] }
 0x311   : > { %v2238_v62 = vadd.f32 %v2237_v36, %v2197_v39  ;;  %2412 = vmatmul.f32.vlgmr.msra.gmra.mxu1 %v9172_v51  ;;  %v2299_v40 = vsub.f32 %v9169_v54, %v9172_v51  ;;  %v2714_v20 = vsub.f32 %v9189_v59, %v2713_v21  ;;  %2667 = vmatpush.msrb.mxu2 %v9181_v53  ;;  %v2755_v39 = vand.u32 4294901760, %v9271_v0 }
 0x312   : > { %2876 = vmatpush.msra.mxu1 %v9177_v45  ;;  %v9281_v36 = vand.u32 4294901760, %v2647_v15 }
 0x313   : > { %v2241_v30 = vadd.f32 %v2238_v62, %v8547_v16  ;;  %2470 = vmatmul.f32.vlgmr.msra.gmra.mxu2 %v2299_v40  ;;  %v2300_v3 = vand.u32 4294901760, %v2299_v40  ;;  %v2715_v6 = vand.u32 4294901760, %v2714_v20  ;;  %v2646_v62 = vld [vmem:[#allocation10 + $0xa8] sm:$0xff] }
 0x314   : > { %2878 = vmatpush.msra.mxu1 %v9179_v56  ;;  %2669 = vmatpush.msrb.mxu2 %v9184_v32  ;;  %v9291_v46 = vsub.f32 %v2647_v15, %v9281_v36  ;;  %v9293_v37 = vand.u32 4294901760, %v2646_v62 }
 0x315   : > { %v9201_v16 = vmax.f32 %v2241_v30, 0.0  ;;  %2514 = vmatmul.f32.vlgmr.msra.gmra.mxu3 %v2300_v3  ;;  %v2301_v13 = vsub.f32 %v2299_v40, %v2300_v3  ;;  %v2756_v40 = vsub.f32 %v9271_v0, %v2755_v39 }
 0x316   : > { %2880 = vmatpush.msra.mxu1 %v9181_v53  ;;  %2716 = vmatpush.msrb.mxu3 %v2715_v6  ;;  %v2767_v30 = vand.u32 4294901760, %v9291_v46  ;;  %v9303_v3 = vsub.f32 %v2646_v62, %v9293_v37 }
 0x317   : > { %v2302_v43 = vand.u32 4294901760, %v2301_v13  ;;  %v2306_v31 = vand.u32 4294901760, %v9201_v16  ;;  %2671 = vmatpush.msrb.mxu2 %v9186_v50  ;;  %v2757_v41 = vand.u32 4294901760, %v2756_v40  ;;  %v9307_v13 = vand.u32 4294901760, %v2645_v27 }
 0x318   : > { %2882 = vmatpush.msra.mxu1 %v9184_v32  ;;  %2722 = vmatpush.msrb.mxu3 %v2721_v18  ;;  %v2773_v20 = vand.u32 4294901760, %v9303_v3 }
 0x319   : > { %2303 = vmatmul.f32.vlgmr.msra.gmra.mxu0 %v2302_v43  ;;  %2416 = vmatmul.f32.gmra.mxu1 %v2306_v31  ;;  %v2307_v48 = vsub.f32 %v9201_v16, %v2306_v31  ;;  %v9318_v34 = vsub.f32 %v2645_v27, %v9307_v13 }
 0x31a   : > { %2818 = vmatpush.msra.mxu0 %v9189_v59  ;;  %2673 = vmatpush.msrb.mxu2 %v9198_v42  ;;  %v2774_v18 = vsub.f32 %v9303_v3, %v2773_v20 }
 0x31b   : > { %2475 = vmatmul.f32.gmra.mxu2 %v2307_v48  ;;  %v2308_v52 = vand.u32 4294901760, %v2307_v48  ;;  %2884 = vmatpush.msra.mxu1 %v9186_v50 }
 0x31c   : > { %2821 = vmatpush.msra.mxu0 %v9192_v44  ;;  %2728 = vmatpush.msrb.mxu3 %v2727_v22  ;;  %v2779_v22 = vand.u32 4294901760, %v9318_v34 }
 0x31d   : > { %2520 = vmatmul.f32.gmra.mxu3 %v2308_v52  ;;  %v2309_v8 = vsub.f32 %v2307_v48, %v2308_v52  ;;  %2675 = vmatpush.msrb.mxu2 %v9232_v9  ;;  %v2643_v48 = vld [vmem:[#allocation10 + $0x90] sm:$0xff] }
 0x31e   : > { %2824 = vmatpush.msra.mxu0 %v9195_v19  ;;  %2734 = vmatpush.msrb.mxu3 %v2733_v55  ;;  %v9328_v52 = vand.u32 4294901760, %v2643_v48  ;;  %v2785_v55 = vand.u32 4294901760, %v9326_v10 }
 0x31f   : > { %v2310_v5 = vand.u32 4294901760, %v2309_v8  ;;  %2886 = vmatpush.msra.mxu1 %v9198_v42  ;;  %2677 = vmatpush.msrb.mxu2 %v9268_v11  ;;  %v2775_v8 = vand.u32 4294901760, %v2774_v18 }
 0x320   : > { %2827 = vmatpush.msra.mxu0 %v9204_v7  ;;  %2740 = vmatpush.msrb.mxu3 %v2739_v38  ;;  %v2790_v23 = vsub.f32 %v2643_v48, %v9328_v52  ;;  %v2780_v38 = vsub.f32 %v9318_v34, %v2779_v22 }
 0x321   : > { %2311 = vmatmul.f32.gmra.mxu0 %v2310_v5  ;;  %2630 = vmatmul.f32.vlgmr.msrb.gmra.mxu1 %v9172_v51  ;;  %v9335_v5 = vand.u32 4294901760, %v2642_v24 }
 0x322   : > { %2830 = vmatpush.msra.mxu0 %v9207_v14  ;;  %2888 = vmatpush.msra.mxu1 %v9232_v9  ;;  %v2781_v15 = vand.u32 4294901760, %v2780_v38 }
 0x323   : > { %2746 = vmatpush.msrb.mxu3 %v2745_v61  ;;  %2679 = vmatpush.msrb.mxu2 %v9273_v60  ;;  %v2786_v61 = vsub.f32 %v9326_v10, %v2785_v55  ;;  %v2796_v4 = vsub.f32 %v2642_v24, %v9335_v5 }
 0x324   : > { %2833 = vmatpush.msra.mxu0 %v9214_v47  ;;  %2890 = vmatpush.msra.mxu1 %v9268_v11 }
 0x325   : > { %2752 = vmatpush.msrb.mxu3 %v2751_v28  ;;  %2681 = vmatpush.msrb.mxu2 %v9281_v36  ;;  %v2791_v28 = vand.u32 4294901760, %v2790_v23  ;;  %v2787_v62 = vand.u32 4294901760, %v2786_v61  ;;  %v2797_v27 = vand.u32 4294901760, %v2796_v4 }
 0x326   : > { %2836 = vmatpush.msra.mxu0 %v9241_v17  ;;  %2892 = vmatpush.msra.mxu1 %v9273_v60 }
 0x327   : > { %2683 = vmatpush.msrb.mxu2 %v9293_v37  ;;  %2758 = vmatpush.msrb.mxu3 %v2757_v41  ;;  %v2792_v40 = vsub.f32 %v2790_v23, %v2791_v28  ;;  %v2798_v12 = vsub.f32 %v2796_v4, %v2797_v27 }
 0x328   : > { %2839 = vmatpush.msra.mxu0 %v9271_v0  ;;  %2894 = vmatpush.msra.mxu1 %v9281_v36 }
 0x329   : > { %2589 = vmatmul.f32.vlgmr.msrb.gmra.mxu0 %v9172_v51  ;;  %2634 = vmatmul.f32.gmra.mxu1 %v2306_v31  ;;  %v9279_v51 = vsub.f32 %v2648_v57, %v9273_v60  ;;  %v9343_v57 = vand.u32 4294901760, %v2641_v25 }
 0x32a   : > { %2896 = vmatpush.msra.mxu1 %v9293_v37  ;;  %2685 = vmatpush.msrb.mxu2 %v9307_v13 }
 0x32b   : > { %v2761_v63 = vand.u32 4294901760, %v9279_v51  ;;  %2842 = vmatpush.msra.mxu0 %v9279_v51  ;;  %v2802_v41 = vsub.f32 %v2641_v25, %v9343_v57 }
 0x32c   : > { %2898 = vmatpush.msra.mxu1 %v9307_v13  ;;  %2687 = vmatpush.msrb.mxu2 %v9314_v26 }
 0x32d   : > { %v2762_v35 = vsub.f32 %v9279_v51, %v2761_v63  ;;  %2845 = vmatpush.msra.mxu0 %v9291_v46 }
 0x32e   : > { %2900 = vmatpush.msra.mxu1 %v9314_v26  ;;  %2689 = vmatpush.msrb.mxu2 %v9328_v52 }
 0x32f   : > { %v2763_v43 = vand.u32 4294901760, %v2762_v35  ;;  %2848 = vmatpush.msra.mxu0 %v9303_v3  ;;  %v2793_v35 = vand.u32 4294901760, %v2792_v40 }
 0x330   : > { %2902 = vmatpush.msra.mxu1 %v9328_v52  ;;  %2691 = vmatpush.msrb.mxu2 %v9335_v5 }
 0x331   : > { %2593 = vmatmul.f32.gmra.mxu0 %v2306_v31  ;;  %v2768_v31 = vsub.f32 %v9291_v46, %v2767_v30  ;;  %2764 = vmatpush.msrb.mxu3 %v2763_v43  ;;  %v2803_v43 = vand.u32 4294901760, %v2802_v41  ;;  %v3050_v46 = vld [vmem:[#allocation11 + $0xe8] sm:$0xff] }
 0x332   : > { %2851 = vmatpush.msra.mxu0 %v9318_v34  ;;  %2904 = vmatpush.msra.mxu1 %v9335_v5 }
 0x333   : > { %v2769_v6 = vand.u32 4294901760, %v2768_v31  ;;  %2693 = vmatpush.msrb.mxu2 %v9343_v57  ;;  %v2799_v31 = vand.u32 4294901760, %v2798_v12  ;;  %v2804_v34 = vsub.f32 %v2802_v41, %v2803_v43 }
 0x334   : > { %2854 = vmatpush.msra.mxu0 %v9326_v10  ;;  %2906 = vmatpush.msra.mxu1 %v9343_v57 }
 0x335   : > { %2770 = vmatpush.msrb.mxu3 %v2769_v6  ;;  %2923 = vmatpush.msra.mxu2 %v2713_v21  ;;  %v2805_v48 = vand.u32 4294901760, %v2804_v34 }
 0x336   : > { %2857 = vmatpush.msra.mxu0 %v2790_v23 }
 0x337   : > { %2776 = vmatpush.msrb.mxu3 %v2775_v8  ;;  %2927 = vmatpush.msra.mxu2 %v2719_v2 }
 0x338   : > { %2860 = vmatpush.msra.mxu0 %v2796_v4 }
 0x339   : > { %2782 = vmatpush.msrb.mxu3 %v2781_v15  ;;  %2931 = vmatpush.msra.mxu2 %v2725_v29 }
 0x33a   : > { %2863 = vmatpush.msra.mxu0 %v2802_v41 }
 0x33b   : > { %2788 = vmatpush.msrb.mxu3 %v2787_v62  ;;  %2935 = vmatpush.msra.mxu2 %v2731_v33 }
 0x33d   : > { %2794 = vmatpush.msrb.mxu3 %v2793_v35  ;;  %2939 = vmatpush.msra.mxu2 %v2737_v58 }
 0x33f   : > { %2800 = vmatpush.msrb.mxu3 %v2799_v31  ;;  %2943 = vmatpush.msra.mxu2 %v2743_v49 }
 0x341   : > { %2806 = vmatpush.msrb.mxu3 %v2805_v48  ;;  %2947 = vmatpush.msra.mxu2 %v2749_v1 }
 0x343   : > { %2994 = vmatpush.msra.mxu3 %v9177_v45  ;;  %2951 = vmatpush.msra.mxu2 %v2755_v39 }
 0x345   : > { %2996 = vmatpush.msra.mxu3 %v9179_v56  ;;  %2955 = vmatpush.msra.mxu2 %v2761_v63  ;;  %v7355_v56 = vld [vmem:[#allocation8 + $0x1] ss:$0 sm:$0xff]  ;;  %v3051_v63 = vld [vmem:[#allocation11 + $0xf0] sm:$0xff] }
 0x346   : > { %v9395_v3 = vand.u32 4294901760, %v3051_v63 }
 0x347   : > { %2998 = vmatpush.msra.mxu3 %v9181_v53  ;;  %2959 = vmatpush.msra.mxu2 %v2767_v30 }
 0x348   : > { %v9407_v24 = vsub.f32 %v3051_v63, %v9395_v3 }
 0x349   : > { %3000 = vmatpush.msra.mxu3 %v9184_v32  ;;  %2963 = vmatpush.msra.mxu2 %v2773_v20  ;;  %v3049_v20 = vld [vmem:[#allocation11 + $0xe0] sm:$0xff] }
 0x34a   : > { %v9399_v10 = vand.u32 4294901760, %v3049_v20  ;;  %v3115_v61 = vand.u32 4294901760, %v9407_v24 }
 0x34b   : > { %3002 = vmatpush.msra.mxu3 %v9186_v50  ;;  %2967 = vmatpush.msra.mxu2 %v2779_v22 }
 0x34c   : > { %v3116_v40 = vsub.f32 %v9407_v24, %v3115_v61 }
 0x34d   : > { %3004 = vmatpush.msra.mxu3 %v9198_v42  ;;  %2971 = vmatpush.msra.mxu2 %v2785_v55 }
 0x34f   : > { %3006 = vmatpush.msra.mxu3 %v9232_v9  ;;  %2975 = vmatpush.msra.mxu2 %v2791_v28 }
 0x351   : > { %3008 = vmatpush.msra.mxu3 %v9268_v11  ;;  %2979 = vmatpush.msra.mxu2 %v2797_v27 }
 0x353   : > { %3010 = vmatpush.msra.mxu3 %v9273_v60  ;;  %2983 = vmatpush.msra.mxu2 %v2803_v43  ;;  %v3117_v43 = vand.u32 4294901760, %v3116_v40 }
 0x355   : > { %3012 = vmatpush.msra.mxu3 %v9281_v36  ;;  %v3052_v36 = vld [vmem:[#allocation11 + $0xf8] sm:$0xff] }
 0x356   : > { %v9393_v30 = vand.u32 4294901760, %v3052_v36 }
 0x357   : > { %3014 = vmatpush.msra.mxu3 %v9293_v37 }
 0x358   : > { %v9404_v22 = vsub.f32 %v3052_v36, %v9393_v30  ;;  %3059 = vmatpush.msrb.mxu0 %v9393_v30 }
 0x359   : > { %3016 = vmatpush.msra.mxu3 %v9307_v13  ;;  %v9397_v13 = vand.u32 4294901760, %v3050_v46 }
 0x35a   : > { %v3109_v25 = vand.u32 4294901760, %v9404_v22  ;;  %3061 = vmatpush.msrb.mxu0 %v9395_v3 }
 0x35b   : > { %3018 = vmatpush.msra.mxu3 %v9314_v26  ;;  %v3048_v26 = vld [vmem:[#allocation11 + $0xd8] sm:$0xff]  ;;  %v9410_v8 = vsub.f32 %v3050_v46, %v9397_v13 }
 0x35c   : > { %v3110_v62 = vsub.f32 %v9404_v22, %v3109_v25  ;;  %3063 = vmatpush.msrb.mxu0 %v9397_v13 }
 0x35d   : > { %3020 = vmatpush.msra.mxu3 %v9328_v52  ;;  %v9401_v52 = vand.u32 4294901760, %v3048_v26  ;;  %v3121_v28 = vand.u32 4294901760, %v9410_v8 }
 0x35e   : > { %v3111_v12 = vand.u32 4294901760, %v3110_v62  ;;  %3065 = vmatpush.msrb.mxu0 %v9399_v10 }
 0x35f   : > { %3022 = vmatpush.msra.mxu3 %v9335_v5  ;;  %v9415_v5 = vsub.f32 %v3049_v20, %v9399_v10  ;;  %v9418_v38 = vsub.f32 %v3048_v26, %v9401_v52  ;;  %v3122_v27 = vsub.f32 %v9410_v8, %v3121_v28  ;;  %v3041_v26 = vld [vmem:[#allocation11 + $0xa0] sm:$0xff] }
 0x360   : > { %3112 = vmatpush.msrb.mxu1 %v3111_v12  ;;  %3067 = vmatpush.msrb.mxu0 %v9401_v52 }
 0x361   : > { %3024 = vmatpush.msra.mxu3 %v9343_v57  ;;  %v3127_v15 = vand.u32 4294901760, %v9415_v5  ;;  %v3133_v41 = vand.u32 4294901760, %v9418_v38  ;;  %v3123_v48 = vand.u32 4294901760, %v3122_v27 }
 0x362   : > { %3118 = vmatpush.msrb.mxu1 %v3117_v43  ;;  %v3039_v43 = vld [vmem:[#allocation11 + $0x90] sm:$0xff] }
 0x363   : > { %v3128_v31 = vsub.f32 %v9415_v5, %v3127_v15 }
 0x364   : > { %3124 = vmatpush.msrb.mxu1 %v3123_v48 }
 0x38e   : > { %v2413_v45 = vpop.f32.mrf.mxu1 }
 0x396   : > { %v2304_v53 = vpop.f32.mrf.mxu0  ;;  %v2417_v50 = vpop.f32.mrf.mxu1 }
 0x397   : > { %v2305_v32 = vadd.f32 %v7355_v56, %v2304_v53  ;;  %v2471_v44 = vpop.f32.mrf.mxu2  ;;  %v3129_v53 = vand.u32 4294901760, %v3128_v31 }
 0x398   : > { %v2515_v14 = vpop.f32.mrf.mxu3 }
 0x399   : > { %v2414_v59 = vadd.f32 %v2413_v45, %v2305_v32  ;;  %v3134_v45 = vsub.f32 %v9418_v38, %v3133_v41  ;;  %3130 = vmatpush.msrb.mxu1 %v3129_v53  ;;  %v3038_v53 = vld [vmem:[#allocation11 + $0x88] sm:$0xff] }
 0x39b   : > { %v2472_v42 = vadd.f32 %v2471_v44, %v2414_v59  ;;  %v3047_v59 = vld [vmem:[#allocation11 + $0xd0] sm:$0xff] }
 0x39c   : > { %v9455_v44 = vand.u32 4294901760, %v3047_v59 }
 0x39d   : > { %v2516_v21 = vadd.f32 %v2515_v14, %v2472_v42  ;;  %v3045_v14 = vld [vmem:[#allocation11 + $0xc0] sm:$0xff] }
 0x39e   : > { %v2312_v19 = vpop.f32.mrf.mxu0  ;;  %v2631_v29 = vpop.f32.mrf.mxu1  ;;  %v9458_v42 = vsub.f32 %v3047_v59, %v9455_v44  ;;  %3069 = vmatpush.msrb.mxu0 %v9455_v44 }
 0x39f   : > { %v2313_v7 = vadd.f32 %v7355_v56, %v2312_v19  ;;  %v2476_v58 = vpop.f32.mrf.mxu2  ;;  %v3046_v19 = vld [vmem:[#allocation11 + $0xc8] sm:$0xff] }
 0x3a0   : > { %v2521_v1 = vpop.f32.mrf.mxu3 }
 0x3a1   : > { %v2418_v2 = vadd.f32 %v2417_v50, %v2313_v7  ;;  %v3135_v50 = vand.u32 4294901760, %v3134_v45  ;;  %v9460_v7 = vand.u32 4294901760, %v3046_v19  ;;  %v9539_v45 = vand.u32 4294901760, %v3039_v43 }
 0x3a3   : > { %v2477_v9 = vadd.f32 %v2476_v58, %v2418_v2  ;;  %3136 = vmatpush.msrb.mxu1 %v3135_v50  ;;  %v9466_v2 = vsub.f32 %v3046_v19, %v9460_v7  ;;  %3071 = vmatpush.msrb.mxu0 %v9460_v7  ;;  %v3186_v19 = vsub.f32 %v3039_v43, %v9539_v45 }
 0x3a5   : > { %v2522_v11 = vadd.f32 %v2521_v1, %v2477_v9  ;;  %v3145_v58 = vand.u32 4294901760, %v9466_v2 }
 0x3a6   : > { %v2590_v47 = vpop.f32.mrf.mxu0  ;;  %v2635_v37 = vpop.f32.mrf.mxu1 }
 0x3a7   : > { %v2591_v33 = vadd.f32 %v2590_v47, %v2516_v21  ;;  %v3139_v21 = vand.u32 4294901760, %v9458_v42  ;;  %v3044_v47 = vld [vmem:[#allocation11 + $0xb8] sm:$0xff] }
 0x3a9   : > { %v2632_v49 = vadd.f32 %v2631_v29, %v2591_v33  ;;  %v9468_v29 = vand.u32 4294901760, %v3045_v14  ;;  %v3140_v33 = vsub.f32 %v9458_v42, %v3139_v21 }
 0x3ab   : > { %v2638_v17 = vmax.f32 %v2632_v49, 0.0  ;;  %v9478_v9 = vsub.f32 %v3045_v14, %v9468_v29  ;;  %v9480_v49 = vand.u32 4294901760, %v3044_v47  ;;  %3073 = vmatpush.msrb.mxu0 %v9468_v29  ;;  %v3141_v1 = vand.u32 4294901760, %v3140_v33 }
 0x3ac   : > { %v9550_v14 = vand.u32 4294901760, %v3038_v53 }
 0x3ad   : > { %v9389_v0 = vand.u32 4294901760, %v2638_v17  ;;  %3075 = vmatpush.msrb.mxu0 %v9480_v49  ;;  %3142 = vmatpush.msrb.mxu1 %v3141_v1  ;;  %v3187_v1 = vand.u32 4294901760, %v3186_v19 }
 0x3ae   : > { %v2594_v60 = vpop.f32.mrf.mxu0 }
 0x3af   : > { %v2695_v39 = vsub.f32 %v2638_v17, %v9389_v0  ;;  %v2595_v51 = vadd.f32 %v2594_v60, %v2522_v11  ;;  %2808 = vmatmul.f32.vlgmr.msrb.gmra.mxu3 %v9389_v0  ;;  %v3043_v17 = vld [vmem:[#allocation11 + $0xb0] sm:$0xff]  ;;  %v3146_v11 = vsub.f32 %v9466_v2, %v3145_v58  ;;  %v9490_v60 = vsub.f32 %v3044_v47, %v9480_v49  ;;  %v3037_v47 = vld [vmem:[#allocation11 + $0x80] sm:$0xff] }
 0x3b0   : > { %3272 = vmatpush.msrb.mxu3 %v9393_v30 }
 0x3b1   : > { %v2636_v6 = vadd.f32 %v2635_v37, %v2595_v51  ;;  %2866 = vmatmul.f32.vlgmr.msra.gmra.mxu0 %v2695_v39  ;;  %v2696_v18 = vand.u32 4294901760, %v2695_v39  ;;  %v3042_v51 = vld [vmem:[#allocation11 + $0xa8] sm:$0xff]  ;;  %v3147_v36 = vand.u32 4294901760, %v3146_v11  ;;  %v3157_v46 = vand.u32 4294901760, %v9490_v60 }
 0x3b2   : > { %3274 = vmatpush.msrb.mxu3 %v9395_v3  ;;  %v9501_v37 = vand.u32 4294901760, %v3042_v51  ;;  %v9554_v11 = vand.u32 4294901760, %v3037_v47 }
 0x3b3   : > { %v2639_v55 = vmax.f32 %v2636_v6, 0.0  ;;  %2910 = vmatmul.f32.vlgmr.msra.gmra.mxu1 %v2696_v18  ;;  %v2697_v23 = vsub.f32 %v2695_v39, %v2696_v18  ;;  %v9494_v39 = vand.u32 4294901760, %v3043_v17  ;;  %v3158_v18 = vsub.f32 %v9490_v60, %v3157_v46 }
 0x3b4   : > { %3276 = vmatpush.msrb.mxu3 %v9397_v13  ;;  %3148 = vmatpush.msrb.mxu1 %v3147_v36 }
 0x3b5   : > { %v2702_v4 = vand.u32 4294901760, %v2639_v55  ;;  %v2698_v57 = vand.u32 4294901760, %v2697_v23  ;;  %v9505_v20 = vsub.f32 %v3043_v17, %v9494_v39  ;;  %3077 = vmatpush.msrb.mxu0 %v9494_v39  ;;  %v9515_v23 = vand.u32 4294901760, %v3041_v26 }
 0x3b6   : > { %3278 = vmatpush.msrb.mxu3 %v9399_v10  ;;  %v3159_v62 = vand.u32 4294901760, %v3158_v18 }
 0x3b7   : > { %2699 = vmatmul.f32.vlgmr.msrb.gmra.mxu2 %v2698_v57  ;;  %2812 = vmatmul.f32.gmra.mxu3 %v2702_v4  ;;  %v2703_v35 = vsub.f32 %v2639_v55, %v2702_v4  ;;  %v9513_v55 = vsub.f32 %v3042_v51, %v9501_v37  ;;  %v3040_v57 = vld [vmem:[#allocation11 + $0x98] sm:$0xff]  ;;  %v9522_v27 = vsub.f32 %v3041_v26, %v9515_v23 }
 0x3b8   : > { %3214 = vmatpush.msrb.mxu2 %v9404_v22  ;;  %3280 = vmatpush.msrb.mxu3 %v9401_v52  ;;  %v3192_v51 = vsub.f32 %v3038_v53, %v9550_v14  ;;  %v3198_v26 = vsub.f32 %v3037_v47, %v9554_v11 }
 0x3b9   : > { %2871 = vmatmul.f32.gmra.mxu0 %v2703_v35  ;;  %v2704_v34 = vand.u32 4294901760, %v2703_v35  ;;  %v3169_v40 = vand.u32 4294901760, %v9513_v55 }
 0x3ba   : > { %3217 = vmatpush.msrb.mxu2 %v9407_v24  ;;  %3282 = vmatpush.msrb.mxu3 %v9455_v44 }
 0x3bb   : > { %2916 = vmatmul.f32.gmra.mxu1 %v2704_v34  ;;  %v2705_v56 = vsub.f32 %v2703_v35, %v2704_v34  ;;  %3079 = vmatpush.msrb.mxu0 %v9501_v37  ;;  %v9524_v35 = vand.u32 4294901760, %v3040_v57  ;;  %v3170_v31 = vsub.f32 %v9513_v55, %v3169_v40  ;;  %v3175_v34 = vand.u32 4294901760, %v9522_v27 }
 0x3bc   : > { %3220 = vmatpush.msrb.mxu2 %v9410_v8  ;;  %3284 = vmatpush.msrb.mxu3 %v9460_v7 }
 0x3bd   : > { %v2706_v32 = vand.u32 4294901760, %v2705_v56  ;;  %3081 = vmatpush.msrb.mxu0 %v9515_v23  ;;  %v9537_v48 = vsub.f32 %v3040_v57, %v9524_v35  ;;  %v3176_v50 = vsub.f32 %v9522_v27, %v3175_v34  ;;  %v3199_v57 = vand.u32 4294901760, %v3198_v26 }
 0x3be   : > { %3223 = vmatpush.msrb.mxu2 %v9415_v5  ;;  %3286 = vmatpush.msrb.mxu3 %v9468_v29 }
 0x3bf   : > { %2707 = vmatmul.f32.gmra.mxu2 %v2706_v32  ;;  %3026 = vmatmul.f32.vlgmr.msra.gmra.mxu3 %v9389_v0  ;;  %v3171_v32 = vand.u32 4294901760, %v3170_v31  ;;  %v3181_v59 = vand.u32 4294901760, %v9537_v48  ;;  %v3177_v33 = vand.u32 4294901760, %v3176_v50 }
 0x3c0   : > { %3226 = vmatpush.msrb.mxu2 %v9418_v38  ;;  %3288 = vmatpush.msrb.mxu3 %v9480_v49 }
 0x3c1   : > { %3083 = vmatpush.msrb.mxu0 %v9524_v35  ;;  %v3182_v17 = vsub.f32 %v9537_v48, %v3181_v59 }
 0x3c2   : > { %3229 = vmatpush.msrb.mxu2 %v9458_v42  ;;  %3290 = vmatpush.msrb.mxu3 %v9494_v39 }
 0x3c3   : > { %3085 = vmatpush.msrb.mxu0 %v9539_v45  ;;  %v3183_v36 = vand.u32 4294901760, %v3182_v17 }
 0x3c4   : > { %3232 = vmatpush.msrb.mxu2 %v9466_v2  ;;  %3292 = vmatpush.msrb.mxu3 %v9501_v37 }
 0x3c5   : > { %3087 = vmatpush.msrb.mxu0 %v9550_v14 }
 0x3c6   : > { %3235 = vmatpush.msrb.mxu2 %v9478_v9  ;;  %3294 = vmatpush.msrb.mxu3 %v9515_v23 }
 0x3c7   : > { %2985 = vmatmul.f32.vlgmr.msra.gmra.mxu2 %v9389_v0  ;;  %3030 = vmatmul.f32.gmra.mxu3 %v2702_v4  ;;  %v3151_v0 = vand.u32 4294901760, %v9478_v9 }
 0x3c8   : > { %3238 = vmatpush.msrb.mxu2 %v9490_v60  ;;  %3296 = vmatpush.msrb.mxu3 %v9524_v35 }
 0x3c9   : > { %v3152_v63 = vsub.f32 %v9478_v9, %v3151_v0  ;;  %3089 = vmatpush.msrb.mxu0 %v9554_v11 }
 0x3ca   : > { %3241 = vmatpush.msrb.mxu2 %v9505_v20  ;;  %3298 = vmatpush.msrb.mxu3 %v9539_v45 }
 0x3cb   : > { %v3153_v6 = vand.u32 4294901760, %v3152_v63  ;;  %v3188_v63 = vsub.f32 %v3186_v19, %v3187_v1  ;;  %3319 = vmatpush.msra.mxu0 %v3109_v25 }
 0x3cc   : > { %3244 = vmatpush.msrb.mxu2 %v9513_v55  ;;  %3300 = vmatpush.msrb.mxu3 %v9550_v14 }
 0x3cd   : > { %3154 = vmatpush.msrb.mxu1 %v3153_v6  ;;  %v3193_v6 = vand.u32 4294901760, %v3192_v51  ;;  %v3189_v18 = vand.u32 4294901760, %v3188_v63  ;;  %3323 = vmatpush.msra.mxu0 %v3115_v61 }
 0x3ce   : > { %3247 = vmatpush.msrb.mxu2 %v9522_v27  ;;  %3302 = vmatpush.msrb.mxu3 %v9554_v11  ;;  %v3446_v27 = vld [vmem:[#allocation7 + $0x158] sm:$0xff] }
 0x3cf   : > { %2989 = vmatmul.f32.gmra.mxu2 %v2702_v4  ;;  %v3163_v4 = vand.u32 4294901760, %v9505_v20  ;;  %3160 = vmatpush.msrb.mxu1 %v3159_v62  ;;  %v3194_v62 = vsub.f32 %v3192_v51, %v3193_v6 }
 0x3d0   : > { %3250 = vmatpush.msrb.mxu2 %v9537_v48  ;;  %3327 = vmatpush.msra.mxu0 %v3121_v28 }
 0x3d1   : > { %v3164_v12 = vsub.f32 %v9505_v20, %v3163_v4  ;;  %v3195_v43 = vand.u32 4294901760, %v3194_v62 }
 0x3d2   : > { %3253 = vmatpush.msrb.mxu2 %v3186_v19  ;;  %3331 = vmatpush.msra.mxu0 %v3127_v15 }
 0x3d3   : > { %v3165_v56 = vand.u32 4294901760, %v3164_v12  ;;  %v3200_v12 = vsub.f32 %v3198_v26, %v3199_v57 }
 0x3d4   : > { %3256 = vmatpush.msrb.mxu2 %v3192_v51  ;;  %3335 = vmatpush.msra.mxu0 %v3133_v41 }
 0x3d5   : > { %3166 = vmatpush.msrb.mxu1 %v3165_v56  ;;  %v3201_v31 = vand.u32 4294901760, %v3200_v12  ;;  %v9619_v56 = vand.u32 4294901760, %v3446_v27 }
 0x3d6   : > { %3259 = vmatpush.msrb.mxu2 %v3198_v26  ;;  %3339 = vmatpush.msra.mxu0 %v3139_v21 }
 0x3d7   : > { %3172 = vmatpush.msrb.mxu1 %v3171_v32 }
 0x3d8   : > { %3343 = vmatpush.msra.mxu0 %v3145_v58 }
 0x3d9   : > { %3178 = vmatpush.msrb.mxu1 %v3177_v33  ;;  %v9638_v33 = vsub.f32 %v3446_v27, %v9619_v56  ;;  %v3439_v27 = vld [vmem:[#allocation7 + $0x120] sm:$0xff] }
 0x3da   : > { %3347 = vmatpush.msra.mxu0 %v3151_v0 }
 0x3db   : > { %3184 = vmatpush.msrb.mxu1 %v3183_v36  ;;  %v3531_v62 = vand.u32 4294901760, %v9638_v33 }
 0x3dc   : > { %3351 = vmatpush.msra.mxu0 %v3157_v46  ;;  %v3449_v46 = vld [vmem:[#allocation7 + $0x170] sm:$0xff] }
 0x3dd   : > { %3190 = vmatpush.msrb.mxu1 %v3189_v18 }
 0x3de   : > { %3355 = vmatpush.msra.mxu0 %v3163_v4 }
 0x3df   : > { %3196 = vmatpush.msrb.mxu1 %v3195_v43 }
 0x3e0   : > { %3359 = vmatpush.msra.mxu0 %v3169_v40  ;;  %v3447_v40 = vld [vmem:[#allocation7 + $0x160] sm:$0xff] }
 0x3e1   : > { %3202 = vmatpush.msrb.mxu1 %v3201_v31 }
 0x3e2   : > { %3363 = vmatpush.msra.mxu0 %v3175_v34 }
 0x3e3   : > { %3390 = vmatpush.msra.mxu1 %v9393_v30 }
 0x3e4   : > { %3367 = vmatpush.msra.mxu0 %v3181_v59 }
 0x3e5   : > { %3392 = vmatpush.msra.mxu1 %v9395_v3  ;;  %v7356_v3 = vld [vmem:[%s11608_s6 + $0x1] ss:$0 sm:$0xff] }
 0x3e6   : > { %3371 = vmatpush.msra.mxu0 %v3187_v1 }
 0x3e7   : > { %3394 = vmatpush.msra.mxu1 %v9397_v13 }
 0x3e8   : > { %3375 = vmatpush.msra.mxu0 %v3193_v6 }
 0x3e9   : > { %3396 = vmatpush.msra.mxu1 %v9399_v10 }
 0x3ea   : > { %3379 = vmatpush.msra.mxu0 %v3199_v57 }
 0x3eb   : > { %3398 = vmatpush.msra.mxu1 %v9401_v52 }
 0x3ed   : > { %3400 = vmatpush.msra.mxu1 %v9455_v44 }
 0x3ef   : > { %3402 = vmatpush.msra.mxu1 %v9460_v7 }
 0x3f1   : > { %3404 = vmatpush.msra.mxu1 %v9468_v29 }
 0x3f3   : > { %3406 = vmatpush.msra.mxu1 %v9480_v49 }
 0x3f5   : > { %3408 = vmatpush.msra.mxu1 %v9494_v39  ;;  %v3450_v39 = vld [vmem:[#allocation7 + $0x178] sm:$0xff] }
 0x3f6   : > { %v9611_v55 = vand.u32 4294901760, %v3450_v39 }
 0x3f7   : > { %3410 = vmatpush.msra.mxu1 %v9501_v37  ;;  %v3448_v37 = vld [vmem:[#allocation7 + $0x168] sm:$0xff] }
 0x3f8   : > { %v9615_v4 = vand.u32 4294901760, %v3448_v37  ;;  %v9622_v53 = vsub.f32 %v3450_v39, %v9611_v55  ;;  %3457 = vmatpush.msra.mxu2 %v9611_v55 }
 0x3f9   : > { %3412 = vmatpush.msra.mxu1 %v9515_v23  ;;  %v9613_v23 = vand.u32 4294901760, %v3449_v46 }
 0x3fa   : > { %v9628_v50 = vsub.f32 %v3448_v37, %v9615_v4  ;;  %v3507_v17 = vand.u32 4294901760, %v9622_v53 }
 0x3fb   : > { %3414 = vmatpush.msra.mxu1 %v9524_v35  ;;  %v3445_v35 = vld [vmem:[#allocation7 + $0x150] sm:$0xff]  ;;  %v9625_v32 = vsub.f32 %v3449_v46, %v9613_v23  ;;  %3459 = vmatpush.msra.mxu2 %v9613_v23 }
 0x3fc   : > { %v9631_v59 = vand.u32 4294901760, %v3445_v35  ;;  %v3508_v6 = vsub.f32 %v9622_v53, %v3507_v17 }
 0x3fd   : > { %3416 = vmatpush.msra.mxu1 %v9539_v45  ;;  %v9617_v45 = vand.u32 4294901760, %v3447_v40  ;;  %v3513_v1 = vand.u32 4294901760, %v9625_v32  ;;  %3461 = vmatpush.msra.mxu2 %v9615_v4 }
 0x3fe   : > { %v9645_v51 = vsub.f32 %v3445_v35, %v9631_v59  ;;  %v3509_v43 = vand.u32 4294901760, %v3508_v6 }
 0x3ff   : > { %3418 = vmatpush.msra.mxu1 %v9550_v14  ;;  %v9635_v47 = vsub.f32 %v3447_v40, %v9617_v45  ;;  %v3514_v18 = vsub.f32 %v9625_v32, %v3513_v1  ;;  %3463 = vmatpush.msra.mxu2 %v9617_v45 }
 0x400   : > { %3510 = vmatpush.msra.mxu3 %v3509_v43  ;;  %v3437_v43 = vld [vmem:[#allocation7 + $0x110] sm:$0xff] }
 0x401   : > { %3420 = vmatpush.msra.mxu1 %v9554_v11  ;;  %v3519_v11 = vand.u32 4294901760, %v9628_v50  ;;  %v3525_v26 = vand.u32 4294901760, %v9635_v47  ;;  %v3515_v31 = vand.u32 4294901760, %v3514_v18  ;;  %3465 = vmatpush.msra.mxu2 %v9619_v56 }
 0x403   : > { %v3520_v57 = vsub.f32 %v9628_v50, %v3519_v11  ;;  %3516 = vmatpush.msra.mxu3 %v3515_v31  ;;  %3467 = vmatpush.msra.mxu2 %v9631_v59 }
 0x42e   : > { %v2867_v24 = vpop.f32.mrf.mxu0 }
 0x430   : > { %v2911_v25 = vpop.f32.mrf.mxu1 }
 0x432   : > { %v2809_v30 = vpop.f32.mrf.mxu3 }
 0x436   : > { %v2872_v42 = vpop.f32.mrf.mxu0 }
 0x438   : > { %v2917_v29 = vpop.f32.mrf.mxu1 }
 0x43a   : > { %v2700_v13 = vpop.f32.mrf.mxu2  ;;  %v2813_v52 = vpop.f32.mrf.mxu3 }
 0x43b   : > { %v2701_v10 = vadd.f32 %v7356_v3, %v2700_v13 }
 0x43d   : > { %v2810_v22 = vadd.f32 %v2809_v30, %v2701_v10  ;;  %v3526_v30 = vsub.f32 %v9635_v47, %v3525_v26  ;;  %v3521_v10 = vand.u32 4294901760, %v3520_v57 }
 0x43f   : > { %v2868_v38 = vadd.f32 %v2867_v24, %v2810_v22  ;;  %v3527_v24 = vand.u32 4294901760, %v3526_v30  ;;  %3522 = vmatpush.msra.mxu3 %v3521_v10  ;;  %v9754_v10 = vand.u32 4294901760, %v3437_v43 }
 0x441   : > { %v2912_v28 = vadd.f32 %v2911_v25, %v2868_v38  ;;  %3528 = vmatpush.msra.mxu3 %v3527_v24 }
 0x442   : > { %v2708_v8 = vpop.f32.mrf.mxu2  ;;  %v3027_v15 = vpop.f32.mrf.mxu3 }
 0x443   : > { %v2709_v5 = vadd.f32 %v7356_v3, %v2708_v8  ;;  %v3537_v3 = vand.u32 4294901760, %v9645_v51 }
 0x445   : > { %v2814_v61 = vadd.f32 %v2813_v52, %v2709_v5  ;;  %v3532_v52 = vsub.f32 %v9638_v33, %v3531_v62  ;;  %v3538_v8 = vsub.f32 %v9645_v51, %v3537_v3 }
 0x447   : > { %v2873_v21 = vadd.f32 %v2872_v42, %v2814_v61  ;;  %v3533_v38 = vand.u32 4294901760, %v3532_v52  ;;  %v3539_v25 = vand.u32 4294901760, %v3538_v8  ;;  %v3444_v61 = vld [vmem:[#allocation7 + $0x148] sm:$0xff]  ;;  %v3442_v42 = vld [vmem:[#allocation7 + $0x138] sm:$0xff] }
 0x449   : > { %v2918_v9 = vadd.f32 %v2917_v29, %v2873_v21  ;;  %3534 = vmatpush.msra.mxu3 %v3533_v38  ;;  %v3441_v29 = vld [vmem:[#allocation7 + $0x130] sm:$0xff] }
 0x44a   : > { %v2986_v41 = vpop.f32.mrf.mxu2  ;;  %v3031_v20 = vpop.f32.mrf.mxu3 }
 0x44b   : > { %v2987_v44 = vadd.f32 %v2986_v41, %v2912_v28  ;;  %3540 = vmatpush.msra.mxu3 %v3539_v25  ;;  %v9685_v28 = vand.u32 4294901760, %v3444_v61 }
 0x44d   : > { %v3028_v7 = vadd.f32 %v3027_v15, %v2987_v44  ;;  %v3443_v15 = vld [vmem:[#allocation7 + $0x140] sm:$0xff]  ;;  %v9688_v41 = vsub.f32 %v3444_v61, %v9685_v28  ;;  %3469 = vmatpush.msra.mxu2 %v9685_v28 }
 0x44e   : > { %v9690_v44 = vand.u32 4294901760, %v3443_v15  ;;  %v3435_v61 = vld [vmem:[#allocation7 + $0x100] sm:$0xff] }
 0x44f   : > { %v3034_v2 = vmax.f32 %v3028_v7, 0.0  ;;  %v3543_v7 = vand.u32 4294901760, %v9688_v41 }
 0x450   : > { %v9696_v21 = vsub.f32 %v3443_v15, %v9690_v44  ;;  %3471 = vmatpush.msra.mxu2 %v9690_v44 }
 0x451   : > { %v9607_v58 = vand.u32 4294901760, %v3034_v2 }
 0x452   : > { %v2990_v49 = vpop.f32.mrf.mxu2 }
 0x453   : > { %v3091_v0 = vsub.f32 %v3034_v2, %v9607_v58  ;;  %v2991_v60 = vadd.f32 %v2990_v49, %v2918_v9  ;;  %3204 = vmatmul.f32.vlgmr.msrb.gmra.mxu1 %v9607_v58  ;;  %v9698_v2 = vand.u32 4294901760, %v3442_v42  ;;  %v3549_v9 = vand.u32 4294901760, %v9696_v21 }
 0x454   : > { %3670 = vmatpush.msrb.mxu1 %v9611_v55 }
 0x455   : > { %v3032_v34 = vadd.f32 %v3031_v20, %v2991_v60  ;;  %3262 = vmatmul.f32.vlgmr.msrb.gmra.mxu2 %v3091_v0  ;;  %v3092_v48 = vand.u32 4294901760, %v3091_v0  ;;  %v9708_v49 = vsub.f32 %v3442_v42, %v9698_v2  ;;  %v3440_v60 = vld [vmem:[#allocation7 + $0x128] sm:$0xff]  ;;  %v3550_v46 = vsub.f32 %v9696_v21, %v3549_v9 }
 0x456   : > { %3672 = vmatpush.msrb.mxu1 %v9613_v23  ;;  %3473 = vmatpush.msra.mxu2 %v9698_v2  ;;  %v9724_v40 = vand.u32 4294901760, %v3440_v60 }
 0x457   : > { %v3035_v19 = vmax.f32 %v3032_v34, 0.0  ;;  %3306 = vmatmul.f32.vlgmr.msrb.gmra.mxu3 %v3092_v48  ;;  %v3093_v14 = vsub.f32 %v3091_v0, %v3092_v48  ;;  %v9710_v0 = vand.u32 4294901760, %v3441_v29  ;;  %v3555_v37 = vand.u32 4294901760, %v9708_v49 }
 0x458   : > { %3674 = vmatpush.msrb.mxu1 %v9615_v4  ;;  %v3551_v35 = vand.u32 4294901760, %v3550_v46 }
 0x459   : > { %v3098_v36 = vand.u32 4294901760, %v3035_v19  ;;  %v3094_v63 = vand.u32 4294901760, %v3093_v14  ;;  %v9720_v20 = vsub.f32 %v3441_v29, %v9710_v0  ;;  %3475 = vmatpush.msra.mxu2 %v9710_v0  ;;  %v3556_v34 = vsub.f32 %v9708_v49, %v3555_v37 }
 0x45a   : > { %3676 = vmatpush.msrb.mxu1 %v9617_v45  ;;  %v9735_v14 = vsub.f32 %v3440_v60, %v9724_v40  ;;  %v9775_v60 = vand.u32 4294901760, %v3435_v61 }
 0x45b   : > { %3095 = vmatmul.f32.vlgmr.msrb.gmra.mxu0 %v3094_v63  ;;  %3208 = vmatmul.f32.gmra.mxu1 %v3098_v36  ;;  %v3099_v12 = vsub.f32 %v3035_v19, %v3098_v36  ;;  %v3561_v48 = vand.u32 4294901760, %v9720_v20  ;;  %v9731_v19 = vand.u32 4294901760, %v3439_v27  ;;  %v3557_v63 = vand.u32 4294901760, %v3556_v34 }
 0x45c   : > { %3612 = vmatpush.msrb.mxu0 %v9622_v53  ;;  %3678 = vmatpush.msrb.mxu1 %v9619_v56 }
 0x45d   : > { %3267 = vmatmul.f32.gmra.mxu2 %v3099_v12  ;;  %v3100_v13 = vand.u32 4294901760, %v3099_v12  ;;  %v3562_v6 = vsub.f32 %v9720_v20, %v3561_v48  ;;  %v9743_v18 = vsub.f32 %v3439_v27, %v9731_v19 }
 0x45e   : > { %3615 = vmatpush.msrb.mxu0 %v9625_v32  ;;  %3680 = vmatpush.msrb.mxu1 %v9631_v59 }
 0x45f   : > { %3312 = vmatmul.f32.gmra.mxu3 %v3100_v13  ;;  %v3101_v22 = vsub.f32 %v3099_v12, %v3100_v13  ;;  %3477 = vmatpush.msra.mxu2 %v9724_v40  ;;  %v3567_v12 = vand.u32 4294901760, %v9735_v14  ;;  %v3563_v31 = vand.u32 4294901760, %v3562_v6  ;;  %v3573_v30 = vand.u32 4294901760, %v9743_v18 }
 0x460   : > { %3618 = vmatpush.msrb.mxu0 %v9628_v50  ;;  %3682 = vmatpush.msrb.mxu1 %v9685_v28 }
 0x461   : > { %v3102_v5 = vand.u32 4294901760, %v3101_v22  ;;  %3479 = vmatpush.msra.mxu2 %v9731_v19  ;;  %v3568_v52 = vsub.f32 %v9735_v14, %v3567_v12  ;;  %v3436_v22 = vld [vmem:[#allocation7 + $0x108] sm:$0xff]  ;;  %v3574_v24 = vsub.f32 %v9743_v18, %v3573_v30 }
 0x462   : > { %3621 = vmatpush.msrb.mxu0 %v9635_v47  ;;  %3684 = vmatpush.msrb.mxu1 %v9690_v44  ;;  %v9767_v38 = vand.u32 4294901760, %v3436_v22 }
 0x463   : > { %3103 = vmatmul.f32.gmra.mxu0 %v3102_v5  ;;  %3422 = vmatmul.f32.vlgmr.msra.gmra.mxu1 %v9607_v58  ;;  %v3584_v5 = vsub.f32 %v3437_v43, %v9754_v10  ;;  %v3569_v25 = vand.u32 4294901760, %v3568_v52  ;;  %v3575_v15 = vand.u32 4294901760, %v3574_v24 }
 0x464   : > { %3624 = vmatpush.msrb.mxu0 %v9638_v33  ;;  %3686 = vmatpush.msrb.mxu1 %v9698_v2 }
 0x465   : > { %v3585_v29 = vand.u32 4294901760, %v3584_v5 }
 0x466   : > { %3627 = vmatpush.msrb.mxu0 %v9645_v51  ;;  %3688 = vmatpush.msrb.mxu1 %v9710_v0 }
 0x467   : > { %v3586_v46 = vsub.f32 %v3584_v5, %v3585_v29 }
 0x468   : > { %3630 = vmatpush.msrb.mxu0 %v9688_v41  ;;  %3690 = vmatpush.msrb.mxu1 %v9724_v40 }
 0x469   : > { %v3587_v34 = vand.u32 4294901760, %v3586_v46 }
 0x46a   : > { %3633 = vmatpush.msrb.mxu0 %v9696_v21  ;;  %3692 = vmatpush.msrb.mxu1 %v9731_v19 }
 0x46b   : > { %3381 = vmatmul.f32.vlgmr.msra.gmra.mxu0 %v9607_v58  ;;  %3426 = vmatmul.f32.gmra.mxu1 %v3098_v36  ;;  %v3544_v58 = vsub.f32 %v9688_v41, %v3543_v7 }
 0x46c   : > { %3636 = vmatpush.msrb.mxu0 %v9708_v49 }
 0x46d   : > { %v3545_v39 = vand.u32 4294901760, %v3544_v58  ;;  %v3590_v58 = vsub.f32 %v3436_v22, %v9767_v38 }
 0x46e   : > { %3639 = vmatpush.msrb.mxu0 %v9720_v20 }
 0x46f   : > { %3546 = vmatpush.msra.mxu3 %v3545_v39  ;;  %v3591_v27 = vand.u32 4294901760, %v3590_v58 }
 0x470   : > { %3642 = vmatpush.msrb.mxu0 %v9735_v14 }
 0x471   : > { %3552 = vmatpush.msra.mxu3 %v3551_v35  ;;  %v3596_v35 = vsub.f32 %v3435_v61, %v9775_v60 }
 0x472   : > { %3645 = vmatpush.msrb.mxu0 %v9743_v18 }
 0x473   : > { %3385 = vmatmul.f32.gmra.mxu0 %v3098_v36  ;;  %v3438_v36 = vld [vmem:[#allocation7 + $0x118] sm:$0xff]  ;;  %3558 = vmatpush.msra.mxu3 %v3557_v63  ;;  %v3597_v63 = vand.u32 4294901760, %v3596_v35 }
 0x474   : > { %v9745_v57 = vand.u32 4294901760, %v3438_v36 }
 0x475   : > { %3564 = vmatpush.msra.mxu3 %v3563_v31  ;;  %v3598_v43 = vsub.f32 %v3596_v35, %v3597_v63 }
 0x476   : > { %v9752_v13 = vsub.f32 %v3438_v36, %v9745_v57  ;;  %3481 = vmatpush.msra.mxu2 %v9745_v57  ;;  %3694 = vmatpush.msrb.mxu1 %v9745_v57  ;;  %v3592_v36 = vsub.f32 %v3590_v58, %v3591_v27 }
 0x477   : > { %3570 = vmatpush.msra.mxu3 %v3569_v25  ;;  %v3599_v31 = vand.u32 4294901760, %v3598_v43 }
 0x478   : > { %v3579_v8 = vand.u32 4294901760, %v9752_v13  ;;  %3483 = vmatpush.msra.mxu2 %v9754_v10  ;;  %3648 = vmatpush.msrb.mxu0 %v9752_v13  ;;  %v3593_v6 = vand.u32 4294901760, %v3592_v36 }
 0x479   : > { %3696 = vmatpush.msrb.mxu1 %v9754_v10  ;;  %3576 = vmatpush.msra.mxu3 %v3575_v15 }
 0x47a   : > { %v3580_v42 = vsub.f32 %v9752_v13, %v3579_v8  ;;  %3485 = vmatpush.msra.mxu2 %v9767_v38  ;;  %3651 = vmatpush.msrb.mxu0 %v3584_v5 }
 0x47b   : > { %3698 = vmatpush.msrb.mxu1 %v9767_v38 }
 0x47c   : > { %v3581_v39 = vand.u32 4294901760, %v3580_v42  ;;  %3487 = vmatpush.msra.mxu2 %v9775_v60  ;;  %3654 = vmatpush.msrb.mxu0 %v3590_v58 }
 0x47d   : > { %3700 = vmatpush.msrb.mxu1 %v9775_v60 }
 0x47e   : > { %3717 = vmatpush.msrb.mxu2 %v3507_v17  ;;  %3582 = vmatpush.msra.mxu3 %v3581_v39 }
 0x47f   : > { %3657 = vmatpush.msrb.mxu0 %v3596_v35 }
 0x480   : > { %3721 = vmatpush.msrb.mxu2 %v3513_v1  ;;  %3588 = vmatpush.msra.mxu3 %v3587_v34 }
 0x482   : > { %3725 = vmatpush.msrb.mxu2 %v3519_v11  ;;  %3594 = vmatpush.msra.mxu3 %v3593_v6 }
 0x484   : > { %3729 = vmatpush.msrb.mxu2 %v3525_v26  ;;  %3600 = vmatpush.msra.mxu3 %v3599_v31 }
 0x486   : > { %3788 = vmatpush.msrb.mxu3 %v9611_v55  ;;  %3733 = vmatpush.msrb.mxu2 %v3531_v62 }
 0x488   : > { %3790 = vmatpush.msrb.mxu3 %v9613_v23  ;;  %3737 = vmatpush.msrb.mxu2 %v3537_v3  ;;  %v7357_v23 = vld [vmem:[#allocation13 + $0x1] ss:$0 sm:$0xff] }
 0x48a   : > { %3792 = vmatpush.msrb.mxu3 %v9615_v4  ;;  %3741 = vmatpush.msrb.mxu2 %v3543_v7 }
 0x48c   : > { %3794 = vmatpush.msrb.mxu3 %v9617_v45  ;;  %3745 = vmatpush.msrb.mxu2 %v3549_v9 }
 0x48e   : > { %3796 = vmatpush.msrb.mxu3 %v9619_v56  ;;  %3749 = vmatpush.msrb.mxu2 %v3555_v37 }
 0x490   : > { %3798 = vmatpush.msrb.mxu3 %v9631_v59  ;;  %3753 = vmatpush.msrb.mxu2 %v3561_v48  ;;  %v3845_v48 = vld [vmem:[#allocation10 + $0x170] sm:$0xff] }
 0x491   : > { %v9833_v14 = vand.u32 4294901760, %v3845_v48 }
 0x492   : > { %3800 = vmatpush.msrb.mxu3 %v9685_v28  ;;  %3757 = vmatpush.msrb.mxu2 %v3567_v12  ;;  %v3842_v12 = vld [vmem:[#allocation10 + $0x158] sm:$0xff] }
 0x493   : > { %v9840_v52 = vand.u32 4294901760, %v3842_v12  ;;  %v9846_v24 = vsub.f32 %v3845_v48, %v9833_v14 }
 0x494   : > { %3802 = vmatpush.msrb.mxu3 %v9690_v44  ;;  %3761 = vmatpush.msrb.mxu2 %v3573_v30 }
 0x495   : > { %v9859_v25 = vsub.f32 %v3842_v12, %v9840_v52  ;;  %v3909_v15 = vand.u32 4294901760, %v9846_v24 }
 0x496   : > { %3804 = vmatpush.msrb.mxu3 %v9698_v2  ;;  %3765 = vmatpush.msrb.mxu2 %v3579_v8 }
 0x497   : > { %v3910_v46 = vsub.f32 %v9846_v24, %v3909_v15  ;;  %v3927_v35 = vand.u32 4294901760, %v9859_v25 }
 0x498   : > { %3806 = vmatpush.msrb.mxu3 %v9710_v0  ;;  %3769 = vmatpush.msrb.mxu2 %v3585_v29 }
 0x49a   : > { %3808 = vmatpush.msrb.mxu3 %v9724_v40  ;;  %3773 = vmatpush.msrb.mxu2 %v3591_v27  ;;  %v3846_v40 = vld [vmem:[#allocation10 + $0x178] sm:$0xff] }
 0x49c   : > { %3810 = vmatpush.msrb.mxu3 %v9731_v19  ;;  %3777 = vmatpush.msrb.mxu2 %v3597_v63  ;;  %v3844_v19 = vld [vmem:[#allocation10 + $0x168] sm:$0xff]  ;;  %v3911_v63 = vand.u32 4294901760, %v3910_v46 }
 0x49d   : > { %v9835_v18 = vand.u32 4294901760, %v3844_v19 }
 0x49e   : > { %3812 = vmatpush.msrb.mxu3 %v9745_v57  ;;  %v3843_v57 = vld [vmem:[#allocation10 + $0x160] sm:$0xff] }
 0x49f   : > { %v9849_v8 = vsub.f32 %v3844_v19, %v9835_v18 }
 0x4a0   : > { %3814 = vmatpush.msrb.mxu3 %v9754_v10  ;;  %v9838_v10 = vand.u32 4294901760, %v3843_v57 }
 0x4a1   : > { %v3915_v42 = vand.u32 4294901760, %v9849_v8 }
 0x4a2   : > { %3816 = vmatpush.msrb.mxu3 %v9767_v38  ;;  %v9856_v38 = vsub.f32 %v3843_v57, %v9838_v10  ;;  %v3835_v57 = vld [vmem:[#allocation10 + $0x120] sm:$0xff] }
 0x4a3   : > { %v3916_v27 = vsub.f32 %v9849_v8, %v3915_v42 }
 0x4a4   : > { %3818 = vmatpush.msrb.mxu3 %v9775_v60  ;;  %v3921_v60 = vand.u32 4294901760, %v9856_v38 }
 0x4a5   : > { %v3917_v31 = vand.u32 4294901760, %v3916_v27 }
 0x4a6   : > { %v3922_v6 = vsub.f32 %v9856_v38, %v3921_v60 }
 0x4d0   : > { %v3205_v55 = vpop.f32.mrf.mxu1 }
 0x4d8   : > { %v3096_v4 = vpop.f32.mrf.mxu0  ;;  %v3209_v56 = vpop.f32.mrf.mxu1 }
 0x4d9   : > { %v3097_v45 = vadd.f32 %v7357_v23, %v3096_v4  ;;  %v3263_v32 = vpop.f32.mrf.mxu2  ;;  %v3923_v4 = vand.u32 4294901760, %v3922_v6 }
 0x4da   : > { %v3307_v33 = vpop.f32.mrf.mxu3 }
 0x4db   : > { %v3206_v53 = vadd.f32 %v3205_v55, %v3097_v45  ;;  %v3928_v55 = vsub.f32 %v9859_v25, %v3927_v35 }
 0x4dd   : > { %v3264_v59 = vadd.f32 %v3263_v32, %v3206_v53  ;;  %v3841_v53 = vld [vmem:[#allocation10 + $0x150] sm:$0xff] }
 0x4de   : > { %v9898_v32 = vand.u32 4294901760, %v3841_v53 }
 0x4df   : > { %v3308_v17 = vadd.f32 %v3307_v33, %v3264_v59  ;;  %v3839_v33 = vld [vmem:[#allocation10 + $0x140] sm:$0xff] }
 0x4e0   : > { %v3104_v50 = vpop.f32.mrf.mxu0  ;;  %v3423_v11 = vpop.f32.mrf.mxu1  ;;  %v9901_v59 = vsub.f32 %v3841_v53, %v9898_v32 }
 0x4e1   : > { %v3105_v47 = vadd.f32 %v7357_v23, %v3104_v50  ;;  %v3268_v62 = vpop.f32.mrf.mxu2  ;;  %v3840_v50 = vld [vmem:[#allocation10 + $0x148] sm:$0xff] }
 0x4e2   : > { %v3313_v44 = vpop.f32.mrf.mxu3 }
 0x4e3   : > { %v3210_v1 = vadd.f32 %v3209_v56, %v3105_v47  ;;  %v3929_v56 = vand.u32 4294901760, %v3928_v55  ;;  %v9903_v47 = vand.u32 4294901760, %v3840_v50 }
 0x4e5   : > { %v3269_v3 = vadd.f32 %v3268_v62, %v3210_v1  ;;  %v9909_v1 = vsub.f32 %v3840_v50, %v9903_v47 }
 0x4e7   : > { %v3314_v7 = vadd.f32 %v3313_v44, %v3269_v3  ;;  %v3939_v62 = vand.u32 4294901760, %v9909_v1 }
 0x4e8   : > { %v3382_v51 = vpop.f32.mrf.mxu0  ;;  %v3427_v0 = vpop.f32.mrf.mxu1 }
 0x4e9   : > { %v3383_v26 = vadd.f32 %v3382_v51, %v3308_v17  ;;  %v3933_v17 = vand.u32 4294901760, %v9901_v59  ;;  %v3838_v51 = vld [vmem:[#allocation10 + $0x138] sm:$0xff] }
 0x4eb   : > { %v3424_v28 = vadd.f32 %v3423_v11, %v3383_v26  ;;  %v9911_v11 = vand.u32 4294901760, %v3839_v33  ;;  %v3934_v26 = vsub.f32 %v9901_v59, %v3933_v17 }
 0x4ed   : > { %v3430_v41 = vadd.f32 %v3424_v28, %v9169_v54  ;;  %v9831_v54 = vand.u32 4294901760, %v3846_v40  ;;  %v9921_v3 = vsub.f32 %v3839_v33, %v9911_v11  ;;  %v9923_v28 = vand.u32 4294901760, %v3838_v51 }
 0x4ee   : > { %v3935_v44 = vand.u32 4294901760, %v3934_v26 }
 0x4ef   : > { %v9823_v21 = vmax.f32 %v3430_v41, 0.0  ;;  %v9843_v22 = vsub.f32 %v3846_v40, %v9831_v54  ;;  %3853 = vmatpush.msra.mxu0 %v9831_v54  ;;  %v3837_v41 = vld [vmem:[#allocation10 + $0x130] sm:$0xff] }
 0x4f0   : > { %v3386_v2 = vpop.f32.mrf.mxu0 }
 0x4f1   : > { %v3387_v9 = vadd.f32 %v3386_v2, %v3314_v7  ;;  %v9826_v49 = vand.u32 4294901760, %v9823_v21  ;;  %v3903_v61 = vand.u32 4294901760, %v9843_v22  ;;  %3855 = vmatpush.msra.mxu0 %v9833_v14  ;;  %v3940_v7 = vsub.f32 %v9909_v1, %v3939_v62 }
 0x4f2   : > { %v3945_v2 = vand.u32 4294901760, %v9921_v3 }
 0x4f3   : > { %v3428_v37 = vadd.f32 %v3427_v0, %v3387_v9  ;;  %3602 = vmatmul.f32.vlgmr.msra.gmra.mxu3 %v9826_v49  ;;  %v3489_v20 = vsub.f32 %v9823_v21, %v9826_v49  ;;  %v3904_v39 = vsub.f32 %v9843_v22, %v3903_v61  ;;  %3857 = vmatpush.msra.mxu0 %v9835_v18  ;;  %v3836_v0 = vld [vmem:[#allocation10 + $0x128] sm:$0xff] }
 0x4f4   : > { %4066 = vmatpush.msra.mxu3 %v9831_v54  ;;  %v9933_v9 = vsub.f32 %v3838_v51, %v9923_v28  ;;  %v9944_v48 = vand.u32 4294901760, %v3836_v0  ;;  %v3831_v51 = vld [vmem:[#allocation10 + $0x100] sm:$0xff] }
 0x4f5   : > { %v3431_v30 = vadd.f32 %v3428_v37, %v9201_v16  ;;  %3660 = vmatmul.f32.vlgmr.msrb.gmra.mxu0 %v3489_v20  ;;  %v3490_v13 = vand.u32 4294901760, %v3489_v20  ;;  %v3905_v36 = vand.u32 4294901760, %v3904_v39  ;;  %v3941_v37 = vand.u32 4294901760, %v3940_v7 }
 0x4f6   : > { %4068 = vmatpush.msra.mxu3 %v9833_v14  ;;  %3859 = vmatpush.msra.mxu0 %v9838_v10  ;;  %v3951_v40 = vand.u32 4294901760, %v9933_v9  ;;  %v9997_v7 = vand.u32 4294901760, %v3831_v51 }
 0x4f7   : > { %v9853_v16 = vmax.f32 %v3431_v30, 0.0  ;;  %3704 = vmatmul.f32.vlgmr.msrb.gmra.mxu1 %v3490_v13  ;;  %v3491_v5 = vsub.f32 %v3489_v20, %v3490_v13  ;;  %v3946_v20 = vsub.f32 %v9921_v3, %v3945_v2  ;;  %v9956_v13 = vsub.f32 %v3836_v0, %v9944_v48 }
 0x4f8   : > { %4070 = vmatpush.msra.mxu3 %v9835_v18  ;;  %3906 = vmatpush.msra.mxu1 %v3905_v36  ;;  %v3952_v30 = vsub.f32 %v9933_v9, %v3951_v40 }
 0x4f9   : > { %v3492_v29 = vand.u32 4294901760, %v3491_v5  ;;  %v3496_v58 = vand.u32 4294901760, %v9853_v16  ;;  %3861 = vmatpush.msra.mxu0 %v9840_v52  ;;  %v3947_v12 = vand.u32 4294901760, %v3946_v20  ;;  %v9958_v5 = vand.u32 4294901760, %v3835_v57 }
 0x4fa   : > { %4072 = vmatpush.msra.mxu3 %v9838_v10  ;;  %3912 = vmatpush.msra.mxu1 %v3911_v63  ;;  %v3953_v39 = vand.u32 4294901760, %v3952_v30  ;;  %v3963_v46 = vand.u32 4294901760, %v9956_v13  ;;  %v3833_v63 = vld [vmem:[#allocation10 + $0x110] sm:$0xff] }
 0x4fb   : > { %3493 = vmatmul.f32.vlgmr.msra.gmra.mxu2 %v3492_v29  ;;  %3606 = vmatmul.f32.gmra.mxu3 %v3496_v58  ;;  %v3497_v34 = vsub.f32 %v9853_v16, %v3496_v58  ;;  %v9965_v27 = vsub.f32 %v3835_v57, %v9958_v5  ;;  %v9982_v55 = vand.u32 4294901760, %v3833_v63  ;;  %v3992_v57 = vsub.f32 %v3831_v51, %v9997_v7 }
 0x4fc   : > { %4008 = vmatpush.msra.mxu2 %v9843_v22  ;;  %4074 = vmatpush.msra.mxu3 %v9840_v52  ;;  %v3964_v6 = vsub.f32 %v9956_v13, %v3963_v46 }
 0x4fd   : > { %3665 = vmatmul.f32.gmra.mxu0 %v3497_v34  ;;  %v3498_v43 = vand.u32 4294901760, %v3497_v34  ;;  %3918 = vmatpush.msra.mxu1 %v3917_v31  ;;  %v3980_v50 = vsub.f32 %v3833_v63, %v9982_v55 }
 0x4fe   : > { %4011 = vmatpush.msra.mxu2 %v9846_v24  ;;  %3863 = vmatpush.msra.mxu0 %v9898_v32 }
 0x4ff   : > { %3710 = vmatmul.f32.gmra.mxu1 %v3498_v43  ;;  %v3499_v23 = vsub.f32 %v3497_v34, %v3498_v43  ;;  %4076 = vmatpush.msra.mxu3 %v9898_v32  ;;  %v3969_v43 = vand.u32 4294901760, %v9965_v27 }
 0x500   : > { %4014 = vmatpush.msra.mxu2 %v9849_v8  ;;  %3924 = vmatpush.msra.mxu1 %v3923_v4  ;;  %v3832_v4 = vld [vmem:[#allocation10 + $0x108] sm:$0xff] }
 0x501   : > { %v3500_v45 = vand.u32 4294901760, %v3499_v23  ;;  %3865 = vmatpush.msra.mxu0 %v9903_v47  ;;  %4078 = vmatpush.msra.mxu3 %v9903_v47  ;;  %v9993_v33 = vand.u32 4294901760, %v3832_v4 }
 0x502   : > { %4017 = vmatpush.msra.mxu2 %v9856_v38  ;;  %3930 = vmatpush.msra.mxu1 %v3929_v56  ;;  %v3970_v56 = vsub.f32 %v9965_v27, %v3969_v43 }
 0x503   : > { %3501 = vmatmul.f32.gmra.mxu2 %v3500_v45  ;;  %3820 = vmatmul.f32.vlgmr.msrb.gmra.mxu3 %v9826_v49  ;;  %v3965_v45 = vand.u32 4294901760, %v3964_v6  ;;  %v3986_v0 = vsub.f32 %v3832_v4, %v9993_v33 }
 0x504   : > { %4020 = vmatpush.msra.mxu2 %v9859_v25  ;;  %3867 = vmatpush.msra.mxu0 %v9911_v11  ;;  %v3971_v26 = vand.u32 4294901760, %v3970_v56 }
 0x505   : > { %4080 = vmatpush.msra.mxu3 %v9911_v11  ;;  %3936 = vmatpush.msra.mxu1 %v3935_v44  ;;  %v3981_v44 = vand.u32 4294901760, %v3980_v50 }
 0x506   : > { %4023 = vmatpush.msra.mxu2 %v9901_v59  ;;  %3869 = vmatpush.msra.mxu0 %v9923_v28 }
 0x507   : > { %4082 = vmatpush.msra.mxu3 %v9923_v28  ;;  %3942 = vmatpush.msra.mxu1 %v3941_v37  ;;  %v3982_v20 = vsub.f32 %v3980_v50, %v3981_v44 }
 0x508   : > { %4026 = vmatpush.msra.mxu2 %v9909_v1 }
 0x509   : > { %3948 = vmatpush.msra.mxu1 %v3947_v12  ;;  %v3987_v12 = vand.u32 4294901760, %v3986_v0  ;;  %v3983_v30 = vand.u32 4294901760, %v3982_v20 }
 0x50a   : > { %4029 = vmatpush.msra.mxu2 %v9921_v3 }
 0x50b   : > { %3779 = vmatmul.f32.vlgmr.msrb.gmra.mxu2 %v9826_v49  ;;  %3824 = vmatmul.f32.gmra.mxu3 %v3496_v58  ;;  %v9937_v49 = vand.u32 4294901760, %v3837_v41 }
 0x50c   : > { %4032 = vmatpush.msra.mxu2 %v9933_v9  ;;  %3954 = vmatpush.msra.mxu1 %v3953_v39  ;;  %v3988_v39 = vsub.f32 %v3986_v0, %v3987_v12 }
 0x50d   : > { %v9948_v19 = vsub.f32 %v3837_v41, %v9937_v49  ;;  %3871 = vmatpush.msra.mxu0 %v9937_v49  ;;  %4084 = vmatpush.msra.mxu3 %v9937_v49 }
 0x50e   : > { %v3989_v63 = vand.u32 4294901760, %v3988_v39 }
 0x50f   : > { %v3957_v29 = vand.u32 4294901760, %v9948_v19  ;;  %3873 = vmatpush.msra.mxu0 %v9944_v48  ;;  %4035 = vmatpush.msra.mxu2 %v9948_v19 }
 0x510   : > { %4086 = vmatpush.msra.mxu3 %v9944_v48 }
 0x511   : > { %v3958_v36 = vsub.f32 %v9948_v19, %v3957_v29  ;;  %3875 = vmatpush.msra.mxu0 %v9958_v5  ;;  %4038 = vmatpush.msra.mxu2 %v9956_v13 }
 0x512   : > { %4088 = vmatpush.msra.mxu3 %v9958_v5 }
 0x513   : > { %3783 = vmatmul.f32.gmra.mxu2 %v3496_v58  ;;  %v3834_v58 = vld [vmem:[#allocation10 + $0x118] sm:$0xff]  ;;  %v3959_v23 = vand.u32 4294901760, %v3958_v36 }
 0x514   : > { %v9967_v34 = vand.u32 4294901760, %v3834_v58  ;;  %4041 = vmatpush.msra.mxu2 %v9965_v27  ;;  %v4238_v27 = vld [vmem:[#allocation11 + $0x158] sm:$0xff] }
 0x515   : > { %3960 = vmatpush.msra.mxu1 %v3959_v23  ;;  %v10059_v23 = vand.u32 4294901760, %v4238_v27 }
 0x516   : > { %v9980_v31 = vsub.f32 %v3834_v58, %v9967_v34  ;;  %3877 = vmatpush.msra.mxu0 %v9967_v34  ;;  %4090 = vmatpush.msra.mxu3 %v9967_v34  ;;  %v3993_v58 = vand.u32 4294901760, %v3992_v57 }
 0x517   : > { %3966 = vmatpush.msra.mxu1 %v3965_v45 }
 0x518   : > { %v3975_v53 = vand.u32 4294901760, %v9980_v31  ;;  %3879 = vmatpush.msra.mxu0 %v9982_v55  ;;  %4044 = vmatpush.msra.mxu2 %v9980_v31  ;;  %v3994_v36 = vsub.f32 %v3992_v57, %v3993_v58 }
 0x519   : > { %4092 = vmatpush.msra.mxu3 %v9982_v55  ;;  %3972 = vmatpush.msra.mxu1 %v3971_v26  ;;  %v10078_v26 = vsub.f32 %v4238_v27, %v10059_v23  ;;  %v4231_v27 = vld [vmem:[#allocation11 + $0x120] sm:$0xff] }
 0x51a   : > { %v3976_v41 = vsub.f32 %v9980_v31, %v3975_v53  ;;  %3881 = vmatpush.msra.mxu0 %v9993_v33  ;;  %4047 = vmatpush.msra.mxu2 %v3980_v50  ;;  %v3995_v6 = vand.u32 4294901760, %v3994_v36 }
 0x51b   : > { %4094 = vmatpush.msra.mxu3 %v9993_v33  ;;  %v4323_v36 = vand.u32 4294901760, %v10078_v26 }
 0x51c   : > { %v3977_v37 = vand.u32 4294901760, %v3976_v41  ;;  %3883 = vmatpush.msra.mxu0 %v9997_v7  ;;  %4050 = vmatpush.msra.mxu2 %v3986_v0 }
 0x51d   : > { %4096 = vmatpush.msra.mxu3 %v9997_v7 }
 0x51e   : > { %4113 = vmatpush.msrb.mxu0 %v3903_v61  ;;  %3978 = vmatpush.msra.mxu1 %v3977_v37  ;;  %v4236_v37 = vld [vmem:[#allocation11 + $0x148] sm:$0xff] }
 0x51f   : > { %4053 = vmatpush.msra.mxu2 %v3992_v57 }
 0x520   : > { %4117 = vmatpush.msrb.mxu0 %v3909_v15  ;;  %3984 = vmatpush.msra.mxu1 %v3983_v30 }
 0x522   : > { %4121 = vmatpush.msrb.mxu0 %v3915_v42  ;;  %3990 = vmatpush.msra.mxu1 %v3989_v63 }
 0x524   : > { %4125 = vmatpush.msrb.mxu0 %v3921_v60  ;;  %3996 = vmatpush.msra.mxu1 %v3995_v6  ;;  %v10101_v6 = vand.u32 4294901760, %v4236_v37 }
 0x526   : > { %4184 = vmatpush.msrb.mxu1 %v9831_v54  ;;  %4129 = vmatpush.msrb.mxu0 %v3927_v35 }
 0x528   : > { %4186 = vmatpush.msrb.mxu1 %v9833_v14  ;;  %4133 = vmatpush.msrb.mxu0 %v3933_v17  ;;  %v7358_v14 = vld [vmem:[#allocation8 + $0x2] ss:$0 sm:$0xff] }
 0x52a   : > { %4188 = vmatpush.msrb.mxu1 %v9835_v18  ;;  %4137 = vmatpush.msrb.mxu0 %v3939_v62 }
 0x52c   : > { %4190 = vmatpush.msrb.mxu1 %v9838_v10  ;;  %4141 = vmatpush.msrb.mxu0 %v3945_v2 }
 0x52e   : > { %4192 = vmatpush.msrb.mxu1 %v9840_v52  ;;  %4145 = vmatpush.msrb.mxu0 %v3951_v40  ;;  %v4241_v40 = vld [vmem:[#allocation11 + $0x170] sm:$0xff] }
 0x530   : > { %4194 = vmatpush.msrb.mxu1 %v9898_v32  ;;  %4149 = vmatpush.msrb.mxu0 %v3957_v29 }
 0x532   : > { %4196 = vmatpush.msrb.mxu1 %v9903_v47  ;;  %4153 = vmatpush.msrb.mxu0 %v3963_v46  ;;  %v4239_v46 = vld [vmem:[#allocation11 + $0x160] sm:$0xff] }
 0x534   : > { %4198 = vmatpush.msrb.mxu1 %v9911_v11  ;;  %4157 = vmatpush.msrb.mxu0 %v3969_v43 }
 0x536   : > { %4200 = vmatpush.msrb.mxu1 %v9923_v28  ;;  %4161 = vmatpush.msrb.mxu0 %v3975_v53 }
 0x538   : > { %4202 = vmatpush.msrb.mxu1 %v9937_v49  ;;  %4165 = vmatpush.msrb.mxu0 %v3981_v44  ;;  %v4242_v49 = vld [vmem:[#allocation11 + $0x178] sm:$0xff] }
 0x539   : > { %v10051_v13 = vand.u32 4294901760, %v4242_v49 }
 0x53a   : > { %4204 = vmatpush.msrb.mxu1 %v9944_v48  ;;  %4169 = vmatpush.msrb.mxu0 %v3987_v12  ;;  %v4240_v48 = vld [vmem:[#allocation11 + $0x168] sm:$0xff] }
 0x53b   : > { %v10055_v29 = vand.u32 4294901760, %v4240_v48  ;;  %v10062_v4 = vsub.f32 %v4242_v49, %v10051_v13  ;;  %4249 = vmatpush.msrb.mxu2 %v10051_v13  ;;  %v4232_v49 = vld [vmem:[#allocation11 + $0x128] sm:$0xff] }
 0x53c   : > { %4206 = vmatpush.msrb.mxu1 %v9958_v5  ;;  %4173 = vmatpush.msrb.mxu0 %v3993_v58  ;;  %v10053_v5 = vand.u32 4294901760, %v4241_v40 }
 0x53d   : > { %v10068_v56 = vsub.f32 %v4240_v48, %v10055_v29  ;;  %v4299_v41 = vand.u32 4294901760, %v10062_v4 }
 0x53e   : > { %4208 = vmatpush.msrb.mxu1 %v9967_v34  ;;  %v4237_v34 = vld [vmem:[#allocation11 + $0x150] sm:$0xff]  ;;  %v10065_v45 = vsub.f32 %v4241_v40, %v10053_v5  ;;  %4251 = vmatpush.msrb.mxu2 %v10053_v5 }
 0x53f   : > { %v10071_v53 = vand.u32 4294901760, %v4237_v34  ;;  %v4300_v30 = vsub.f32 %v10062_v4, %v4299_v41 }
 0x540   : > { %4210 = vmatpush.msrb.mxu1 %v9982_v55  ;;  %v10057_v55 = vand.u32 4294901760, %v4239_v46  ;;  %v4305_v44 = vand.u32 4294901760, %v10065_v45  ;;  %4253 = vmatpush.msrb.mxu2 %v10055_v29 }
 0x541   : > { %v10085_v0 = vsub.f32 %v4237_v34, %v10071_v53 }
 0x542   : > { %4212 = vmatpush.msrb.mxu1 %v9993_v33  ;;  %v10075_v51 = vsub.f32 %v4239_v46, %v10057_v55  ;;  %v4306_v58 = vsub.f32 %v10065_v45, %v4305_v44  ;;  %4255 = vmatpush.msrb.mxu2 %v10057_v55  ;;  %v10162_v46 = vand.u32 4294901760, %v4232_v49 }
 0x544   : > { %4214 = vmatpush.msrb.mxu1 %v9997_v7  ;;  %v4311_v7 = vand.u32 4294901760, %v10068_v56  ;;  %v4317_v12 = vand.u32 4294901760, %v10075_v51  ;;  %4257 = vmatpush.msrb.mxu2 %v10059_v23 }
 0x546   : > { %v4312_v39 = vsub.f32 %v10068_v56, %v4311_v7  ;;  %4259 = vmatpush.msrb.mxu2 %v10071_v53 }
 0x548   : > { %4261 = vmatpush.msrb.mxu2 %v10101_v6 }
 0x572   : > { %v3661_v24 = vpop.f32.mrf.mxu0 }
 0x574   : > { %v3705_v61 = vpop.f32.mrf.mxu1 }
 0x576   : > { %v3603_v54 = vpop.f32.mrf.mxu3 }
 0x57a   : > { %v3666_v59 = vpop.f32.mrf.mxu0 }
 0x57c   : > { %v3711_v11 = vpop.f32.mrf.mxu1 }
 0x57e   : > { %v3494_v18 = vpop.f32.mrf.mxu2  ;;  %v3607_v52 = vpop.f32.mrf.mxu3 }
 0x57f   : > { %v3495_v10 = vadd.f32 %v7358_v14, %v3494_v18  ;;  %v4318_v18 = vsub.f32 %v10075_v51, %v4317_v12 }
 0x581   : > { %v3604_v22 = vadd.f32 %v3603_v54, %v3495_v10  ;;  %v4301_v54 = vand.u32 4294901760, %v4300_v30  ;;  %v4329_v10 = vand.u32 4294901760, %v10085_v0 }
 0x583   : > { %v3662_v25 = vadd.f32 %v3661_v24, %v3604_v22  ;;  %v10110_v22 = vsub.f32 %v4236_v37, %v10101_v6  ;;  %4302 = vmatpush.msrb.mxu3 %v4301_v54  ;;  %v4313_v24 = vand.u32 4294901760, %v4312_v39  ;;  %v4230_v37 = vld [vmem:[#allocation11 + $0x118] sm:$0xff] }
 0x585   : > { %v3706_v42 = vadd.f32 %v3705_v61, %v3662_v25  ;;  %v4335_v25 = vand.u32 4294901760, %v10110_v22  ;;  %v4319_v61 = vand.u32 4294901760, %v4318_v18 }
 0x586   : > { %v3502_v8 = vpop.f32.mrf.mxu2  ;;  %v3821_v60 = vpop.f32.mrf.mxu3 }
 0x587   : > { %v3503_v38 = vadd.f32 %v7358_v14, %v3502_v8  ;;  %v4307_v14 = vand.u32 4294901760, %v4306_v58  ;;  %v4324_v8 = vsub.f32 %v10078_v26, %v4323_v36  ;;  %v10183_v58 = vand.u32 4294901760, %v4230_v37 }
 0x589   : > { %v3608_v15 = vadd.f32 %v3607_v52, %v3503_v38  ;;  %4308 = vmatpush.msrb.mxu3 %v4307_v14  ;;  %v10195_v18 = vsub.f32 %v4230_v37, %v10183_v58 }
 0x58b   : > { %v3667_v17 = vadd.f32 %v3666_v59, %v3608_v15  ;;  %v4330_v15 = vsub.f32 %v10085_v0, %v4329_v10  ;;  %4314 = vmatpush.msrb.mxu3 %v4313_v24 }
 0x58d   : > { %v3712_v3 = vadd.f32 %v3711_v11, %v3667_v17  ;;  %4320 = vmatpush.msrb.mxu3 %v4319_v61  ;;  %v4371_v61 = vand.u32 4294901760, %v10195_v18 }
 0x58e   : > { %v3780_v35 = vpop.f32.mrf.mxu2  ;;  %v3825_v19 = vpop.f32.mrf.mxu3 }
 0x58f   : > { %v3781_v32 = vadd.f32 %v3780_v35, %v3706_v42  ;;  %v4336_v35 = vsub.f32 %v10110_v22, %v4335_v25 }
 0x591   : > { %v3822_v47 = vadd.f32 %v3821_v60, %v3781_v32  ;;  %v4325_v60 = vand.u32 4294901760, %v4324_v8  ;;  %v4331_v32 = vand.u32 4294901760, %v4330_v15  ;;  %v4337_v59 = vand.u32 4294901760, %v4336_v35  ;;  %v4228_v8 = vld [vmem:[#allocation11 + $0x108] sm:$0xff]  ;;  %v4227_v35 = vld [vmem:[#allocation11 + $0x100] sm:$0xff] }
 0x593   : > { %v3828_v1 = vmax.f32 %v3822_v47, 0.0  ;;  %4326 = vmatpush.msrb.mxu3 %v4325_v60  ;;  %v4235_v47 = vld [vmem:[#allocation11 + $0x140] sm:$0xff] }
 0x594   : > { %v10137_v17 = vand.u32 4294901760, %v4235_v47 }
 0x595   : > { %v10047_v62 = vand.u32 4294901760, %v3828_v1  ;;  %4332 = vmatpush.msrb.mxu3 %v4331_v32  ;;  %v4372_v32 = vsub.f32 %v10195_v18, %v4371_v61 }
 0x596   : > { %v3784_v28 = vpop.f32.mrf.mxu2  ;;  %v10140_v11 = vsub.f32 %v4235_v47, %v10137_v17  ;;  %4263 = vmatpush.msrb.mxu2 %v10137_v17 }
 0x597   : > { %v3885_v2 = vsub.f32 %v3828_v1, %v10047_v62  ;;  %v3785_v9 = vadd.f32 %v3784_v28, %v3712_v3  ;;  %3998 = vmatmul.f32.vlgmr.msra.gmra.mxu1 %v10047_v62  ;;  %4338 = vmatpush.msrb.mxu3 %v4337_v59  ;;  %v4234_v1 = vld [vmem:[#allocation11 + $0x138] sm:$0xff]  ;;  %v4233_v28 = vld [vmem:[#allocation11 + $0x130] sm:$0xff] }
 0x598   : > { %4462 = vmatpush.msra.mxu1 %v10051_v13  ;;  %v10142_v3 = vand.u32 4294901760, %v4234_v1 }
 0x599   : > { %v3886_v43 = vand.u32 4294901760, %v3885_v2  ;;  %v3826_v31 = vadd.f32 %v3825_v19, %v3785_v9  ;;  %4056 = vmatmul.f32.vlgmr.msra.gmra.mxu2 %v3885_v2  ;;  %v10150_v9 = vand.u32 4294901760, %v4233_v28 }
 0x59a   : > { %4464 = vmatpush.msra.mxu1 %v10053_v5  ;;  %4265 = vmatpush.msrb.mxu2 %v10142_v3 }
 0x59b   : > { %v3887_v50 = vsub.f32 %v3885_v2, %v3886_v43  ;;  %v3829_v33 = vmax.f32 %v3826_v31, 0.0  ;;  %4100 = vmatmul.f32.vlgmr.msra.gmra.mxu3 %v3886_v43  ;;  %v4341_v2 = vand.u32 4294901760, %v10140_v11  ;;  %v10160_v19 = vsub.f32 %v4233_v28, %v10150_v9 }
 0x59c   : > { %4466 = vmatpush.msra.mxu1 %v10055_v29  ;;  %4267 = vmatpush.msrb.mxu2 %v10150_v9 }
 0x59d   : > { %v3888_v20 = vand.u32 4294901760, %v3887_v50  ;;  %v3892_v57 = vand.u32 4294901760, %v3829_v33  ;;  %v4342_v40 = vsub.f32 %v10140_v11, %v4341_v2  ;;  %v4353_v31 = vand.u32 4294901760, %v10160_v19 }
 0x59e   : > { %4468 = vmatpush.msra.mxu1 %v10057_v55  ;;  %v10172_v50 = vsub.f32 %v4232_v49, %v10162_v46  ;;  %4269 = vmatpush.msrb.mxu2 %v10162_v46  ;;  %v4373_v49 = vand.u32 4294901760, %v4372_v32 }
 0x59f   : > { %3889 = vmatmul.f32.vlgmr.msra.gmra.mxu0 %v3888_v20  ;;  %4002 = vmatmul.f32.gmra.mxu1 %v3892_v57  ;;  %v3893_v63 = vsub.f32 %v3829_v33, %v3892_v57  ;;  %v4343_v34 = vand.u32 4294901760, %v4342_v40  ;;  %v10176_v33 = vand.u32 4294901760, %v4231_v27 }
 0x5a0   : > { %4404 = vmatpush.msra.mxu0 %v10062_v4  ;;  %4470 = vmatpush.msra.mxu1 %v10059_v23  ;;  %v4359_v30 = vand.u32 4294901760, %v10172_v50 }
 0x5a1   : > { %4061 = vmatmul.f32.gmra.mxu2 %v3893_v63  ;;  %v3894_v52 = vand.u32 4294901760, %v3893_v63  ;;  %4344 = vmatpush.msrb.mxu3 %v4343_v34  ;;  %v10187_v39 = vsub.f32 %v4231_v27, %v10176_v33 }
 0x5a2   : > { %4407 = vmatpush.msra.mxu0 %v10065_v45  ;;  %4472 = vmatpush.msra.mxu1 %v10071_v53  ;;  %v4360_v14 = vsub.f32 %v10172_v50, %v4359_v30 }
 0x5a3   : > { %4106 = vmatmul.f32.gmra.mxu3 %v3894_v52  ;;  %v3895_v38 = vsub.f32 %v3893_v63, %v3894_v52  ;;  %v4229_v63 = vld [vmem:[#allocation11 + $0x110] sm:$0xff]  ;;  %4271 = vmatpush.msrb.mxu2 %v10176_v33  ;;  %v4365_v24 = vand.u32 4294901760, %v10187_v39 }
 0x5a4   : > { %4410 = vmatpush.msra.mxu0 %v10068_v56  ;;  %4474 = vmatpush.msra.mxu1 %v10101_v6  ;;  %v10197_v52 = vand.u32 4294901760, %v4229_v63 }
 0x5a5   : > { %v3896_v42 = vand.u32 4294901760, %v3895_v38  ;;  %4273 = vmatpush.msrb.mxu2 %v10183_v58  ;;  %v4361_v38 = vand.u32 4294901760, %v4360_v14  ;;  %v4366_v60 = vsub.f32 %v10187_v39, %v4365_v24 }
 0x5a6   : > { %4413 = vmatpush.msra.mxu0 %v10075_v51  ;;  %4476 = vmatpush.msra.mxu1 %v10137_v17  ;;  %v4376_v15 = vsub.f32 %v4229_v63, %v10197_v52 }
 0x5a7   : > { %3897 = vmatmul.f32.gmra.mxu0 %v3896_v42  ;;  %4216 = vmatmul.f32.vlgmr.msrb.gmra.mxu1 %v10047_v62  ;;  %v10204_v42 = vand.u32 4294901760, %v4228_v8  ;;  %v4367_v28 = vand.u32 4294901760, %v4366_v60 }
 0x5a8   : > { %4416 = vmatpush.msra.mxu0 %v10078_v26  ;;  %4478 = vmatpush.msra.mxu1 %v10142_v3  ;;  %v4377_v59 = vand.u32 4294901760, %v4376_v15 }
 0x5a9   : > { %4275 = vmatpush.msrb.mxu2 %v10197_v52  ;;  %v4382_v47 = vsub.f32 %v4228_v8, %v10204_v42 }
 0x5aa   : > { %4419 = vmatpush.msra.mxu0 %v10085_v0  ;;  %4480 = vmatpush.msra.mxu1 %v10150_v9  ;;  %v4378_v40 = vsub.f32 %v4376_v15, %v4377_v59 }
 0x5ab   : > { %4277 = vmatpush.msrb.mxu2 %v10204_v42  ;;  %v4383_v27 = vand.u32 4294901760, %v4382_v47 }
 0x5ac   : > { %4422 = vmatpush.msra.mxu0 %v10110_v22  ;;  %4482 = vmatpush.msra.mxu1 %v10162_v46 }
 0x5ad   : > { %v4384_v37 = vsub.f32 %v4382_v47, %v4383_v27 }
 0x5ae   : > { %4425 = vmatpush.msra.mxu0 %v10140_v11  ;;  %4484 = vmatpush.msra.mxu1 %v10176_v33 }
 0x5af   : > { %4175 = vmatmul.f32.vlgmr.msrb.gmra.mxu0 %v10047_v62  ;;  %4220 = vmatmul.f32.gmra.mxu1 %v3892_v57  ;;  %v10148_v62 = vsub.f32 %v4234_v1, %v10142_v3  ;;  %v10212_v1 = vand.u32 4294901760, %v4227_v35 }
 0x5b0   : > { %4486 = vmatpush.msra.mxu1 %v10183_v58 }
 0x5b1   : > { %v4347_v48 = vand.u32 4294901760, %v10148_v62  ;;  %4428 = vmatpush.msra.mxu0 %v10148_v62  ;;  %v4388_v34 = vsub.f32 %v4227_v35, %v10212_v1  ;;  %4279 = vmatpush.msrb.mxu2 %v10212_v1 }
 0x5b2   : > { %4488 = vmatpush.msra.mxu1 %v10197_v52 }
 0x5b3   : > { %v4348_v43 = vsub.f32 %v10148_v62, %v4347_v48  ;;  %4431 = vmatpush.msra.mxu0 %v10160_v19  ;;  %4509 = vmatpush.msra.mxu2 %v4299_v41 }
 0x5b4   : > { %4490 = vmatpush.msra.mxu1 %v10204_v42 }
 0x5b5   : > { %v4349_v20 = vand.u32 4294901760, %v4348_v43  ;;  %4434 = vmatpush.msra.mxu0 %v10172_v50  ;;  %v4379_v43 = vand.u32 4294901760, %v4378_v40  ;;  %4513 = vmatpush.msra.mxu2 %v4305_v44 }
 0x5b6   : > { %4492 = vmatpush.msra.mxu1 %v10212_v1 }
 0x5b7   : > { %4179 = vmatmul.f32.gmra.mxu0 %v3892_v57  ;;  %v4354_v57 = vsub.f32 %v10160_v19, %v4353_v31  ;;  %4350 = vmatpush.msrb.mxu3 %v4349_v20  ;;  %v4389_v20 = vand.u32 4294901760, %v4388_v34  ;;  %v4638_v19 = vld [vmem:[#allocation7 + $0x1e8] sm:$0xff] }
 0x5b8   : > { %4437 = vmatpush.msra.mxu0 %v10187_v39  ;;  %4517 = vmatpush.msra.mxu2 %v4311_v7 }
 0x5b9   : > { %v4355_v54 = vand.u32 4294901760, %v4354_v57  ;;  %v4385_v57 = vand.u32 4294901760, %v4384_v37  ;;  %v4390_v39 = vsub.f32 %v4388_v34, %v4389_v20 }
 0x5ba   : > { %4440 = vmatpush.msra.mxu0 %v10195_v18  ;;  %4521 = vmatpush.msra.mxu2 %v4317_v12 }
 0x5bb   : > { %4356 = vmatpush.msrb.mxu3 %v4355_v54  ;;  %v4391_v63 = vand.u32 4294901760, %v4390_v39 }
 0x5bc   : > { %4443 = vmatpush.msra.mxu0 %v4376_v15  ;;  %4525 = vmatpush.msra.mxu2 %v4323_v36 }
 0x5bd   : > { %4362 = vmatpush.msrb.mxu3 %v4361_v38 }
 0x5be   : > { %4446 = vmatpush.msra.mxu0 %v4382_v47  ;;  %4529 = vmatpush.msra.mxu2 %v4329_v10 }
 0x5bf   : > { %4368 = vmatpush.msrb.mxu3 %v4367_v28 }
 0x5c0   : > { %4449 = vmatpush.msra.mxu0 %v4388_v34  ;;  %4533 = vmatpush.msra.mxu2 %v4335_v25 }
 0x5c1   : > { %4374 = vmatpush.msrb.mxu3 %v4373_v49 }
 0x5c2   : > { %4537 = vmatpush.msra.mxu2 %v4341_v2 }
 0x5c3   : > { %4380 = vmatpush.msrb.mxu3 %v4379_v43 }
 0x5c4   : > { %4541 = vmatpush.msra.mxu2 %v4347_v48  ;;  %v4639_v48 = vld [vmem:[#allocation7 + $0x1f0] sm:$0xff] }
 0x5c5   : > { %4386 = vmatpush.msrb.mxu3 %v4385_v57  ;;  %v10267_v50 = vand.u32 4294901760, %v4639_v48 }
 0x5c6   : > { %4545 = vmatpush.msra.mxu2 %v4353_v31 }
 0x5c7   : > { %4392 = vmatpush.msrb.mxu3 %v4391_v63  ;;  %v4636_v63 = vld [vmem:[#allocation7 + $0x1d8] sm:$0xff] }
 0x5c8   : > { %4549 = vmatpush.msra.mxu2 %v4359_v30  ;;  %v4637_v30 = vld [vmem:[#allocation7 + $0x1e0] sm:$0xff] }
 0x5c9   : > { %4580 = vmatpush.msra.mxu3 %v10051_v13  ;;  %v10271_v14 = vand.u32 4294901760, %v4637_v30 }
 0x5ca   : > { %4553 = vmatpush.msra.mxu2 %v4365_v24 }
 0x5cb   : > { %4582 = vmatpush.msra.mxu3 %v10053_v5  ;;  %v7359_v5 = vld [vmem:[%s11608_s6 + $0x2] ss:$0 sm:$0xff] }
 0x5cc   : > { %4557 = vmatpush.msra.mxu2 %v4371_v61  ;;  %v10285_v61 = vsub.f32 %v4637_v30, %v10271_v14 }
 0x5cd   : > { %4584 = vmatpush.msra.mxu3 %v10055_v29 }
 0x5ce   : > { %4561 = vmatpush.msra.mxu2 %v4377_v59  ;;  %v4715_v59 = vand.u32 4294901760, %v10285_v61 }
 0x5cf   : > { %4586 = vmatpush.msra.mxu3 %v10057_v55 }
 0x5d0   : > { %4565 = vmatpush.msra.mxu2 %v4383_v27  ;;  %v4716_v34 = vsub.f32 %v10285_v61, %v4715_v59 }
 0x5d1   : > { %4588 = vmatpush.msra.mxu3 %v10059_v23 }
 0x5d2   : > { %4569 = vmatpush.msra.mxu2 %v4389_v20  ;;  %v4717_v57 = vand.u32 4294901760, %v4716_v34  ;;  %v4627_v34 = vld [vmem:[#allocation7 + $0x190] sm:$0xff] }
 0x5d3   : > { %4590 = vmatpush.msra.mxu3 %v10071_v53 }
 0x5d5   : > { %4592 = vmatpush.msra.mxu3 %v10101_v6 }
 0x5d7   : > { %4594 = vmatpush.msra.mxu3 %v10137_v17 }
 0x5d9   : > { %4596 = vmatpush.msra.mxu3 %v10142_v3 }
 0x5db   : > { %4598 = vmatpush.msra.mxu3 %v10150_v9  ;;  %v4640_v9 = vld [vmem:[#allocation7 + $0x1f8] sm:$0xff] }
 0x5dc   : > { %v10265_v31 = vand.u32 4294901760, %v4640_v9 }
 0x5dd   : > { %4600 = vmatpush.msra.mxu3 %v10162_v46 }
 0x5de   : > { %v10274_v18 = vsub.f32 %v4640_v9, %v10265_v31  ;;  %4647 = vmatpush.msrb.mxu0 %v10265_v31 }
 0x5df   : > { %4602 = vmatpush.msra.mxu3 %v10176_v33  ;;  %v10269_v33 = vand.u32 4294901760, %v4638_v19 }
 0x5e0   : > { %v4697_v15 = vand.u32 4294901760, %v10274_v18  ;;  %4649 = vmatpush.msrb.mxu0 %v10267_v50 }
 0x5e1   : > { %4604 = vmatpush.msra.mxu3 %v10183_v58  ;;  %v10280_v24 = vsub.f32 %v4638_v19, %v10269_v33 }
 0x5e2   : > { %v4698_v47 = vsub.f32 %v10274_v18, %v4697_v15  ;;  %4651 = vmatpush.msrb.mxu0 %v10269_v33 }
 0x5e3   : > { %4606 = vmatpush.msra.mxu3 %v10197_v52  ;;  %v10277_v52 = vsub.f32 %v4639_v48, %v10267_v50  ;;  %v4709_v60 = vand.u32 4294901760, %v10280_v24 }
 0x5e4   : > { %v4699_v40 = vand.u32 4294901760, %v4698_v47  ;;  %4653 = vmatpush.msrb.mxu0 %v10271_v14  ;;  %v4628_v47 = vld [vmem:[#allocation7 + $0x198] sm:$0xff] }
 0x5e5   : > { %4608 = vmatpush.msra.mxu3 %v10204_v42  ;;  %v4703_v42 = vand.u32 4294901760, %v10277_v52  ;;  %v4710_v28 = vsub.f32 %v10280_v24, %v4709_v60 }
 0x5e6   : > { %4700 = vmatpush.msrb.mxu1 %v4699_v40  ;;  %v10399_v40 = vand.u32 4294901760, %v4628_v47 }
 0x5e7   : > { %4610 = vmatpush.msra.mxu3 %v10212_v1  ;;  %v4704_v1 = vsub.f32 %v10277_v52, %v4703_v42  ;;  %v4711_v37 = vand.u32 4294901760, %v4710_v28 }
 0x5e9   : > { %v4705_v27 = vand.u32 4294901760, %v4704_v1 }
 0x5eb   : > { %4706 = vmatpush.msrb.mxu1 %v4705_v27 }
 0x5ed   : > { %4712 = vmatpush.msrb.mxu1 %v4711_v37 }
 0x5ef   : > { %4718 = vmatpush.msrb.mxu1 %v4717_v57  ;;  %v10409_v57 = vsub.f32 %v4628_v47, %v10399_v40 }
 0x614   : > { %v3999_v13 = vpop.f32.mrf.mxu1 }
 0x61c   : > { %v3890_v29 = vpop.f32.mrf.mxu0  ;;  %v4003_v23 = vpop.f32.mrf.mxu1 }
 0x61d   : > { %v3891_v55 = vadd.f32 %v7359_v5, %v3890_v29  ;;  %v4057_v45 = vpop.f32.mrf.mxu2 }
 0x61e   : > { %v4101_v26 = vpop.f32.mrf.mxu3 }
 0x61f   : > { %v4000_v4 = vadd.f32 %v3999_v13, %v3891_v55  ;;  %v10315_v13 = vand.u32 4294901760, %v4636_v63 }
 0x621   : > { %v4058_v53 = vadd.f32 %v4057_v45, %v4000_v4  ;;  %v10318_v29 = vsub.f32 %v4636_v63, %v10315_v13  ;;  %4655 = vmatpush.msrb.mxu0 %v10315_v13  ;;  %v4626_v63 = vld [vmem:[#allocation7 + $0x188] sm:$0xff] }
 0x623   : > { %v4102_v41 = vadd.f32 %v4101_v26, %v4058_v53  ;;  %v4721_v4 = vand.u32 4294901760, %v10318_v29  ;;  %v4633_v53 = vld [vmem:[#allocation7 + $0x1c0] sm:$0xff] }
 0x624   : > { %v3898_v56 = vpop.f32.mrf.mxu0  ;;  %v4217_v7 = vpop.f32.mrf.mxu1 }
 0x625   : > { %v3899_v51 = vadd.f32 %v7359_v5, %v3898_v56  ;;  %v4062_v36 = vpop.f32.mrf.mxu2  ;;  %v4635_v5 = vld [vmem:[#allocation7 + $0x1d0] sm:$0xff] }
 0x626   : > { %v4107_v25 = vpop.f32.mrf.mxu3  ;;  %v10320_v55 = vand.u32 4294901760, %v4635_v5 }
 0x627   : > { %v4004_v44 = vadd.f32 %v4003_v23, %v3899_v51  ;;  %v4634_v23 = vld [vmem:[#allocation7 + $0x1c8] sm:$0xff]  ;;  %v4722_v51 = vsub.f32 %v10318_v29, %v4721_v4 }
 0x628   : > { %v10326_v45 = vsub.f32 %v4635_v5, %v10320_v55  ;;  %v10328_v56 = vand.u32 4294901760, %v4634_v23  ;;  %4657 = vmatpush.msrb.mxu0 %v10320_v55 }
 0x629   : > { %v4063_v6 = vadd.f32 %v4062_v36, %v4004_v44  ;;  %v10340_v44 = vand.u32 4294901760, %v4633_v53 }
 0x62a   : > { %v4727_v26 = vand.u32 4294901760, %v10326_v45  ;;  %4659 = vmatpush.msrb.mxu0 %v10328_v56 }
 0x62b   : > { %v4108_v17 = vadd.f32 %v4107_v25, %v4063_v6  ;;  %v10350_v6 = vsub.f32 %v4633_v53, %v10340_v44  ;;  %v4769_v53 = vand.u32 4294901760, %v10409_v57 }
 0x62c   : > { %v4176_v0 = vpop.f32.mrf.mxu0  ;;  %v4221_v46 = vpop.f32.mrf.mxu1  ;;  %4661 = vmatpush.msrb.mxu0 %v10340_v44 }
 0x62d   : > { %v4177_v12 = vadd.f32 %v4176_v0, %v4102_v41  ;;  %v10338_v41 = vsub.f32 %v4634_v23, %v10328_v56  ;;  %v4723_v0 = vand.u32 4294901760, %v4722_v51  ;;  %v10419_v51 = vand.u32 4294901760, %v4626_v63 }
 0x62f   : > { %v4218_v10 = vadd.f32 %v4217_v7, %v4177_v12  ;;  %v4632_v7 = vld [vmem:[#allocation7 + $0x1b8] sm:$0xff]  ;;  %v4728_v12 = vsub.f32 %v10326_v45, %v4727_v26  ;;  %v4733_v36 = vand.u32 4294901760, %v10338_v41  ;;  %4724 = vmatpush.msrb.mxu1 %v4723_v0  ;;  %v4625_v0 = vld [vmem:[#allocation7 + $0x180] sm:$0xff] }
 0x631   : > { %v4224_v22 = vmax.f32 %v4218_v10, 0.0  ;;  %v10354_v10 = vand.u32 4294901760, %v4632_v7  ;;  %v4729_v25 = vand.u32 4294901760, %v4728_v12 }
 0x633   : > { %v10261_v11 = vand.u32 4294901760, %v4224_v22  ;;  %4663 = vmatpush.msrb.mxu0 %v10354_v10  ;;  %4730 = vmatpush.msrb.mxu1 %v4729_v25  ;;  %v4780_v25 = vsub.f32 %v4626_v63, %v10419_v51 }
 0x634   : > { %v4180_v3 = vpop.f32.mrf.mxu0 }
 0x635   : > { %v4281_v2 = vsub.f32 %v4224_v22, %v10261_v11  ;;  %v4181_v62 = vadd.f32 %v4180_v3, %v4108_v17  ;;  %4394 = vmatmul.f32.vlgmr.msrb.gmra.mxu3 %v10261_v11  ;;  %v4631_v22 = vld [vmem:[#allocation7 + $0x1b0] sm:$0xff]  ;;  %v4734_v17 = vsub.f32 %v10338_v41, %v4733_v36 }
 0x636   : > { %4860 = vmatpush.msrb.mxu3 %v10265_v31  ;;  %v10361_v3 = vand.u32 4294901760, %v4631_v22 }
 0x637   : > { %v4282_v58 = vand.u32 4294901760, %v4281_v2  ;;  %v4222_v54 = vadd.f32 %v4221_v46, %v4181_v62  ;;  %4452 = vmatmul.f32.vlgmr.msra.gmra.mxu0 %v4281_v2  ;;  %v4630_v62 = vld [vmem:[#allocation7 + $0x1a8] sm:$0xff]  ;;  %v4735_v9 = vand.u32 4294901760, %v4734_v17  ;;  %v10427_v17 = vand.u32 4294901760, %v4625_v0 }
 0x638   : > { %4862 = vmatpush.msrb.mxu3 %v10267_v50  ;;  %v10373_v19 = vsub.f32 %v4631_v22, %v10361_v3  ;;  %v10375_v46 = vand.u32 4294901760, %v4630_v62  ;;  %4665 = vmatpush.msrb.mxu0 %v10361_v3  ;;  %v4770_v22 = vsub.f32 %v10409_v57, %v4769_v53 }
 0x639   : > { %v4283_v8 = vsub.f32 %v4281_v2, %v4282_v58  ;;  %v4225_v38 = vmax.f32 %v4222_v54, 0.0  ;;  %4496 = vmatmul.f32.vlgmr.msra.gmra.mxu1 %v4282_v58  ;;  %v10365_v2 = vsub.f32 %v4632_v7, %v10354_v10  ;;  %v4629_v58 = vld [vmem:[#allocation7 + $0x1a0] sm:$0xff] }
 0x63a   : > { %4864 = vmatpush.msrb.mxu3 %v10269_v33  ;;  %4736 = vmatpush.msrb.mxu1 %v4735_v9  ;;  %v4771_v9 = vand.u32 4294901760, %v4770_v22 }
 0x63b   : > { %v4284_v35 = vand.u32 4294901760, %v4283_v8  ;;  %v4288_v32 = vand.u32 4294901760, %v4225_v38  ;;  %v4745_v30 = vand.u32 4294901760, %v10365_v2  ;;  %v4751_v8 = vand.u32 4294901760, %v10373_v19  ;;  %4667 = vmatpush.msrb.mxu0 %v10375_v46 }
 0x63c   : > { %4866 = vmatpush.msrb.mxu3 %v10271_v14 }
 0x63d   : > { %4285 = vmatmul.f32.vlgmr.msrb.gmra.mxu2 %v4284_v35  ;;  %4398 = vmatmul.f32.gmra.mxu3 %v4288_v32  ;;  %v4289_v49 = vsub.f32 %v4225_v38, %v4288_v32  ;;  %v10382_v38 = vsub.f32 %v4630_v62, %v10375_v46  ;;  %v10384_v35 = vand.u32 4294901760, %v4629_v58  ;;  %v4752_v1 = vsub.f32 %v10373_v19, %v4751_v8 }
 0x63e   : > { %4802 = vmatpush.msrb.mxu2 %v10274_v18  ;;  %4868 = vmatpush.msrb.mxu3 %v10315_v13 }
 0x63f   : > { %4457 = vmatmul.f32.gmra.mxu0 %v4289_v49  ;;  %v4290_v43 = vand.u32 4294901760, %v4289_v49  ;;  %v4757_v28 = vand.u32 4294901760, %v10382_v38 }
 0x640   : > { %4805 = vmatpush.msrb.mxu2 %v10277_v52  ;;  %4870 = vmatpush.msrb.mxu3 %v10320_v55 }
 0x641   : > { %4502 = vmatmul.f32.gmra.mxu1 %v4290_v43  ;;  %v4291_v20 = vsub.f32 %v4289_v49, %v4290_v43  ;;  %v10397_v49 = vsub.f32 %v4629_v58, %v10384_v35  ;;  %4669 = vmatpush.msrb.mxu0 %v10384_v35  ;;  %v4753_v43 = vand.u32 4294901760, %v4752_v1  ;;  %v4758_v37 = vsub.f32 %v10382_v38, %v4757_v28 }
 0x642   : > { %4808 = vmatpush.msrb.mxu2 %v10280_v24  ;;  %4872 = vmatpush.msrb.mxu3 %v10328_v56  ;;  %v4786_v58 = vsub.f32 %v4625_v0, %v10427_v17 }
 0x643   : > { %v4292_v39 = vand.u32 4294901760, %v4291_v20  ;;  %v4763_v20 = vand.u32 4294901760, %v10397_v49  ;;  %4671 = vmatpush.msrb.mxu0 %v10399_v40  ;;  %v4759_v5 = vand.u32 4294901760, %v4758_v37  ;;  %v5031_v37 = vld [vmem:[#allocation10 + $0x1d0] sm:$0xff] }
 0x644   : > { %4811 = vmatpush.msrb.mxu2 %v10285_v61  ;;  %4874 = vmatpush.msrb.mxu3 %v10340_v44  ;;  %v4787_v47 = vand.u32 4294901760, %v4786_v58 }
 0x645   : > { %4293 = vmatmul.f32.gmra.mxu2 %v4292_v39  ;;  %4612 = vmatmul.f32.vlgmr.msra.gmra.mxu3 %v10261_v11  ;;  %v10412_v39 = vand.u32 4294901760, %v4627_v34  ;;  %v4764_v23 = vsub.f32 %v10397_v49, %v4763_v20 }
 0x646   : > { %4814 = vmatpush.msrb.mxu2 %v10318_v29  ;;  %4876 = vmatpush.msrb.mxu3 %v10354_v10 }
 0x647   : > { %v4774_v7 = vsub.f32 %v4627_v34, %v10412_v39  ;;  %4673 = vmatpush.msrb.mxu0 %v10412_v39  ;;  %v4765_v12 = vand.u32 4294901760, %v4764_v23  ;;  %v4788_v34 = vsub.f32 %v4786_v58, %v4787_v47 }
 0x648   : > { %4817 = vmatpush.msrb.mxu2 %v10326_v45  ;;  %4878 = vmatpush.msrb.mxu3 %v10361_v3 }
 0x649   : > { %v4775_v62 = vand.u32 4294901760, %v4774_v7  ;;  %4675 = vmatpush.msrb.mxu0 %v10419_v51 }
 0x64a   : > { %4820 = vmatpush.msrb.mxu2 %v10338_v41  ;;  %4880 = vmatpush.msrb.mxu3 %v10375_v46 }
 0x64b   : > { %4677 = vmatpush.msrb.mxu0 %v10427_v17 }
 0x64c   : > { %4823 = vmatpush.msrb.mxu2 %v10350_v6  ;;  %4882 = vmatpush.msrb.mxu3 %v10384_v35 }
 0x64d   : > { %4571 = vmatmul.f32.vlgmr.msra.gmra.mxu2 %v10261_v11  ;;  %4616 = vmatmul.f32.gmra.mxu3 %v4288_v32  ;;  %v4739_v11 = vand.u32 4294901760, %v10350_v6 }
 0x64e   : > { %4826 = vmatpush.msrb.mxu2 %v10365_v2  ;;  %4884 = vmatpush.msrb.mxu3 %v10399_v40 }
 0x64f   : > { %v4740_v48 = vsub.f32 %v10350_v6, %v4739_v11  ;;  %4907 = vmatpush.msra.mxu0 %v4697_v15 }
 0x650   : > { %4829 = vmatpush.msrb.mxu2 %v10373_v19  ;;  %4886 = vmatpush.msrb.mxu3 %v10412_v39 }
 0x651   : > { %v4741_v54 = vand.u32 4294901760, %v4740_v48  ;;  %v4781_v48 = vand.u32 4294901760, %v4780_v25  ;;  %4911 = vmatpush.msra.mxu0 %v4703_v42 }
 0x652   : > { %4832 = vmatpush.msrb.mxu2 %v10382_v38  ;;  %4888 = vmatpush.msrb.mxu3 %v10419_v51  ;;  %v5034_v38 = vld [vmem:[#allocation10 + $0x1e8] sm:$0xff] }
 0x653   : > { %4742 = vmatpush.msrb.mxu1 %v4741_v54  ;;  %v4776_v54 = vsub.f32 %v4774_v7, %v4775_v62  ;;  %4915 = vmatpush.msra.mxu0 %v4709_v60 }
 0x654   : > { %4835 = vmatpush.msrb.mxu2 %v10397_v49  ;;  %4890 = vmatpush.msrb.mxu3 %v10427_v17  ;;  %v5033_v49 = vld [vmem:[#allocation10 + $0x1e0] sm:$0xff] }
 0x655   : > { %4575 = vmatmul.f32.gmra.mxu2 %v4288_v32  ;;  %v4746_v32 = vsub.f32 %v10365_v2, %v4745_v30  ;;  %v4777_v1 = vand.u32 4294901760, %v4776_v54  ;;  %4919 = vmatpush.msra.mxu0 %v4715_v59 }
 0x656   : > { %4838 = vmatpush.msrb.mxu2 %v10409_v57 }
 0x657   : > { %v4747_v27 = vand.u32 4294901760, %v4746_v32  ;;  %v4782_v32 = vsub.f32 %v4780_v25, %v4781_v48  ;;  %4923 = vmatpush.msra.mxu0 %v4721_v4 }
 0x658   : > { %4841 = vmatpush.msrb.mxu2 %v4774_v7 }
 0x659   : > { %4748 = vmatpush.msrb.mxu1 %v4747_v27  ;;  %v4783_v27 = vand.u32 4294901760, %v4782_v32  ;;  %4927 = vmatpush.msra.mxu0 %v4727_v26 }
 0x65a   : > { %4844 = vmatpush.msrb.mxu2 %v4780_v25 }
 0x65b   : > { %4754 = vmatpush.msrb.mxu1 %v4753_v43  ;;  %v4789_v43 = vand.u32 4294901760, %v4788_v34  ;;  %4931 = vmatpush.msra.mxu0 %v4733_v36 }
 0x65c   : > { %4847 = vmatpush.msrb.mxu2 %v4786_v58 }
 0x65d   : > { %4760 = vmatpush.msrb.mxu1 %v4759_v5  ;;  %4935 = vmatpush.msra.mxu0 %v4739_v11 }
 0x65f   : > { %4766 = vmatpush.msrb.mxu1 %v4765_v12  ;;  %4939 = vmatpush.msra.mxu0 %v4745_v30  ;;  %v5036_v30 = vld [vmem:[#allocation10 + $0x1f8] sm:$0xff] }
 0x661   : > { %4772 = vmatpush.msrb.mxu1 %v4771_v9  ;;  %4943 = vmatpush.msra.mxu0 %v4751_v8  ;;  %v5035_v8 = vld [vmem:[#allocation10 + $0x1f0] sm:$0xff]  ;;  %v5030_v9 = vld [vmem:[#allocation10 + $0x1c8] sm:$0xff] }
 0x663   : > { %4778 = vmatpush.msrb.mxu1 %v4777_v1  ;;  %4947 = vmatpush.msra.mxu0 %v4757_v28  ;;  %v10489_v28 = vand.u32 4294901760, %v5034_v38 }
 0x665   : > { %4784 = vmatpush.msrb.mxu1 %v4783_v27  ;;  %4951 = vmatpush.msra.mxu0 %v4763_v20 }
 0x667   : > { %4790 = vmatpush.msrb.mxu1 %v4789_v43  ;;  %4955 = vmatpush.msra.mxu0 %v4769_v53  ;;  %v10503_v53 = vsub.f32 %v5034_v38, %v10489_v28  ;;  %v10540_v43 = vand.u32 4294901760, %v5030_v9 }
 0x669   : > { %4978 = vmatpush.msra.mxu1 %v10265_v31  ;;  %4959 = vmatpush.msra.mxu0 %v4775_v62 }
 0x66b   : > { %4980 = vmatpush.msra.mxu1 %v10267_v50  ;;  %v7360_v50 = vld [vmem:[#allocation13 + $0x2] ss:$0 sm:$0xff]  ;;  %4963 = vmatpush.msra.mxu0 %v4781_v48 }
 0x66d   : > { %4982 = vmatpush.msra.mxu1 %v10269_v33  ;;  %4967 = vmatpush.msra.mxu0 %v4787_v47 }
 0x66f   : > { %4984 = vmatpush.msra.mxu1 %v10271_v14 }
 0x671   : > { %4986 = vmatpush.msra.mxu1 %v10315_v13 }
 0x673   : > { %4988 = vmatpush.msra.mxu1 %v10320_v55 }
 0x675   : > { %4990 = vmatpush.msra.mxu1 %v10328_v56 }
 0x677   : > { %4992 = vmatpush.msra.mxu1 %v10340_v44 }
 0x679   : > { %4994 = vmatpush.msra.mxu1 %v10354_v10 }
 0x67b   : > { %4996 = vmatpush.msra.mxu1 %v10361_v3 }
 0x67d   : > { %4998 = vmatpush.msra.mxu1 %v10375_v46 }
 0x67f   : > { %5000 = vmatpush.msra.mxu1 %v10384_v35  ;;  %v10487_v35 = vand.u32 4294901760, %v5035_v8 }
 0x681   : > { %5002 = vmatpush.msra.mxu1 %v10399_v40  ;;  %v5032_v40 = vld [vmem:[#allocation10 + $0x1d8] sm:$0xff]  ;;  %v10500_v23 = vsub.f32 %v5035_v8, %v10487_v35 }
 0x682   : > { %v10494_v63 = vand.u32 4294901760, %v5032_v40 }
 0x683   : > { %5004 = vmatpush.msra.mxu1 %v10412_v39  ;;  %v10492_v39 = vand.u32 4294901760, %v5033_v49  ;;  %v5099_v25 = vand.u32 4294901760, %v10500_v23 }
 0x684   : > { %v10515_v12 = vsub.f32 %v5032_v40, %v10494_v63 }
 0x685   : > { %5006 = vmatpush.msra.mxu1 %v10419_v51  ;;  %v10506_v51 = vand.u32 4294901760, %v5031_v37  ;;  %v10512_v0 = vsub.f32 %v5033_v49, %v10492_v39  ;;  %v5100_v47 = vsub.f32 %v10500_v23, %v5099_v25  ;;  %v5025_v49 = vld [vmem:[#allocation10 + $0x1a0] sm:$0xff] }
 0x686   : > { %v5117_v27 = vand.u32 4294901760, %v10515_v12 }
 0x687   : > { %5008 = vmatpush.msra.mxu1 %v10427_v17  ;;  %v5105_v17 = vand.u32 4294901760, %v10503_v53  ;;  %v10522_v62 = vsub.f32 %v5031_v37, %v10506_v51  ;;  %v5111_v54 = vand.u32 4294901760, %v10512_v0 }
 0x689   : > { %v5106_v1 = vsub.f32 %v10503_v53, %v5105_v17 }
 0x6b4   : > { %v4453_v24 = vpop.f32.mrf.mxu0 }
 0x6b6   : > { %v4497_v60 = vpop.f32.mrf.mxu1 }
 0x6b8   : > { %v4395_v31 = vpop.f32.mrf.mxu3 }
 0x6bc   : > { %v4458_v45 = vpop.f32.mrf.mxu0 }
 0x6be   : > { %v4503_v44 = vpop.f32.mrf.mxu1 }
 0x6c0   : > { %v4286_v33 = vpop.f32.mrf.mxu2  ;;  %v4399_v18 = vpop.f32.mrf.mxu3 }
 0x6c1   : > { %v4287_v14 = vadd.f32 %v7360_v50, %v4286_v33  ;;  %v5112_v33 = vsub.f32 %v10512_v0, %v5111_v54 }
 0x6c3   : > { %v4396_v52 = vadd.f32 %v4395_v31, %v4287_v14  ;;  %v5123_v14 = vand.u32 4294901760, %v10522_v62 }
 0x6c5   : > { %v4454_v42 = vadd.f32 %v4453_v24, %v4396_v52  ;;  %v10549_v52 = vsub.f32 %v5030_v9, %v10540_v43  ;;  %v5107_v24 = vand.u32 4294901760, %v5106_v1  ;;  %v5024_v9 = vld [vmem:[#allocation10 + $0x198] sm:$0xff] }
 0x6c7   : > { %v4498_v13 = vadd.f32 %v4497_v60, %v4454_v42  ;;  %v5129_v42 = vand.u32 4294901760, %v10549_v52  ;;  %v5113_v60 = vand.u32 4294901760, %v5112_v33 }
 0x6c8   : > { %v4294_v61 = vpop.f32.mrf.mxu2  ;;  %v4613_v29 = vpop.f32.mrf.mxu3 }
 0x6c9   : > { %v4295_v15 = vadd.f32 %v7360_v50, %v4294_v61  ;;  %v5101_v50 = vand.u32 4294901760, %v5100_v47  ;;  %v5118_v61 = vsub.f32 %v10515_v12, %v5117_v27  ;;  %v10622_v47 = vand.u32 4294901760, %v5024_v9 }
 0x6cb   : > { %v4400_v59 = vadd.f32 %v4399_v18, %v4295_v15  ;;  %v10634_v33 = vsub.f32 %v5024_v9, %v10622_v47 }
 0x6cd   : > { %v4459_v26 = vadd.f32 %v4458_v45, %v4400_v59  ;;  %v5124_v59 = vsub.f32 %v10522_v62, %v5123_v14 }
 0x6cf   : > { %v4504_v6 = vadd.f32 %v4503_v44, %v4459_v26 }
 0x6d0   : > { %v4572_v55 = vpop.f32.mrf.mxu2  ;;  %v4617_v2 = vpop.f32.mrf.mxu3 }
 0x6d1   : > { %v4573_v4 = vadd.f32 %v4572_v55, %v4498_v13  ;;  %v5130_v55 = vsub.f32 %v10549_v52, %v5129_v42 }
 0x6d3   : > { %v4614_v56 = vadd.f32 %v4613_v29, %v4573_v4  ;;  %v5119_v29 = vand.u32 4294901760, %v5118_v61  ;;  %v5125_v4 = vand.u32 4294901760, %v5124_v59  ;;  %v5131_v45 = vand.u32 4294901760, %v5130_v55  ;;  %v5022_v61 = vld [vmem:[#allocation10 + $0x188] sm:$0xff]  ;;  %v5021_v55 = vld [vmem:[#allocation10 + $0x180] sm:$0xff] }
 0x6d5   : > { %v4620_v41 = vadd.f32 %v4614_v56, %v9823_v21  ;;  %v10485_v21 = vand.u32 4294901760, %v5036_v30  ;;  %v5029_v56 = vld [vmem:[#allocation10 + $0x1c0] sm:$0xff] }
 0x6d6   : > { %v10576_v26 = vand.u32 4294901760, %v5029_v56 }
 0x6d7   : > { %v10477_v36 = vmax.f32 %v4620_v41, 0.0  ;;  %v10497_v5 = vsub.f32 %v5036_v30, %v10485_v21  ;;  %5043 = vmatpush.msra.mxu2 %v10485_v21  ;;  %v5028_v41 = vld [vmem:[#allocation10 + $0x1b8] sm:$0xff] }
 0x6d8   : > { %v4576_v10 = vpop.f32.mrf.mxu2  ;;  %v10579_v44 = vsub.f32 %v5029_v56, %v10576_v26 }
 0x6d9   : > { %v10480_v11 = vand.u32 4294901760, %v10477_v36  ;;  %v4577_v3 = vadd.f32 %v4576_v10, %v4504_v6  ;;  %v5093_v22 = vand.u32 4294901760, %v10497_v5  ;;  %5045 = vmatpush.msra.mxu2 %v10487_v35  ;;  %v10581_v6 = vand.u32 4294901760, %v5028_v41  ;;  %v5027_v10 = vld [vmem:[#allocation10 + $0x1b0] sm:$0xff] }
 0x6db   : > { %v4679_v19 = vsub.f32 %v10477_v36, %v10480_v11  ;;  %v4618_v46 = vadd.f32 %v4617_v2, %v4577_v3  ;;  %4792 = vmatmul.f32.vlgmr.msrb.gmra.mxu1 %v10480_v11  ;;  %v5094_v32 = vsub.f32 %v10497_v5, %v5093_v22  ;;  %5047 = vmatpush.msra.mxu2 %v10489_v28  ;;  %v5135_v3 = vand.u32 4294901760, %v10579_v44 }
 0x6dc   : > { %5256 = vmatpush.msrb.mxu1 %v10485_v21  ;;  %v10589_v2 = vand.u32 4294901760, %v5027_v10 }
 0x6dd   : > { %v4621_v20 = vadd.f32 %v4618_v46, %v9853_v16  ;;  %4850 = vmatmul.f32.vlgmr.msrb.gmra.mxu2 %v4679_v19  ;;  %v4680_v57 = vand.u32 4294901760, %v4679_v19  ;;  %v5095_v31 = vand.u32 4294901760, %v5094_v32  ;;  %v5136_v46 = vsub.f32 %v10579_v44, %v5135_v3 }
 0x6de   : > { %5258 = vmatpush.msrb.mxu1 %v10487_v35  ;;  %5049 = vmatpush.msra.mxu2 %v10492_v39  ;;  %v10599_v8 = vsub.f32 %v5027_v10, %v10589_v2 }
 0x6df   : > { %v10509_v16 = vmax.f32 %v4621_v20, 0.0  ;;  %4894 = vmatmul.f32.vlgmr.msrb.gmra.mxu3 %v4680_v57  ;;  %v4681_v7 = vsub.f32 %v4679_v19, %v4680_v57  ;;  %v5026_v19 = vld [vmem:[#allocation10 + $0x1a8] sm:$0xff]  ;;  %v5137_v40 = vand.u32 4294901760, %v5136_v46 }
 0x6e0   : > { %5260 = vmatpush.msrb.mxu1 %v10489_v28  ;;  %5096 = vmatpush.msra.mxu3 %v5095_v31  ;;  %v10601_v38 = vand.u32 4294901760, %v5026_v19  ;;  %v5147_v20 = vand.u32 4294901760, %v10599_v8 }
 0x6e1   : > { %v4682_v48 = vand.u32 4294901760, %v4681_v7  ;;  %v4686_v58 = vand.u32 4294901760, %v10509_v16  ;;  %5051 = vmatpush.msra.mxu2 %v10494_v63  ;;  %v10615_v7 = vand.u32 4294901760, %v5025_v49 }
 0x6e2   : > { %5262 = vmatpush.msrb.mxu1 %v10492_v39  ;;  %5102 = vmatpush.msra.mxu3 %v5101_v50  ;;  %v10611_v57 = vsub.f32 %v5026_v19, %v10601_v38 }
 0x6e3   : > { %4683 = vmatmul.f32.vlgmr.msrb.gmra.mxu0 %v4682_v48  ;;  %4796 = vmatmul.f32.gmra.mxu1 %v4686_v58  ;;  %v4687_v34 = vsub.f32 %v10509_v16, %v4686_v58  ;;  %v10626_v1 = vsub.f32 %v5025_v49, %v10615_v7 }
 0x6e4   : > { %5198 = vmatpush.msrb.mxu0 %v10497_v5  ;;  %5053 = vmatpush.msra.mxu2 %v10506_v51  ;;  %v5153_v32 = vand.u32 4294901760, %v10611_v57 }
 0x6e5   : > { %4855 = vmatmul.f32.gmra.mxu2 %v4687_v34  ;;  %v4688_v18 = vand.u32 4294901760, %v4687_v34  ;;  %5264 = vmatpush.msrb.mxu1 %v10494_v63 }
 0x6e6   : > { %5201 = vmatpush.msrb.mxu0 %v10500_v23  ;;  %5108 = vmatpush.msra.mxu3 %v5107_v24  ;;  %v5154_v50 = vsub.f32 %v10611_v57, %v5153_v32  ;;  %v5159_v24 = vand.u32 4294901760, %v10626_v1 }
 0x6e7   : > { %4900 = vmatmul.f32.gmra.mxu3 %v4688_v18  ;;  %v4689_v15 = vsub.f32 %v4687_v34, %v4688_v18  ;;  %5055 = vmatpush.msra.mxu2 %v10540_v43  ;;  %v5023_v34 = vld [vmem:[#allocation10 + $0x190] sm:$0xff] }
 0x6e8   : > { %5204 = vmatpush.msrb.mxu0 %v10503_v53  ;;  %5114 = vmatpush.msra.mxu3 %v5113_v60  ;;  %v10636_v18 = vand.u32 4294901760, %v5023_v34  ;;  %v5165_v60 = vand.u32 4294901760, %v10634_v33 }
 0x6e9   : > { %v4690_v13 = vand.u32 4294901760, %v4689_v15  ;;  %5266 = vmatpush.msrb.mxu1 %v10506_v51  ;;  %5057 = vmatpush.msra.mxu2 %v10576_v26  ;;  %v5155_v15 = vand.u32 4294901760, %v5154_v50 }
 0x6ea   : > { %5207 = vmatpush.msrb.mxu0 %v10512_v0  ;;  %5120 = vmatpush.msra.mxu3 %v5119_v29  ;;  %v5170_v59 = vsub.f32 %v5023_v34, %v10636_v18  ;;  %v5160_v29 = vsub.f32 %v10626_v1, %v5159_v24 }
 0x6eb   : > { %4691 = vmatmul.f32.gmra.mxu0 %v4690_v13  ;;  %5010 = vmatmul.f32.vlgmr.msra.gmra.mxu1 %v10480_v11  ;;  %v10643_v13 = vand.u32 4294901760, %v5022_v61 }
 0x6ec   : > { %5210 = vmatpush.msrb.mxu0 %v10515_v12  ;;  %5268 = vmatpush.msrb.mxu1 %v10540_v43  ;;  %v5161_v10 = vand.u32 4294901760, %v5160_v29 }
 0x6ed   : > { %5126 = vmatpush.msra.mxu3 %v5125_v4  ;;  %5059 = vmatpush.msra.mxu2 %v10581_v6  ;;  %v5166_v4 = vsub.f32 %v10634_v33, %v5165_v60  ;;  %v5176_v56 = vsub.f32 %v5022_v61, %v10643_v13 }
 0x6ee   : > { %5213 = vmatpush.msrb.mxu0 %v10522_v62  ;;  %5270 = vmatpush.msrb.mxu1 %v10576_v26 }
 0x6ef   : > { %5132 = vmatpush.msra.mxu3 %v5131_v45  ;;  %5061 = vmatpush.msra.mxu2 %v10589_v2  ;;  %v5171_v45 = vand.u32 4294901760, %v5170_v59  ;;  %v5167_v19 = vand.u32 4294901760, %v5166_v4  ;;  %v5177_v49 = vand.u32 4294901760, %v5176_v56 }
 0x6f0   : > { %5216 = vmatpush.msrb.mxu0 %v10549_v52  ;;  %5272 = vmatpush.msrb.mxu1 %v10581_v6 }
 0x6f1   : > { %5063 = vmatpush.msra.mxu2 %v10601_v38  ;;  %5138 = vmatpush.msra.mxu3 %v5137_v40  ;;  %v5172_v46 = vsub.f32 %v5170_v59, %v5171_v45  ;;  %v5178_v9 = vsub.f32 %v5176_v56, %v5177_v49 }
 0x6f2   : > { %5219 = vmatpush.msrb.mxu0 %v10579_v44  ;;  %5274 = vmatpush.msrb.mxu1 %v10589_v2 }
 0x6f3   : > { %4969 = vmatmul.f32.vlgmr.msra.gmra.mxu0 %v10480_v11  ;;  %5014 = vmatmul.f32.gmra.mxu1 %v4686_v58  ;;  %v10587_v11 = vsub.f32 %v5028_v41, %v10581_v6  ;;  %v10651_v41 = vand.u32 4294901760, %v5021_v55 }
 0x6f4   : > { %5276 = vmatpush.msrb.mxu1 %v10601_v38  ;;  %5065 = vmatpush.msra.mxu2 %v10615_v7 }
 0x6f5   : > { %v5141_v30 = vand.u32 4294901760, %v10587_v11  ;;  %5222 = vmatpush.msrb.mxu0 %v10587_v11  ;;  %v5182_v40 = vsub.f32 %v5021_v55, %v10651_v41 }
 0x6f6   : > { %5278 = vmatpush.msrb.mxu1 %v10615_v7  ;;  %5067 = vmatpush.msra.mxu2 %v10622_v47 }
 0x6f7   : > { %v5142_v37 = vsub.f32 %v10587_v11, %v5141_v30  ;;  %5225 = vmatpush.msrb.mxu0 %v10599_v8 }
 0x6f8   : > { %5280 = vmatpush.msrb.mxu1 %v10622_v47  ;;  %5069 = vmatpush.msra.mxu2 %v10636_v18 }
 0x6f9   : > { %v5143_v48 = vand.u32 4294901760, %v5142_v37  ;;  %5228 = vmatpush.msrb.mxu0 %v10611_v57  ;;  %v5173_v37 = vand.u32 4294901760, %v5172_v46 }
 0x6fa   : > { %5282 = vmatpush.msrb.mxu1 %v10636_v18  ;;  %5071 = vmatpush.msra.mxu2 %v10643_v13 }
 0x6fb   : > { %4973 = vmatmul.f32.gmra.mxu0 %v4686_v58  ;;  %v5148_v58 = vsub.f32 %v10599_v8, %v5147_v20  ;;  %5144 = vmatpush.msra.mxu3 %v5143_v48  ;;  %v5183_v48 = vand.u32 4294901760, %v5182_v40  ;;  %v5430_v8 = vld [vmem:[#allocation11 + $0x1e8] sm:$0xff] }
 0x6fc   : > { %5231 = vmatpush.msrb.mxu0 %v10626_v1  ;;  %5284 = vmatpush.msrb.mxu1 %v10643_v13 }
 0x6fd   : > { %v5149_v31 = vand.u32 4294901760, %v5148_v58  ;;  %5073 = vmatpush.msra.mxu2 %v10651_v41  ;;  %v5179_v58 = vand.u32 4294901760, %v5178_v9  ;;  %v5184_v1 = vsub.f32 %v5182_v40, %v5183_v48 }
 0x6fe   : > { %5234 = vmatpush.msrb.mxu0 %v10634_v33  ;;  %5286 = vmatpush.msrb.mxu1 %v10651_v41 }
 0x6ff   : > { %5150 = vmatpush.msra.mxu3 %v5149_v31  ;;  %5303 = vmatpush.msrb.mxu2 %v5093_v22  ;;  %v5185_v34 = vand.u32 4294901760, %v5184_v1 }
 0x700   : > { %5237 = vmatpush.msrb.mxu0 %v5170_v59 }
 0x701   : > { %5156 = vmatpush.msra.mxu3 %v5155_v15  ;;  %5307 = vmatpush.msrb.mxu2 %v5099_v25 }
 0x702   : > { %5240 = vmatpush.msrb.mxu0 %v5176_v56 }
 0x703   : > { %5162 = vmatpush.msra.mxu3 %v5161_v10  ;;  %5311 = vmatpush.msrb.mxu2 %v5105_v17 }
 0x704   : > { %5243 = vmatpush.msrb.mxu0 %v5182_v40 }
 0x705   : > { %5168 = vmatpush.msra.mxu3 %v5167_v19  ;;  %5315 = vmatpush.msrb.mxu2 %v5111_v54 }
 0x707   : > { %5174 = vmatpush.msra.mxu3 %v5173_v37  ;;  %5319 = vmatpush.msrb.mxu2 %v5117_v27 }
 0x709   : > { %5180 = vmatpush.msra.mxu3 %v5179_v58  ;;  %5323 = vmatpush.msrb.mxu2 %v5123_v14 }
 0x70b   : > { %5186 = vmatpush.msra.mxu3 %v5185_v34  ;;  %5327 = vmatpush.msrb.mxu2 %v5129_v42 }
 0x70d   : > { %5374 = vmatpush.msrb.mxu3 %v10485_v21  ;;  %5331 = vmatpush.msrb.mxu2 %v5135_v3 }
 0x70f   : > { %5376 = vmatpush.msrb.mxu3 %v10487_v35  ;;  %5335 = vmatpush.msrb.mxu2 %v5141_v30  ;;  %v7361_v35 = vld [vmem:[#allocation8 + $0x3] ss:$0 sm:$0xff]  ;;  %v5431_v30 = vld [vmem:[#allocation11 + $0x1f0] sm:$0xff] }
 0x710   : > { %v10703_v57 = vand.u32 4294901760, %v5431_v30 }
 0x711   : > { %5378 = vmatpush.msrb.mxu3 %v10489_v28  ;;  %5339 = vmatpush.msrb.mxu2 %v5147_v20 }
 0x712   : > { %v10715_v61 = vsub.f32 %v5431_v30, %v10703_v57 }
 0x713   : > { %5380 = vmatpush.msrb.mxu3 %v10492_v39  ;;  %5343 = vmatpush.msrb.mxu2 %v5153_v32  ;;  %v5429_v32 = vld [vmem:[#allocation11 + $0x1e0] sm:$0xff] }
 0x714   : > { %v10707_v33 = vand.u32 4294901760, %v5429_v32  ;;  %v5495_v4 = vand.u32 4294901760, %v10715_v61 }
 0x715   : > { %5382 = vmatpush.msrb.mxu3 %v10494_v63  ;;  %5347 = vmatpush.msrb.mxu2 %v5159_v24 }
 0x716   : > { %v5496_v46 = vsub.f32 %v10715_v61, %v5495_v4 }
 0x717   : > { %5384 = vmatpush.msrb.mxu3 %v10506_v51  ;;  %5351 = vmatpush.msrb.mxu2 %v5165_v60 }
 0x719   : > { %5386 = vmatpush.msrb.mxu3 %v10540_v43  ;;  %5355 = vmatpush.msrb.mxu2 %v5171_v45 }
 0x71b   : > { %5388 = vmatpush.msrb.mxu3 %v10576_v26  ;;  %5359 = vmatpush.msrb.mxu2 %v5177_v49 }
 0x71d   : > { %5390 = vmatpush.msrb.mxu3 %v10581_v6  ;;  %5363 = vmatpush.msrb.mxu2 %v5183_v48  ;;  %v5497_v48 = vand.u32 4294901760, %v5496_v46 }
 0x71f   : > { %5392 = vmatpush.msrb.mxu3 %v10589_v2  ;;  %v5432_v2 = vld [vmem:[#allocation11 + $0x1f8] sm:$0xff] }
 0x720   : > { %v10701_v20 = vand.u32 4294901760, %v5432_v2 }
 0x721   : > { %5394 = vmatpush.msrb.mxu3 %v10601_v38 }
 0x722   : > { %v10712_v24 = vsub.f32 %v5432_v2, %v10701_v20  ;;  %5439 = vmatpush.msra.mxu0 %v10701_v20 }
 0x723   : > { %5396 = vmatpush.msrb.mxu3 %v10615_v7  ;;  %v10705_v7 = vand.u32 4294901760, %v5430_v8 }
 0x724   : > { %v5489_v55 = vand.u32 4294901760, %v10712_v24  ;;  %5441 = vmatpush.msra.mxu0 %v10703_v57 }
 0x725   : > { %5398 = vmatpush.msrb.mxu3 %v10622_v47  ;;  %v5428_v47 = vld [vmem:[#allocation11 + $0x1d8] sm:$0xff]  ;;  %v10718_v15 = vsub.f32 %v5430_v8, %v10705_v7 }
 0x726   : > { %v5490_v19 = vsub.f32 %v10712_v24, %v5489_v55  ;;  %5443 = vmatpush.msra.mxu0 %v10705_v7 }
 0x727   : > { %5400 = vmatpush.msrb.mxu3 %v10636_v18  ;;  %v10709_v18 = vand.u32 4294901760, %v5428_v47  ;;  %v5501_v45 = vand.u32 4294901760, %v10718_v15 }
 0x728   : > { %v5491_v9 = vand.u32 4294901760, %v5490_v19  ;;  %5445 = vmatpush.msra.mxu0 %v10707_v33 }
 0x729   : > { %5402 = vmatpush.msrb.mxu3 %v10643_v13  ;;  %v10723_v13 = vsub.f32 %v5429_v32, %v10707_v33  ;;  %v10726_v29 = vsub.f32 %v5428_v47, %v10709_v18  ;;  %v5502_v49 = vsub.f32 %v10718_v15, %v5501_v45  ;;  %v5421_v47 = vld [vmem:[#allocation11 + $0x1a0] sm:$0xff] }
 0x72a   : > { %5492 = vmatpush.msra.mxu1 %v5491_v9  ;;  %5447 = vmatpush.msra.mxu0 %v10709_v18 }
 0x72b   : > { %5404 = vmatpush.msrb.mxu3 %v10651_v41  ;;  %v5507_v10 = vand.u32 4294901760, %v10723_v13  ;;  %v5513_v40 = vand.u32 4294901760, %v10726_v29  ;;  %v5503_v34 = vand.u32 4294901760, %v5502_v49 }
 0x72c   : > { %5498 = vmatpush.msra.mxu1 %v5497_v48  ;;  %v5419_v48 = vld [vmem:[#allocation11 + $0x190] sm:$0xff] }
 0x72d   : > { %v5508_v58 = vsub.f32 %v10723_v13, %v5507_v10 }
 0x72e   : > { %5504 = vmatpush.msra.mxu1 %v5503_v34 }
 0x758   : > { %v4793_v21 = vpop.f32.mrf.mxu1 }
 0x760   : > { %v4684_v28 = vpop.f32.mrf.mxu0  ;;  %v4797_v63 = vpop.f32.mrf.mxu1 }
 0x761   : > { %v4685_v39 = vadd.f32 %v7361_v35, %v4684_v28  ;;  %v4851_v23 = vpop.f32.mrf.mxu2  ;;  %v5509_v28 = vand.u32 4294901760, %v5508_v58 }
 0x762   : > { %v4895_v12 = vpop.f32.mrf.mxu3 }
 0x763   : > { %v4794_v5 = vadd.f32 %v4793_v21, %v4685_v39  ;;  %v5514_v21 = vsub.f32 %v10726_v29, %v5513_v40  ;;  %5510 = vmatpush.msra.mxu1 %v5509_v28  ;;  %v5418_v28 = vld [vmem:[#allocation11 + $0x188] sm:$0xff] }
 0x765   : > { %v4852_v51 = vadd.f32 %v4851_v23, %v4794_v5  ;;  %v5427_v5 = vld [vmem:[#allocation11 + $0x1d0] sm:$0xff] }
 0x766   : > { %v10763_v23 = vand.u32 4294901760, %v5427_v5 }
 0x767   : > { %v4896_v22 = vadd.f32 %v4895_v12, %v4852_v51  ;;  %v5425_v12 = vld [vmem:[#allocation11 + $0x1c0] sm:$0xff] }
 0x768   : > { %v4692_v53 = vpop.f32.mrf.mxu0  ;;  %v5011_v17 = vpop.f32.mrf.mxu1  ;;  %v10766_v51 = vsub.f32 %v5427_v5, %v10763_v23  ;;  %5449 = vmatpush.msra.mxu0 %v10763_v23 }
 0x769   : > { %v4693_v0 = vadd.f32 %v7361_v35, %v4692_v53  ;;  %v4856_v27 = vpop.f32.mrf.mxu2  ;;  %v5426_v53 = vld [vmem:[#allocation11 + $0x1c8] sm:$0xff] }
 0x76a   : > { %v4901_v42 = vpop.f32.mrf.mxu3 }
 0x76b   : > { %v4798_v25 = vadd.f32 %v4797_v63, %v4693_v0  ;;  %v5515_v63 = vand.u32 4294901760, %v5514_v21  ;;  %v10768_v0 = vand.u32 4294901760, %v5426_v53  ;;  %v10847_v21 = vand.u32 4294901760, %v5419_v48 }
 0x76d   : > { %v4857_v43 = vadd.f32 %v4856_v27, %v4798_v25  ;;  %5516 = vmatpush.msra.mxu1 %v5515_v63  ;;  %v10774_v25 = vsub.f32 %v5426_v53, %v10768_v0  ;;  %5451 = vmatpush.msra.mxu0 %v10768_v0  ;;  %v5566_v53 = vsub.f32 %v5419_v48, %v10847_v21 }
 0x76f   : > { %v4902_v26 = vadd.f32 %v4901_v42, %v4857_v43  ;;  %v5525_v27 = vand.u32 4294901760, %v10774_v25 }
 0x770   : > { %v4970_v62 = vpop.f32.mrf.mxu0  ;;  %v5015_v38 = vpop.f32.mrf.mxu1 }
 0x771   : > { %v4971_v54 = vadd.f32 %v4970_v62, %v4896_v22  ;;  %v5519_v22 = vand.u32 4294901760, %v10766_v51  ;;  %v5424_v62 = vld [vmem:[#allocation11 + $0x1b8] sm:$0xff] }
 0x773   : > { %v5012_v14 = vadd.f32 %v5011_v17, %v4971_v54  ;;  %v10776_v17 = vand.u32 4294901760, %v5425_v12  ;;  %v5520_v54 = vsub.f32 %v10766_v51, %v5519_v22 }
 0x775   : > { %v5018_v52 = vmax.f32 %v5012_v14, 0.0  ;;  %v10786_v43 = vsub.f32 %v5425_v12, %v10776_v17  ;;  %v10788_v14 = vand.u32 4294901760, %v5424_v62  ;;  %5453 = vmatpush.msra.mxu0 %v10776_v17  ;;  %v5521_v42 = vand.u32 4294901760, %v5520_v54 }
 0x776   : > { %v10858_v12 = vand.u32 4294901760, %v5418_v28 }
 0x777   : > { %v10697_v44 = vand.u32 4294901760, %v5018_v52  ;;  %5455 = vmatpush.msra.mxu0 %v10788_v14  ;;  %5522 = vmatpush.msra.mxu1 %v5521_v42  ;;  %v5567_v42 = vand.u32 4294901760, %v5566_v53 }
 0x778   : > { %v4974_v6 = vpop.f32.mrf.mxu0 }
 0x779   : > { %v5075_v3 = vsub.f32 %v5018_v52, %v10697_v44  ;;  %v4975_v11 = vadd.f32 %v4974_v6, %v4902_v26  ;;  %5188 = vmatmul.f32.vlgmr.msra.gmra.mxu3 %v10697_v44  ;;  %v5423_v52 = vld [vmem:[#allocation11 + $0x1b0] sm:$0xff]  ;;  %v5526_v26 = vsub.f32 %v10774_v25, %v5525_v27  ;;  %v10798_v6 = vsub.f32 %v5424_v62, %v10788_v14  ;;  %v5417_v62 = vld [vmem:[#allocation11 + $0x180] sm:$0xff] }
 0x77a   : > { %5652 = vmatpush.msra.mxu3 %v10701_v20 }
 0x77b   : > { %v5076_v31 = vand.u32 4294901760, %v5075_v3  ;;  %v5016_v50 = vadd.f32 %v5015_v38, %v4975_v11  ;;  %5246 = vmatmul.f32.vlgmr.msrb.gmra.mxu0 %v5075_v3  ;;  %v5422_v11 = vld [vmem:[#allocation11 + $0x1a8] sm:$0xff]  ;;  %v5527_v2 = vand.u32 4294901760, %v5526_v26  ;;  %v5537_v8 = vand.u32 4294901760, %v10798_v6 }
 0x77c   : > { %5654 = vmatpush.msra.mxu3 %v10703_v57  ;;  %v10809_v38 = vand.u32 4294901760, %v5422_v11  ;;  %v10862_v26 = vand.u32 4294901760, %v5417_v62 }
 0x77d   : > { %v5077_v60 = vsub.f32 %v5075_v3, %v5076_v31  ;;  %v5019_v59 = vmax.f32 %v5016_v50, 0.0  ;;  %5290 = vmatmul.f32.vlgmr.msrb.gmra.mxu1 %v5076_v31  ;;  %v10802_v3 = vand.u32 4294901760, %v5423_v52  ;;  %v5538_v50 = vsub.f32 %v10798_v6, %v5537_v8 }
 0x77e   : > { %5656 = vmatpush.msra.mxu3 %v10705_v7  ;;  %5528 = vmatpush.msra.mxu1 %v5527_v2 }
 0x77f   : > { %v5078_v56 = vand.u32 4294901760, %v5077_v60  ;;  %v5082_v41 = vand.u32 4294901760, %v5019_v59  ;;  %v10813_v32 = vsub.f32 %v5423_v52, %v10802_v3  ;;  %5457 = vmatpush.msra.mxu0 %v10802_v3  ;;  %v10821_v60 = vsub.f32 %v5422_v11, %v10809_v38 }
 0x780   : > { %5658 = vmatpush.msra.mxu3 %v10707_v33  ;;  %v5539_v19 = vand.u32 4294901760, %v5538_v50  ;;  %v5572_v11 = vsub.f32 %v5418_v28, %v10858_v12 }
 0x781   : > { %5079 = vmatmul.f32.vlgmr.msra.gmra.mxu2 %v5078_v56  ;;  %5192 = vmatmul.f32.gmra.mxu3 %v5082_v41  ;;  %v5083_v37 = vsub.f32 %v5019_v59, %v5082_v41  ;;  %v10823_v59 = vand.u32 4294901760, %v5421_v47  ;;  %v5543_v56 = vand.u32 4294901760, %v10813_v32  ;;  %v5549_v46 = vand.u32 4294901760, %v10821_v60 }
 0x782   : > { %5594 = vmatpush.msra.mxu2 %v10712_v24  ;;  %5660 = vmatpush.msra.mxu3 %v10709_v18 }
 0x783   : > { %5251 = vmatmul.f32.gmra.mxu0 %v5083_v37  ;;  %v5084_v1 = vand.u32 4294901760, %v5083_v37  ;;  %v10830_v49 = vsub.f32 %v5421_v47, %v10823_v59  ;;  %v5544_v9 = vsub.f32 %v10813_v32, %v5543_v56  ;;  %v5550_v58 = vsub.f32 %v10821_v60, %v5549_v46 }
 0x784   : > { %5597 = vmatpush.msra.mxu2 %v10715_v61  ;;  %5662 = vmatpush.msra.mxu3 %v10763_v23  ;;  %v5578_v47 = vsub.f32 %v5417_v62, %v10862_v26 }
 0x785   : > { %5296 = vmatmul.f32.gmra.mxu1 %v5084_v1  ;;  %v5085_v35 = vsub.f32 %v5083_v37, %v5084_v1  ;;  %5459 = vmatpush.msra.mxu0 %v10809_v38  ;;  %v5555_v1 = vand.u32 4294901760, %v10830_v49 }
 0x786   : > { %5600 = vmatpush.msra.mxu2 %v10718_v15  ;;  %5664 = vmatpush.msra.mxu3 %v10768_v0 }
 0x787   : > { %v5086_v39 = vand.u32 4294901760, %v5085_v35  ;;  %5461 = vmatpush.msra.mxu0 %v10823_v59  ;;  %v5545_v35 = vand.u32 4294901760, %v5544_v9  ;;  %v5556_v63 = vsub.f32 %v10830_v49, %v5555_v1 }
 0x788   : > { %5603 = vmatpush.msra.mxu2 %v10723_v13  ;;  %5666 = vmatpush.msra.mxu3 %v10776_v17 }
 0x789   : > { %5087 = vmatmul.f32.gmra.mxu2 %v5086_v39  ;;  %5406 = vmatmul.f32.vlgmr.msrb.gmra.mxu3 %v10697_v44  ;;  %v5551_v39 = vand.u32 4294901760, %v5550_v58  ;;  %v5557_v54 = vand.u32 4294901760, %v5556_v63 }
 0x78a   : > { %5606 = vmatpush.msra.mxu2 %v10726_v29  ;;  %5668 = vmatpush.msra.mxu3 %v10788_v14 }
 0x78c   : > { %5609 = vmatpush.msra.mxu2 %v10766_v51  ;;  %5670 = vmatpush.msra.mxu3 %v10802_v3 }
 0x78e   : > { %5612 = vmatpush.msra.mxu2 %v10774_v25  ;;  %5672 = vmatpush.msra.mxu3 %v10809_v38 }
 0x790   : > { %5615 = vmatpush.msra.mxu2 %v10786_v43  ;;  %5674 = vmatpush.msra.mxu3 %v10823_v59 }
 0x791   : > { %5365 = vmatmul.f32.vlgmr.msrb.gmra.mxu2 %v10697_v44  ;;  %5410 = vmatmul.f32.gmra.mxu3 %v5082_v41  ;;  %v5531_v44 = vand.u32 4294901760, %v10786_v43 }
 0x792   : > { %5618 = vmatpush.msra.mxu2 %v10798_v6 }
 0x793   : > { %v5532_v30 = vsub.f32 %v10786_v43, %v5531_v44 }
 0x794   : > { %5621 = vmatpush.msra.mxu2 %v10813_v32 }
 0x795   : > { %v5533_v31 = vand.u32 4294901760, %v5532_v30  ;;  %v5568_v30 = vsub.f32 %v5566_v53, %v5567_v42 }
 0x796   : > { %5624 = vmatpush.msra.mxu2 %v10821_v60 }
 0x797   : > { %5534 = vmatpush.msra.mxu1 %v5533_v31  ;;  %v5573_v31 = vand.u32 4294901760, %v5572_v11  ;;  %v5569_v50 = vand.u32 4294901760, %v5568_v30 }
 0x798   : > { %5627 = vmatpush.msra.mxu2 %v10830_v49  ;;  %v5825_v49 = vld [vmem:[#allocation14 + $0x58] sm:$0xff] }
 0x799   : > { %5369 = vmatmul.f32.gmra.mxu2 %v5082_v41  ;;  %v5420_v41 = vld [vmem:[#allocation11 + $0x198] sm:$0xff]  ;;  %5540 = vmatpush.msra.mxu1 %v5539_v19  ;;  %v5574_v19 = vsub.f32 %v5572_v11, %v5573_v31 }
 0x79a   : > { %v10832_v37 = vand.u32 4294901760, %v5420_v41 }
 0x79b   : > { %5546 = vmatpush.msra.mxu1 %v5545_v35  ;;  %v5575_v48 = vand.u32 4294901760, %v5574_v19  ;;  %v10927_v35 = vand.u32 4294901760, %v5825_v49 }
 0x79c   : > { %v10845_v34 = vsub.f32 %v5420_v41, %v10832_v37  ;;  %5463 = vmatpush.msra.mxu0 %v10832_v37  ;;  %5676 = vmatpush.msra.mxu3 %v10832_v37  ;;  %v5579_v41 = vand.u32 4294901760, %v5578_v47 }
 0x79d   : > { %5552 = vmatpush.msra.mxu1 %v5551_v39 }
 0x79e   : > { %v5561_v5 = vand.u32 4294901760, %v10845_v34  ;;  %5465 = vmatpush.msra.mxu0 %v10847_v21  ;;  %5630 = vmatpush.msra.mxu2 %v10845_v34  ;;  %v5580_v9 = vsub.f32 %v5578_v47, %v5579_v41 }
 0x79f   : > { %5678 = vmatpush.msra.mxu3 %v10847_v21  ;;  %5558 = vmatpush.msra.mxu1 %v5557_v54  ;;  %v10946_v54 = vsub.f32 %v5825_v49, %v10927_v35  ;;  %v5818_v49 = vld [vmem:[#allocation14 + $0x20] sm:$0xff] }
 0x7a0   : > { %v5562_v52 = vsub.f32 %v10845_v34, %v5561_v5  ;;  %5467 = vmatpush.msra.mxu0 %v10858_v12  ;;  %5633 = vmatpush.msra.mxu2 %v5566_v53  ;;  %v5581_v58 = vand.u32 4294901760, %v5580_v9 }
 0x7a1   : > { %5680 = vmatpush.msra.mxu3 %v10858_v12  ;;  %v5909_v19 = vand.u32 4294901760, %v10946_v54 }
 0x7a2   : > { %v5563_v2 = vand.u32 4294901760, %v5562_v52  ;;  %5469 = vmatpush.msra.mxu0 %v10862_v26  ;;  %5636 = vmatpush.msra.mxu2 %v5572_v11 }
 0x7a3   : > { %5682 = vmatpush.msra.mxu3 %v10862_v26 }
 0x7a4   : > { %5699 = vmatpush.msrb.mxu0 %v5489_v55  ;;  %5564 = vmatpush.msra.mxu1 %v5563_v2 }
 0x7a5   : > { %5639 = vmatpush.msra.mxu2 %v5578_v47 }
 0x7a6   : > { %5703 = vmatpush.msrb.mxu0 %v5495_v4  ;;  %5570 = vmatpush.msra.mxu1 %v5569_v50 }
 0x7a8   : > { %5707 = vmatpush.msrb.mxu0 %v5501_v45  ;;  %5576 = vmatpush.msra.mxu1 %v5575_v48 }
 0x7aa   : > { %5711 = vmatpush.msrb.mxu0 %v5507_v10  ;;  %5582 = vmatpush.msra.mxu1 %v5581_v58 }
 0x7ac   : > { %5770 = vmatpush.msrb.mxu1 %v10701_v20  ;;  %5715 = vmatpush.msrb.mxu0 %v5513_v40 }
 0x7ae   : > { %5772 = vmatpush.msrb.mxu1 %v10703_v57  ;;  %5719 = vmatpush.msrb.mxu0 %v5519_v22  ;;  %v7362_v57 = vld [vmem:[%s11608_s6 + $0x3] ss:$0 sm:$0xff] }
 0x7b0   : > { %5774 = vmatpush.msrb.mxu1 %v10705_v7  ;;  %5723 = vmatpush.msrb.mxu0 %v5525_v27 }
 0x7b2   : > { %5776 = vmatpush.msrb.mxu1 %v10707_v33  ;;  %5727 = vmatpush.msrb.mxu0 %v5531_v44 }
 0x7b4   : > { %5778 = vmatpush.msrb.mxu1 %v10709_v18  ;;  %5731 = vmatpush.msrb.mxu0 %v5537_v8  ;;  %v5828_v8 = vld [vmem:[#allocation14 + $0x70] sm:$0xff] }
 0x7b6   : > { %5780 = vmatpush.msrb.mxu1 %v10763_v23  ;;  %5735 = vmatpush.msrb.mxu0 %v5543_v56 }
 0x7b8   : > { %5782 = vmatpush.msrb.mxu1 %v10768_v0  ;;  %5739 = vmatpush.msrb.mxu0 %v5549_v46  ;;  %v5826_v46 = vld [vmem:[#allocation14 + $0x60] sm:$0xff] }
 0x7ba   : > { %5784 = vmatpush.msrb.mxu1 %v10776_v17  ;;  %5743 = vmatpush.msrb.mxu0 %v5555_v1 }
 0x7bc   : > { %5786 = vmatpush.msrb.mxu1 %v10788_v14  ;;  %5747 = vmatpush.msrb.mxu0 %v5561_v5 }
 0x7be   : > { %5788 = vmatpush.msrb.mxu1 %v10802_v3  ;;  %5751 = vmatpush.msrb.mxu0 %v5567_v42  ;;  %v5829_v3 = vld [vmem:[#allocation14 + $0x78] sm:$0xff] }
 0x7bf   : > { %v10919_v60 = vand.u32 4294901760, %v5829_v3 }
 0x7c0   : > { %5790 = vmatpush.msrb.mxu1 %v10809_v38  ;;  %5755 = vmatpush.msrb.mxu0 %v5573_v31  ;;  %v5827_v38 = vld [vmem:[#allocation14 + $0x68] sm:$0xff] }
 0x7c1   : > { %v10923_v56 = vand.u32 4294901760, %v5827_v38  ;;  %v10930_v28 = vsub.f32 %v5829_v3, %v10919_v60  ;;  %5835 = vmatpush.msrb.mxu2 %v10919_v60 }
 0x7c2   : > { %5792 = vmatpush.msrb.mxu1 %v10823_v59  ;;  %5759 = vmatpush.msrb.mxu0 %v5579_v41  ;;  %v10921_v59 = vand.u32 4294901760, %v5828_v8 }
 0x7c3   : > { %v10936_v63 = vsub.f32 %v5827_v38, %v10923_v56  ;;  %v5885_v52 = vand.u32 4294901760, %v10930_v28 }
 0x7c4   : > { %5794 = vmatpush.msrb.mxu1 %v10832_v37  ;;  %v5824_v37 = vld [vmem:[#allocation14 + $0x50] sm:$0xff]  ;;  %v10933_v39 = vsub.f32 %v5828_v8, %v10921_v59  ;;  %5837 = vmatpush.msrb.mxu2 %v10921_v59 }
 0x7c5   : > { %v10939_v5 = vand.u32 4294901760, %v5824_v37  ;;  %v5886_v31 = vsub.f32 %v10930_v28, %v5885_v52 }
 0x7c6   : > { %5796 = vmatpush.msrb.mxu1 %v10847_v21  ;;  %v10925_v21 = vand.u32 4294901760, %v5826_v46  ;;  %v5891_v42 = vand.u32 4294901760, %v10933_v39  ;;  %5839 = vmatpush.msrb.mxu2 %v10923_v56 }
 0x7c7   : > { %v10953_v11 = vsub.f32 %v5824_v37, %v10939_v5  ;;  %v5887_v48 = vand.u32 4294901760, %v5886_v31 }
 0x7c8   : > { %5798 = vmatpush.msrb.mxu1 %v10858_v12  ;;  %v10943_v62 = vsub.f32 %v5826_v46, %v10925_v21  ;;  %v5892_v50 = vsub.f32 %v10933_v39, %v5891_v42  ;;  %5841 = vmatpush.msrb.mxu2 %v10925_v21 }
 0x7c9   : > { %5888 = vmatpush.msrb.mxu3 %v5887_v48  ;;  %v5816_v48 = vld [vmem:[#allocation14 + $0x10] sm:$0xff] }
 0x7ca   : > { %5800 = vmatpush.msrb.mxu1 %v10862_v26  ;;  %v5897_v26 = vand.u32 4294901760, %v10936_v63  ;;  %v5903_v47 = vand.u32 4294901760, %v10943_v62  ;;  %v5893_v58 = vand.u32 4294901760, %v5892_v50  ;;  %5843 = vmatpush.msrb.mxu2 %v10927_v35 }
 0x7cc   : > { %v5898_v41 = vsub.f32 %v10936_v63, %v5897_v26  ;;  %5894 = vmatpush.msrb.mxu3 %v5893_v58  ;;  %5845 = vmatpush.msrb.mxu2 %v10939_v5 }
 0x7f8   : > { %v5247_v61 = vpop.f32.mrf.mxu0 }
 0x7fa   : > { %v5291_v55 = vpop.f32.mrf.mxu1 }
 0x7fc   : > { %v5189_v20 = vpop.f32.mrf.mxu3 }
 0x800   : > { %v5252_v51 = vpop.f32.mrf.mxu0 }
 0x802   : > { %v5297_v17 = vpop.f32.mrf.mxu1 }
 0x804   : > { %v5080_v7 = vpop.f32.mrf.mxu2  ;;  %v5193_v18 = vpop.f32.mrf.mxu3 }
 0x805   : > { %v5081_v33 = vadd.f32 %v7362_v57, %v5080_v7 }
 0x807   : > { %v5190_v24 = vadd.f32 %v5189_v20, %v5081_v33  ;;  %v5904_v20 = vsub.f32 %v10943_v62, %v5903_v47  ;;  %v5899_v33 = vand.u32 4294901760, %v5898_v41 }
 0x809   : > { %v5248_v29 = vadd.f32 %v5247_v61, %v5190_v24  ;;  %v5905_v61 = vand.u32 4294901760, %v5904_v20  ;;  %5900 = vmatpush.msrb.mxu3 %v5899_v33  ;;  %v11062_v33 = vand.u32 4294901760, %v5816_v48 }
 0x80b   : > { %v5292_v45 = vadd.f32 %v5291_v55, %v5248_v29  ;;  %5906 = vmatpush.msrb.mxu3 %v5905_v61 }
 0x80c   : > { %v5088_v15 = vpop.f32.mrf.mxu2  ;;  %v5407_v10 = vpop.f32.mrf.mxu3 }
 0x80d   : > { %v5089_v13 = vadd.f32 %v7362_v57, %v5088_v15  ;;  %v5915_v57 = vand.u32 4294901760, %v10953_v11 }
 0x80f   : > { %v5194_v4 = vadd.f32 %v5193_v18, %v5089_v13  ;;  %v5910_v18 = vsub.f32 %v10946_v54, %v5909_v19  ;;  %v5916_v15 = vsub.f32 %v10953_v11, %v5915_v57 }
 0x811   : > { %v5253_v22 = vadd.f32 %v5252_v51, %v5194_v4  ;;  %v5911_v29 = vand.u32 4294901760, %v5910_v18  ;;  %v5917_v55 = vand.u32 4294901760, %v5916_v15  ;;  %v5823_v4 = vld [vmem:[#allocation14 + $0x48] sm:$0xff]  ;;  %v5821_v51 = vld [vmem:[#allocation14 + $0x38] sm:$0xff] }
 0x813   : > { %v5298_v43 = vadd.f32 %v5297_v17, %v5253_v22  ;;  %5912 = vmatpush.msrb.mxu3 %v5911_v29  ;;  %v5820_v17 = vld [vmem:[#allocation14 + $0x30] sm:$0xff] }
 0x814   : > { %v5366_v40 = vpop.f32.mrf.mxu2  ;;  %v5411_v32 = vpop.f32.mrf.mxu3 }
 0x815   : > { %v5367_v23 = vadd.f32 %v5366_v40, %v5292_v45  ;;  %5918 = vmatpush.msrb.mxu3 %v5917_v55  ;;  %v10993_v45 = vand.u32 4294901760, %v5823_v4 }
 0x817   : > { %v5408_v0 = vadd.f32 %v5407_v10, %v5367_v23  ;;  %v5822_v10 = vld [vmem:[#allocation14 + $0x40] sm:$0xff]  ;;  %v10996_v40 = vsub.f32 %v5823_v4, %v10993_v45  ;;  %5847 = vmatpush.msrb.mxu2 %v10993_v45 }
 0x818   : > { %v10998_v23 = vand.u32 4294901760, %v5822_v10  ;;  %v5814_v4 = vld [vmem:[#allocation14] sm:$0xff] }
 0x819   : > { %v5414_v25 = vmax.f32 %v5408_v0, 0.0  ;;  %v5921_v0 = vand.u32 4294901760, %v10996_v40 }
 0x81a   : > { %v11004_v22 = vsub.f32 %v5822_v10, %v10998_v23  ;;  %5849 = vmatpush.msrb.mxu2 %v10998_v23 }
 0x81b   : > { %v10915_v27 = vand.u32 4294901760, %v5414_v25 }
 0x81c   : > { %v5370_v14 = vpop.f32.mrf.mxu2 }
 0x81d   : > { %v5471_v44 = vsub.f32 %v5414_v25, %v10915_v27  ;;  %v5371_v6 = vadd.f32 %v5370_v14, %v5298_v43  ;;  %5584 = vmatmul.f32.vlgmr.msra.gmra.mxu1 %v10915_v27  ;;  %v11006_v25 = vand.u32 4294901760, %v5821_v51  ;;  %v5927_v43 = vand.u32 4294901760, %v11004_v22 }
 0x81e   : > { %6048 = vmatpush.msra.mxu1 %v10919_v60 }
 0x81f   : > { %v5472_v1 = vand.u32 4294901760, %v5471_v44  ;;  %v5412_v34 = vadd.f32 %v5411_v32, %v5371_v6  ;;  %5642 = vmatmul.f32.vlgmr.msra.gmra.mxu2 %v5471_v44  ;;  %v11016_v14 = vsub.f32 %v5821_v51, %v11006_v25  ;;  %v5819_v6 = vld [vmem:[#allocation14 + $0x28] sm:$0xff]  ;;  %v5928_v8 = vsub.f32 %v11004_v22, %v5927_v43 }
 0x820   : > { %6050 = vmatpush.msra.mxu1 %v10921_v59  ;;  %5851 = vmatpush.msrb.mxu2 %v11006_v25  ;;  %v11032_v46 = vand.u32 4294901760, %v5819_v6 }
 0x821   : > { %v5473_v53 = vsub.f32 %v5471_v44, %v5472_v1  ;;  %v5415_v12 = vmax.f32 %v5412_v34, 0.0  ;;  %5686 = vmatmul.f32.vlgmr.msra.gmra.mxu3 %v5472_v1  ;;  %v11018_v44 = vand.u32 4294901760, %v5820_v17  ;;  %v5933_v38 = vand.u32 4294901760, %v11016_v14 }
 0x822   : > { %6052 = vmatpush.msra.mxu1 %v10923_v56  ;;  %v5929_v37 = vand.u32 4294901760, %v5928_v8 }
 0x823   : > { %v5474_v2 = vand.u32 4294901760, %v5473_v53  ;;  %v5478_v30 = vand.u32 4294901760, %v5415_v12  ;;  %v11028_v32 = vsub.f32 %v5820_v17, %v11018_v44  ;;  %5853 = vmatpush.msrb.mxu2 %v11018_v44  ;;  %v5934_v1 = vsub.f32 %v11016_v14, %v5933_v38 }
 0x824   : > { %6054 = vmatpush.msra.mxu1 %v10925_v21  ;;  %v11039_v53 = vand.u32 4294901760, %v5818_v49 }
 0x825   : > { %5475 = vmatmul.f32.vlgmr.msra.gmra.mxu0 %v5474_v2  ;;  %5588 = vmatmul.f32.gmra.mxu1 %v5478_v30  ;;  %v5479_v9 = vsub.f32 %v5415_v12, %v5478_v30  ;;  %v5939_v34 = vand.u32 4294901760, %v11028_v32  ;;  %v11043_v12 = vsub.f32 %v5819_v6, %v11032_v46  ;;  %v5817_v2 = vld [vmem:[#allocation14 + $0x18] sm:$0xff]  ;;  %v11083_v6 = vand.u32 4294901760, %v5814_v4 }
 0x826   : > { %5990 = vmatpush.msra.mxu0 %v10930_v28  ;;  %6056 = vmatpush.msra.mxu1 %v10927_v35  ;;  %v11051_v50 = vsub.f32 %v5818_v49, %v11039_v53  ;;  %v11053_v41 = vand.u32 4294901760, %v5817_v2 }
 0x827   : > { %5647 = vmatmul.f32.gmra.mxu2 %v5479_v9  ;;  %v5480_v7 = vand.u32 4294901760, %v5479_v9  ;;  %v5940_v31 = vsub.f32 %v11028_v32, %v5939_v34 }
 0x828   : > { %5993 = vmatpush.msra.mxu0 %v10933_v39  ;;  %6058 = vmatpush.msra.mxu1 %v10939_v5  ;;  %v5951_v20 = vand.u32 4294901760, %v11051_v50 }
 0x829   : > { %5692 = vmatmul.f32.gmra.mxu3 %v5480_v7  ;;  %v5481_v24 = vsub.f32 %v5479_v9, %v5480_v7  ;;  %5855 = vmatpush.msrb.mxu2 %v11032_v46  ;;  %v5945_v9 = vand.u32 4294901760, %v11043_v12  ;;  %v5941_v58 = vand.u32 4294901760, %v5940_v31  ;;  %v11060_v7 = vsub.f32 %v5817_v2, %v11053_v41 }
 0x82a   : > { %5996 = vmatpush.msra.mxu0 %v10936_v63  ;;  %6060 = vmatpush.msra.mxu1 %v10993_v45  ;;  %v5952_v61 = vsub.f32 %v11051_v50, %v5951_v20 }
 0x82b   : > { %v5482_v13 = vand.u32 4294901760, %v5481_v24  ;;  %5857 = vmatpush.msrb.mxu2 %v11039_v53  ;;  %v5946_v18 = vsub.f32 %v11043_v12, %v5945_v9  ;;  %v5815_v24 = vld [vmem:[#allocation14 + $0x8] sm:$0xff]  ;;  %v5957_v15 = vand.u32 4294901760, %v11060_v7 }
 0x82c   : > { %5999 = vmatpush.msra.mxu0 %v10943_v62  ;;  %6062 = vmatpush.msra.mxu1 %v10998_v23  ;;  %v11075_v29 = vand.u32 4294901760, %v5815_v24  ;;  %v5953_v10 = vand.u32 4294901760, %v5952_v61 }
 0x82d   : > { %5483 = vmatmul.f32.gmra.mxu0 %v5482_v13  ;;  %5802 = vmatmul.f32.vlgmr.msrb.gmra.mxu1 %v10915_v27  ;;  %v5962_v13 = vsub.f32 %v5816_v48, %v11062_v33  ;;  %v5947_v55 = vand.u32 4294901760, %v5946_v18  ;;  %v5958_v51 = vsub.f32 %v11060_v7, %v5957_v15 }
 0x82e   : > { %6002 = vmatpush.msra.mxu0 %v10946_v54  ;;  %6064 = vmatpush.msra.mxu1 %v11006_v25 }
 0x82f   : > { %5859 = vmatpush.msrb.mxu2 %v11053_v41  ;;  %v5963_v17 = vand.u32 4294901760, %v5962_v13 }
 0x830   : > { %6005 = vmatpush.msra.mxu0 %v10953_v11  ;;  %6066 = vmatpush.msra.mxu1 %v11018_v44 }
 0x831   : > { %5861 = vmatpush.msrb.mxu2 %v11062_v33  ;;  %v5964_v8 = vsub.f32 %v5962_v13, %v5963_v17 }
 0x832   : > { %6008 = vmatpush.msra.mxu0 %v10996_v40  ;;  %6068 = vmatpush.msra.mxu1 %v11032_v46 }
 0x833   : > { %5863 = vmatpush.msrb.mxu2 %v11075_v29 }
 0x834   : > { %6011 = vmatpush.msra.mxu0 %v11004_v22  ;;  %6070 = vmatpush.msra.mxu1 %v11039_v53 }
 0x835   : > { %5761 = vmatmul.f32.vlgmr.msrb.gmra.mxu0 %v10915_v27  ;;  %5806 = vmatmul.f32.gmra.mxu1 %v5478_v30  ;;  %v5922_v27 = vsub.f32 %v10996_v40, %v5921_v0 }
 0x836   : > { %6014 = vmatpush.msra.mxu0 %v11016_v14  ;;  %6072 = vmatpush.msra.mxu1 %v11053_v41 }
 0x837   : > { %v5923_v3 = vand.u32 4294901760, %v5922_v27  ;;  %v5968_v27 = vsub.f32 %v5815_v24, %v11075_v29  ;;  %5865 = vmatpush.msrb.mxu2 %v11083_v6 }
 0x838   : > { %6017 = vmatpush.msra.mxu0 %v11028_v32  ;;  %6074 = vmatpush.msra.mxu1 %v11062_v33 }
 0x839   : > { %5924 = vmatpush.msrb.mxu3 %v5923_v3  ;;  %v5959_v3 = vand.u32 4294901760, %v5958_v51  ;;  %v5969_v49 = vand.u32 4294901760, %v5968_v27  ;;  %6095 = vmatpush.msra.mxu2 %v5885_v52 }
 0x83a   : > { %6020 = vmatpush.msra.mxu0 %v11043_v12  ;;  %6076 = vmatpush.msra.mxu1 %v11075_v29 }
 0x83b   : > { %5930 = vmatpush.msrb.mxu3 %v5929_v37  ;;  %v5974_v37 = vsub.f32 %v5814_v4, %v11083_v6  ;;  %v5970_v2 = vsub.f32 %v5968_v27, %v5969_v49  ;;  %6099 = vmatpush.msra.mxu2 %v5891_v42 }
 0x83c   : > { %6023 = vmatpush.msra.mxu0 %v11051_v50  ;;  %6078 = vmatpush.msra.mxu1 %v11083_v6 }
 0x83d   : > { %5765 = vmatmul.f32.gmra.mxu0 %v5478_v30  ;;  %v5935_v30 = vand.u32 4294901760, %v5934_v1  ;;  %v5965_v1 = vand.u32 4294901760, %v5964_v8  ;;  %v5971_v31 = vand.u32 4294901760, %v5970_v2  ;;  %6103 = vmatpush.msra.mxu2 %v5897_v26 }
 0x83e   : > { %6026 = vmatpush.msra.mxu0 %v11060_v7 }
 0x83f   : > { %5936 = vmatpush.msrb.mxu3 %v5935_v30  ;;  %v5975_v30 = vand.u32 4294901760, %v5974_v37  ;;  %6107 = vmatpush.msra.mxu2 %v5903_v47 }
 0x840   : > { %6029 = vmatpush.msra.mxu0 %v5962_v13 }
 0x841   : > { %5942 = vmatpush.msrb.mxu3 %v5941_v58  ;;  %v5976_v48 = vsub.f32 %v5974_v37, %v5975_v30  ;;  %6111 = vmatpush.msra.mxu2 %v5909_v19 }
 0x842   : > { %6032 = vmatpush.msra.mxu0 %v5968_v27 }
 0x843   : > { %5948 = vmatpush.msrb.mxu3 %v5947_v55  ;;  %v5977_v58 = vand.u32 4294901760, %v5976_v48  ;;  %6115 = vmatpush.msra.mxu2 %v5915_v57 }
 0x844   : > { %6035 = vmatpush.msra.mxu0 %v5974_v37 }
 0x845   : > { %5954 = vmatpush.msrb.mxu3 %v5953_v10  ;;  %6119 = vmatpush.msra.mxu2 %v5921_v0 }
 0x847   : > { %5960 = vmatpush.msrb.mxu3 %v5959_v3  ;;  %6123 = vmatpush.msra.mxu2 %v5927_v43 }
 0x849   : > { %5966 = vmatpush.msrb.mxu3 %v5965_v1  ;;  %6127 = vmatpush.msra.mxu2 %v5933_v38 }
 0x84b   : > { %5972 = vmatpush.msrb.mxu3 %v5971_v31  ;;  %6131 = vmatpush.msra.mxu2 %v5939_v34  ;;  %v6222_v34 = vld [vmem:[#allocation16 + $0x70] sm:$0xff] }
 0x84c   : > { %v11137_v50 = vand.u32 4294901760, %v6222_v34 }
 0x84d   : > { %5978 = vmatpush.msrb.mxu3 %v5977_v58  ;;  %6135 = vmatpush.msra.mxu2 %v5945_v9  ;;  %v6219_v9 = vld [vmem:[#allocation16 + $0x58] sm:$0xff] }
 0x84e   : > { %v11144_v18 = vand.u32 4294901760, %v6219_v9  ;;  %v11150_v61 = vsub.f32 %v6222_v34, %v11137_v50 }
 0x84f   : > { %6166 = vmatpush.msra.mxu3 %v10919_v60  ;;  %6139 = vmatpush.msra.mxu2 %v5951_v20 }
 0x850   : > { %v11161_v55 = vsub.f32 %v6219_v9, %v11144_v18  ;;  %v6285_v10 = vand.u32 4294901760, %v11150_v61 }
 0x851   : > { %6168 = vmatpush.msra.mxu3 %v10921_v59  ;;  %6143 = vmatpush.msra.mxu2 %v5957_v15  ;;  %v7363_v59 = vld [vmem:[#allocation13 + $0x3] ss:$0 sm:$0xff] }
 0x852   : > { %v6286_v8 = vsub.f32 %v11150_v61, %v6285_v10  ;;  %v6303_v37 = vand.u32 4294901760, %v11161_v55 }
 0x853   : > { %6170 = vmatpush.msra.mxu3 %v10923_v56  ;;  %6147 = vmatpush.msra.mxu2 %v5963_v17 }
 0x855   : > { %6172 = vmatpush.msra.mxu3 %v10925_v21  ;;  %6151 = vmatpush.msra.mxu2 %v5969_v49 }
 0x857   : > { %6174 = vmatpush.msra.mxu3 %v10927_v35  ;;  %6155 = vmatpush.msra.mxu2 %v5975_v30  ;;  %v6287_v30 = vand.u32 4294901760, %v6286_v8 }
 0x859   : > { %6176 = vmatpush.msra.mxu3 %v10939_v5 }
 0x85b   : > { %6178 = vmatpush.msra.mxu3 %v10993_v45 }
 0x85d   : > { %6180 = vmatpush.msra.mxu3 %v10998_v23 }
 0x85f   : > { %6182 = vmatpush.msra.mxu3 %v11006_v25 }
 0x861   : > { %6184 = vmatpush.msra.mxu3 %v11018_v44 }
 0x863   : > { %6186 = vmatpush.msra.mxu3 %v11032_v46  ;;  %v6223_v46 = vld [vmem:[#allocation16 + $0x78] sm:$0xff] }
 0x864   : > { %v11135_v12 = vand.u32 4294901760, %v6223_v46 }
 0x865   : > { %6188 = vmatpush.msra.mxu3 %v11039_v53  ;;  %v6221_v53 = vld [vmem:[#allocation16 + $0x68] sm:$0xff] }
 0x866   : > { %v11147_v24 = vsub.f32 %v6223_v46, %v11135_v12  ;;  %6229 = vmatpush.msrb.mxu0 %v11135_v12 }
 0x867   : > { %6190 = vmatpush.msra.mxu3 %v11053_v41  ;;  %v6220_v41 = vld [vmem:[#allocation16 + $0x60] sm:$0xff] }
 0x868   : > { %v6279_v4 = vand.u32 4294901760, %v11147_v24  ;;  %6231 = vmatpush.msrb.mxu0 %v11137_v50 }
 0x869   : > { %6192 = vmatpush.msra.mxu3 %v11062_v33  ;;  %v11142_v33 = vand.u32 4294901760, %v6220_v41 }
 0x86a   : > { %v6280_v3 = vsub.f32 %v11147_v24, %v6279_v4 }
 0x86b   : > { %6194 = vmatpush.msra.mxu3 %v11075_v29  ;;  %v11158_v29 = vsub.f32 %v6220_v41, %v11142_v33 }
 0x86c   : > { %v6281_v2 = vand.u32 4294901760, %v6280_v3 }
 0x86d   : > { %6196 = vmatpush.msra.mxu3 %v11083_v6  ;;  %v6297_v6 = vand.u32 4294901760, %v11158_v29 }
 0x86e   : > { %6282 = vmatpush.msrb.mxu1 %v6281_v2 }
 0x86f   : > { %v6298_v31 = vsub.f32 %v11158_v29, %v6297_v6 }
 0x870   : > { %6288 = vmatpush.msrb.mxu1 %v6287_v30 }
 0x89a   : > { %v5585_v60 = vpop.f32.mrf.mxu1 }
 0x8a2   : > { %v5476_v56 = vpop.f32.mrf.mxu0  ;;  %v5589_v35 = vpop.f32.mrf.mxu1 }
 0x8a3   : > { %v5477_v21 = vadd.f32 %v7363_v59, %v5476_v56  ;;  %v5643_v39 = vpop.f32.mrf.mxu2  ;;  %v6299_v56 = vand.u32 4294901760, %v6298_v31 }
 0x8a4   : > { %v5687_v54 = vpop.f32.mrf.mxu3 }
 0x8a5   : > { %v5586_v28 = vadd.f32 %v5585_v60, %v5477_v21  ;;  %v6304_v60 = vsub.f32 %v11161_v55, %v6303_v37 }
 0x8a7   : > { %v5644_v5 = vadd.f32 %v5643_v39, %v5586_v28  ;;  %v6218_v28 = vld [vmem:[#allocation16 + $0x50] sm:$0xff] }
 0x8a8   : > { %v11198_v39 = vand.u32 4294901760, %v6218_v28 }
 0x8a9   : > { %v5688_v52 = vadd.f32 %v5687_v54, %v5644_v5  ;;  %v6216_v54 = vld [vmem:[#allocation16 + $0x40] sm:$0xff] }
 0x8aa   : > { %v5484_v63 = vpop.f32.mrf.mxu0  ;;  %v5803_v26 = vpop.f32.mrf.mxu1  ;;  %v11201_v5 = vsub.f32 %v6218_v28, %v11198_v39 }
 0x8ab   : > { %v5485_v62 = vadd.f32 %v7363_v59, %v5484_v63  ;;  %v5648_v19 = vpop.f32.mrf.mxu2  ;;  %v6217_v63 = vld [vmem:[#allocation16 + $0x48] sm:$0xff] }
 0x8ac   : > { %v5693_v23 = vpop.f32.mrf.mxu3 }
 0x8ad   : > { %v5590_v42 = vadd.f32 %v5589_v35, %v5485_v62  ;;  %v6305_v35 = vand.u32 4294901760, %v6304_v60  ;;  %v11203_v62 = vand.u32 4294901760, %v6217_v63  ;;  %v6209_v60 = vld [vmem:[#allocation16 + $0x8] sm:$0xff] }
 0x8ae   : > { %v11293_v28 = vand.u32 4294901760, %v6209_v60 }
 0x8af   : > { %v5649_v57 = vadd.f32 %v5648_v19, %v5590_v42  ;;  %v11209_v42 = vsub.f32 %v6217_v63, %v11203_v62  ;;  %v6208_v63 = vld [vmem:[#allocation16] sm:$0xff] }
 0x8b1   : > { %v5694_v0 = vadd.f32 %v5693_v23, %v5649_v57  ;;  %v6315_v19 = vand.u32 4294901760, %v11209_v42 }
 0x8b2   : > { %v5762_v11 = vpop.f32.mrf.mxu0  ;;  %v5807_v44 = vpop.f32.mrf.mxu1 }
 0x8b3   : > { %v5763_v47 = vadd.f32 %v5762_v11, %v5688_v52  ;;  %v6309_v52 = vand.u32 4294901760, %v11201_v5  ;;  %v6215_v11 = vld [vmem:[#allocation16 + $0x38] sm:$0xff] }
 0x8b5   : > { %v5804_v45 = vadd.f32 %v5803_v26, %v5763_v47  ;;  %v11211_v26 = vand.u32 4294901760, %v6216_v54  ;;  %v6310_v47 = vsub.f32 %v11201_v5, %v6309_v52 }
 0x8b7   : > { %v5810_v40 = vadd.f32 %v5804_v45, %v10477_v36  ;;  %v11139_v36 = vand.u32 4294901760, %v6221_v53  ;;  %v11221_v57 = vsub.f32 %v6216_v54, %v11211_v26  ;;  %v11223_v45 = vand.u32 4294901760, %v6215_v11 }
 0x8b8   : > { %v6311_v23 = vand.u32 4294901760, %v6310_v47 }
 0x8b9   : > { %v5812_v22 = vmax.f32 %v5810_v40, 0.0  ;;  %v11153_v15 = vsub.f32 %v6221_v53, %v11139_v36  ;;  %6233 = vmatpush.msrb.mxu0 %v11139_v36  ;;  %v6214_v40 = vld [vmem:[#allocation16 + $0x30] sm:$0xff]  ;;  %v6212_v53 = vld [vmem:[#allocation16 + $0x20] sm:$0xff] }
 0x8ba   : > { %v5766_v25 = vpop.f32.mrf.mxu0 }
 0x8bb   : > { %v11131_v43 = vand.u32 4294901760, %v5812_v22  ;;  %v5767_v14 = vadd.f32 %v5766_v25, %v5694_v0  ;;  %v6291_v51 = vand.u32 4294901760, %v11153_v15  ;;  %6235 = vmatpush.msrb.mxu0 %v11142_v33  ;;  %v6316_v0 = vsub.f32 %v11209_v42, %v6315_v19 }
 0x8bc   : > { %v11233_v25 = vsub.f32 %v6215_v11, %v11223_v45 }
 0x8bd   : > { %v5867_v38 = vsub.f32 %v5812_v22, %v11131_v43  ;;  %v5808_v32 = vadd.f32 %v5807_v44, %v5767_v14  ;;  %5980 = vmatmul.f32.vlgmr.msrb.gmra.mxu3 %v11131_v43  ;;  %v6292_v49 = vsub.f32 %v11153_v15, %v6291_v51  ;;  %6237 = vmatpush.msrb.mxu0 %v11144_v18  ;;  %v6321_v22 = vand.u32 4294901760, %v11221_v57  ;;  %v6213_v14 = vld [vmem:[#allocation16 + $0x28] sm:$0xff] }
 0x8be   : > { %6442 = vmatpush.msrb.mxu3 %v11135_v12  ;;  %v6317_v44 = vand.u32 4294901760, %v6316_v0  ;;  %v11244_v46 = vand.u32 4294901760, %v6213_v14 }
 0x8bf   : > { %v5868_v20 = vand.u32 4294901760, %v5867_v38  ;;  %v5811_v7 = vadd.f32 %v5808_v32, %v10509_v16  ;;  %6038 = vmatmul.f32.vlgmr.msra.gmra.mxu0 %v5867_v38  ;;  %v6293_v58 = vand.u32 4294901760, %v6292_v49  ;;  %v6327_v32 = vand.u32 4294901760, %v11233_v25 }
 0x8c0   : > { %6444 = vmatpush.msrb.mxu3 %v11137_v50  ;;  %6239 = vmatpush.msrb.mxu0 %v11198_v39 }
 0x8c1   : > { %v5869_v13 = vsub.f32 %v5867_v38, %v5868_v20  ;;  %v5813_v16 = vmax.f32 %v5811_v7, 0.0  ;;  %6082 = vmatmul.f32.vlgmr.msra.gmra.mxu1 %v5868_v20  ;;  %v6322_v38 = vsub.f32 %v11221_v57, %v6321_v22  ;;  %v6328_v9 = vsub.f32 %v11233_v25, %v6327_v32 }
 0x8c2   : > { %6446 = vmatpush.msrb.mxu3 %v11139_v36  ;;  %6294 = vmatpush.msrb.mxu1 %v6293_v58  ;;  %v11256_v20 = vsub.f32 %v6213_v14, %v11244_v46  ;;  %v11258_v7 = vand.u32 4294901760, %v6212_v53 }
 0x8c3   : > { %v5874_v17 = vand.u32 4294901760, %v5813_v16  ;;  %v5870_v27 = vand.u32 4294901760, %v5869_v13  ;;  %6241 = vmatpush.msrb.mxu0 %v11203_v62  ;;  %v6323_v41 = vand.u32 4294901760, %v6322_v38 }
 0x8c4   : > { %6448 = vmatpush.msrb.mxu3 %v11142_v33  ;;  %6300 = vmatpush.msrb.mxu1 %v6299_v56  ;;  %v11265_v3 = vsub.f32 %v6212_v53, %v11258_v7 }
 0x8c5   : > { %5871 = vmatmul.f32.vlgmr.msrb.gmra.mxu2 %v5870_v27  ;;  %5984 = vmatmul.f32.gmra.mxu3 %v5874_v17  ;;  %v5875_v1 = vsub.f32 %v5813_v16, %v5874_v17  ;;  %v6211_v16 = vld [vmem:[#allocation16 + $0x18] sm:$0xff]  ;;  %v6339_v27 = vand.u32 4294901760, %v11256_v20 }
 0x8c6   : > { %6384 = vmatpush.msrb.mxu2 %v11147_v24  ;;  %6450 = vmatpush.msrb.mxu3 %v11144_v18  ;;  %v11267_v8 = vand.u32 4294901760, %v6211_v16  ;;  %v6345_v30 = vand.u32 4294901760, %v11265_v3 }
 0x8c7   : > { %6043 = vmatmul.f32.gmra.mxu0 %v5875_v1  ;;  %v5876_v48 = vand.u32 4294901760, %v5875_v1  ;;  %6306 = vmatpush.msrb.mxu1 %v6305_v35  ;;  %v6340_v2 = vsub.f32 %v11256_v20, %v6339_v27 }
 0x8c8   : > { %6387 = vmatpush.msrb.mxu2 %v11150_v61  ;;  %6452 = vmatpush.msrb.mxu3 %v11198_v39  ;;  %v11280_v31 = vsub.f32 %v6211_v16, %v11267_v8  ;;  %v6346_v56 = vsub.f32 %v11265_v3, %v6345_v30 }
 0x8c9   : > { %6088 = vmatmul.f32.gmra.mxu1 %v5876_v48  ;;  %v5877_v59 = vsub.f32 %v5875_v1, %v5876_v48  ;;  %6243 = vmatpush.msrb.mxu0 %v11211_v26  ;;  %v6210_v1 = vld [vmem:[#allocation16 + $0x10] sm:$0xff] }
 0x8ca   : > { %6390 = vmatpush.msrb.mxu2 %v11153_v15  ;;  %6454 = vmatpush.msrb.mxu3 %v11203_v62  ;;  %v11282_v48 = vand.u32 4294901760, %v6210_v1  ;;  %v6347_v54 = vand.u32 4294901760, %v6346_v56 }
 0x8cb   : > { %v5878_v21 = vand.u32 4294901760, %v5877_v59  ;;  %6245 = vmatpush.msrb.mxu0 %v11223_v45  ;;  %6312 = vmatpush.msrb.mxu1 %v6311_v23  ;;  %v6341_v59 = vand.u32 4294901760, %v6340_v2  ;;  %v6362_v23 = vsub.f32 %v6209_v60, %v11293_v28 }
 0x8cc   : > { %6393 = vmatpush.msrb.mxu2 %v11158_v29  ;;  %6456 = vmatpush.msrb.mxu3 %v11211_v26  ;;  %v6356_v35 = vsub.f32 %v6210_v1, %v11282_v48 }
 0x8cd   : > { %5879 = vmatmul.f32.gmra.mxu2 %v5878_v21  ;;  %6198 = vmatmul.f32.vlgmr.msra.gmra.mxu3 %v11131_v43  ;;  %v6351_v21 = vand.u32 4294901760, %v11280_v31  ;;  %v6363_v38 = vand.u32 4294901760, %v6362_v23 }
 0x8ce   : > { %6396 = vmatpush.msrb.mxu2 %v11161_v55  ;;  %6458 = vmatpush.msrb.mxu3 %v11223_v45  ;;  %v6357_v47 = vand.u32 4294901760, %v6356_v35 }
 0x8cf   : > { %6318 = vmatpush.msrb.mxu1 %v6317_v44  ;;  %v6352_v11 = vsub.f32 %v11280_v31, %v6351_v21 }
 0x8d0   : > { %6399 = vmatpush.msrb.mxu2 %v11201_v5  ;;  %v6358_v14 = vsub.f32 %v6356_v35, %v6357_v47 }
 0x8d1   : > { %6324 = vmatpush.msrb.mxu1 %v6323_v41  ;;  %v6353_v0 = vand.u32 4294901760, %v6352_v11 }
 0x8d2   : > { %6402 = vmatpush.msrb.mxu2 %v11209_v42  ;;  %v6359_v53 = vand.u32 4294901760, %v6358_v14 }
 0x8d4   : > { %6405 = vmatpush.msrb.mxu2 %v11221_v57 }
 0x8d5   : > { %6157 = vmatmul.f32.vlgmr.msra.gmra.mxu2 %v11131_v43  ;;  %6202 = vmatmul.f32.gmra.mxu3 %v5874_v17  ;;  %v11237_v43 = vand.u32 4294901760, %v6214_v40 }
 0x8d6   : > { %6408 = vmatpush.msrb.mxu2 %v11233_v25 }
 0x8d7   : > { %v11248_v34 = vsub.f32 %v6214_v40, %v11237_v43  ;;  %6247 = vmatpush.msrb.mxu0 %v11237_v43  ;;  %6460 = vmatpush.msrb.mxu3 %v11237_v43  ;;  %v11297_v40 = vand.u32 4294901760, %v6208_v63 }
 0x8d9   : > { %v6333_v13 = vand.u32 4294901760, %v11248_v34  ;;  %6249 = vmatpush.msrb.mxu0 %v11244_v46  ;;  %6411 = vmatpush.msrb.mxu2 %v11248_v34  ;;  %v6368_v44 = vsub.f32 %v6208_v63, %v11297_v40 }
 0x8da   : > { %6462 = vmatpush.msrb.mxu3 %v11244_v46 }
 0x8db   : > { %v6334_v49 = vsub.f32 %v11248_v34, %v6333_v13  ;;  %6251 = vmatpush.msrb.mxu0 %v11258_v7  ;;  %6414 = vmatpush.msrb.mxu2 %v11256_v20  ;;  %v6369_v41 = vand.u32 4294901760, %v6368_v44 }
 0x8dc   : > { %6464 = vmatpush.msrb.mxu3 %v11258_v7 }
 0x8dd   : > { %6161 = vmatmul.f32.gmra.mxu2 %v5874_v17  ;;  %v6329_v17 = vand.u32 4294901760, %v6328_v9  ;;  %v6335_v58 = vand.u32 4294901760, %v6334_v49  ;;  %6253 = vmatpush.msrb.mxu0 %v11267_v8  ;;  %v6364_v9 = vsub.f32 %v6362_v23, %v6363_v38  ;;  %v6370_v16 = vsub.f32 %v6368_v44, %v6369_v41 }
 0x8de   : > { %6417 = vmatpush.msrb.mxu2 %v11265_v3  ;;  %6466 = vmatpush.msrb.mxu3 %v11267_v8  ;;  %v6613_v3 = vld [vmem:[#allocation17 + $0x58] sm:$0xff] }
 0x8df   : > { %6330 = vmatpush.msrb.mxu1 %v6329_v17  ;;  %6255 = vmatpush.msrb.mxu0 %v11282_v48  ;;  %v6365_v17 = vand.u32 4294901760, %v6364_v9  ;;  %v6371_v49 = vand.u32 4294901760, %v6370_v16 }
 0x8e0   : > { %6420 = vmatpush.msrb.mxu2 %v11280_v31  ;;  %6468 = vmatpush.msrb.mxu3 %v11282_v48  ;;  %v11362_v31 = vand.u32 4294901760, %v6613_v3 }
 0x8e1   : > { %6336 = vmatpush.msrb.mxu1 %v6335_v58  ;;  %6257 = vmatpush.msrb.mxu0 %v11293_v28 }
 0x8e2   : > { %6423 = vmatpush.msrb.mxu2 %v6356_v35  ;;  %6470 = vmatpush.msrb.mxu3 %v11293_v28 }
 0x8e3   : > { %6342 = vmatpush.msrb.mxu1 %v6341_v59  ;;  %6259 = vmatpush.msrb.mxu0 %v11297_v40 }
 0x8e4   : > { %6426 = vmatpush.msrb.mxu2 %v6362_v23  ;;  %6472 = vmatpush.msrb.mxu3 %v11297_v40 }
 0x8e5   : > { %6348 = vmatpush.msrb.mxu1 %v6347_v54  ;;  %6489 = vmatpush.msra.mxu0 %v6279_v4 }
 0x8e6   : > { %6429 = vmatpush.msrb.mxu2 %v6368_v44 }
 0x8e7   : > { %6354 = vmatpush.msrb.mxu1 %v6353_v0  ;;  %6493 = vmatpush.msra.mxu0 %v6285_v10 }
 0x8e9   : > { %6360 = vmatpush.msrb.mxu1 %v6359_v53  ;;  %6497 = vmatpush.msra.mxu0 %v6291_v51 }
 0x8eb   : > { %6366 = vmatpush.msrb.mxu1 %v6365_v17  ;;  %6501 = vmatpush.msra.mxu0 %v6297_v6 }
 0x8ed   : > { %6372 = vmatpush.msrb.mxu1 %v6371_v49  ;;  %6505 = vmatpush.msra.mxu0 %v6303_v37 }
 0x8ef   : > { %6560 = vmatpush.msra.mxu1 %v11135_v12  ;;  %6509 = vmatpush.msra.mxu0 %v6309_v52 }
 0x8f1   : > { %6562 = vmatpush.msra.mxu1 %v11137_v50  ;;  %6513 = vmatpush.msra.mxu0 %v6315_v19  ;;  %v7364_v50 = vld [vmem:[%s11647_s28] ss:$0 sm:$0xff]  ;;  %s7009_s28 = sshll.u32 %s663_s7, 4  ;;  %s7010_s28 = int_to_ptr.vmem [resolvable:$true] %s7009_s28 }
 0x8f3   : > { %6564 = vmatpush.msra.mxu1 %v11139_v36  ;;  %6517 = vmatpush.msra.mxu0 %v6321_v22 }
 0x8f5   : > { %6566 = vmatpush.msra.mxu1 %v11142_v33  ;;  %6521 = vmatpush.msra.mxu0 %v6327_v32  ;;  %v6616_v32 = vld [vmem:[#allocation17 + $0x70] sm:$0xff] }
 0x8f7   : > { %6568 = vmatpush.msra.mxu1 %v11144_v18  ;;  %6525 = vmatpush.msra.mxu0 %v6333_v13 }
 0x8f9   : > { %6570 = vmatpush.msra.mxu1 %v11198_v39  ;;  %6529 = vmatpush.msra.mxu0 %v6339_v27  ;;  %v6614_v27 = vld [vmem:[#allocation17 + $0x60] sm:$0xff] }
 0x8fb   : > { %6572 = vmatpush.msra.mxu1 %v11203_v62  ;;  %6533 = vmatpush.msra.mxu0 %v6345_v30  ;;  %v11360_v30 = vand.u32 4294901760, %v6614_v27 }
 0x8fd   : > { %6574 = vmatpush.msra.mxu1 %v11211_v26  ;;  %6537 = vmatpush.msra.mxu0 %v6351_v21  ;;  %v11378_v35 = vsub.f32 %v6614_v27, %v11360_v30 }
 0x8ff   : > { %6576 = vmatpush.msra.mxu1 %v11223_v45  ;;  %6541 = vmatpush.msra.mxu0 %v6357_v47  ;;  %v6691_v14 = vand.u32 4294901760, %v11378_v35 }
 0x901   : > { %6578 = vmatpush.msra.mxu1 %v11237_v43  ;;  %6545 = vmatpush.msra.mxu0 %v6363_v38  ;;  %v6617_v43 = vld [vmem:[#allocation17 + $0x78] sm:$0xff] }
 0x902   : > { %v11354_v20 = vand.u32 4294901760, %v6617_v43 }
 0x903   : > { %6580 = vmatpush.msra.mxu1 %v11244_v46  ;;  %6549 = vmatpush.msra.mxu0 %v6369_v41  ;;  %v6615_v46 = vld [vmem:[#allocation17 + $0x68] sm:$0xff] }
 0x904   : > { %v11358_v13 = vand.u32 4294901760, %v6615_v46  ;;  %6623 = vmatpush.msra.mxu2 %v11354_v20 }
 0x905   : > { %6582 = vmatpush.msra.mxu1 %v11258_v7  ;;  %v11356_v7 = vand.u32 4294901760, %v6616_v32 }
 0x906   : > { %v11371_v60 = vsub.f32 %v6615_v46, %v11358_v13 }
 0x907   : > { %6584 = vmatpush.msra.mxu1 %v11267_v8  ;;  %v6612_v8 = vld [vmem:[#allocation17 + $0x50] sm:$0xff]  ;;  %v11368_v58 = vsub.f32 %v6616_v32, %v11356_v7  ;;  %6625 = vmatpush.msra.mxu2 %v11356_v7 }
 0x908   : > { %v11374_v59 = vand.u32 4294901760, %v6612_v8  ;;  %v6685_v11 = vand.u32 4294901760, %v11371_v60 }
 0x909   : > { %6586 = vmatpush.msra.mxu1 %v11282_v48  ;;  %v11365_v48 = vsub.f32 %v6617_v43, %v11354_v20  ;;  %v6679_v54 = vand.u32 4294901760, %v11368_v58  ;;  %6627 = vmatpush.msra.mxu2 %v11358_v13 }
 0x90a   : > { %v11388_v47 = vsub.f32 %v6612_v8, %v11374_v59  ;;  %v6686_v53 = vsub.f32 %v11371_v60, %v6685_v11 }
 0x90b   : > { %6588 = vmatpush.msra.mxu1 %v11293_v28  ;;  %v11381_v28 = vsub.f32 %v6613_v3, %v11362_v31  ;;  %v6673_v63 = vand.u32 4294901760, %v11365_v48  ;;  %v6680_v38 = vsub.f32 %v11368_v58, %v6679_v54  ;;  %6629 = vmatpush.msra.mxu2 %v11360_v30 }
 0x90d   : > { %6590 = vmatpush.msra.mxu1 %v11297_v40  ;;  %v6611_v40 = vld [vmem:[#allocation17 + $0x48] sm:$0xff]  ;;  %v6674_v44 = vsub.f32 %v11365_v48, %v6673_v63  ;;  %v6697_v41 = vand.u32 4294901760, %v11381_v28  ;;  %v6681_v49 = vand.u32 4294901760, %v6680_v38  ;;  %6631 = vmatpush.msra.mxu2 %v11362_v31  ;;  %v6604_v38 = vld [vmem:[#allocation17 + $0x10] sm:$0xff] }
 0x90e   : > { %v11404_v16 = vand.u32 4294901760, %v6611_v40 }
 0x90f   : > { %v6675_v17 = vand.u32 4294901760, %v6674_v44  ;;  %6633 = vmatpush.msra.mxu2 %v11374_v59 }
 0x911   : > { %6676 = vmatpush.msra.mxu3 %v6675_v17  ;;  %6635 = vmatpush.msra.mxu2 %v11404_v16 }
 0x913   : > { %6682 = vmatpush.msra.mxu3 %v6681_v49  ;;  %v11500_v49 = vand.u32 4294901760, %v6604_v38 }
 0x93c   : > { %v6039_v61 = vpop.f32.mrf.mxu0 }
 0x93e   : > { %v6083_v4 = vpop.f32.mrf.mxu1 }
 0x940   : > { %v5981_v12 = vpop.f32.mrf.mxu3 }
 0x944   : > { %v6044_v5 = vpop.f32.mrf.mxu0 }
 0x946   : > { %v6089_v26 = vpop.f32.mrf.mxu1 }
 0x948   : > { %v5872_v36 = vpop.f32.mrf.mxu2  ;;  %v5985_v18 = vpop.f32.mrf.mxu3 }
 0x949   : > { %v5873_v33 = vadd.f32 %v7364_v50, %v5872_v36 }
 0x94b   : > { %v5982_v24 = vadd.f32 %v5981_v12, %v5873_v33  ;;  %v6692_v12 = vsub.f32 %v11378_v35, %v6691_v14  ;;  %v11413_v33 = vsub.f32 %v6611_v40, %v11404_v16 }
 0x94d   : > { %v6040_v55 = vadd.f32 %v6039_v61, %v5982_v24  ;;  %v6698_v24 = vsub.f32 %v11381_v28, %v6697_v41 }
 0x94f   : > { %v6084_v51 = vadd.f32 %v6083_v4, %v6040_v55 }
 0x950   : > { %v5880_v15 = vpop.f32.mrf.mxu2  ;;  %v6199_v6 = vpop.f32.mrf.mxu3 }
 0x951   : > { %v5881_v29 = vadd.f32 %v7364_v50, %v5880_v15  ;;  %v6703_v50 = vand.u32 4294901760, %v11388_v47  ;;  %v6709_v15 = vand.u32 4294901760, %v11413_v33 }
 0x953   : > { %v5986_v10 = vadd.f32 %v5985_v18, %v5881_v29  ;;  %v6687_v18 = vand.u32 4294901760, %v6686_v53  ;;  %v6693_v29 = vand.u32 4294901760, %v6692_v12  ;;  %v6704_v55 = vsub.f32 %v11388_v47, %v6703_v50 }
 0x955   : > { %v6045_v52 = vadd.f32 %v6044_v5, %v5986_v10  ;;  %6688 = vmatpush.msra.mxu3 %v6687_v18  ;;  %v6699_v10 = vand.u32 4294901760, %v6698_v24 }
 0x957   : > { %v6090_v57 = vadd.f32 %v6089_v26, %v6045_v52  ;;  %6694 = vmatpush.msra.mxu3 %v6693_v29  ;;  %v6608_v26 = vld [vmem:[#allocation17 + $0x30] sm:$0xff] }
 0x958   : > { %v6158_v37 = vpop.f32.mrf.mxu2  ;;  %v6203_v34 = vpop.f32.mrf.mxu3 }
 0x959   : > { %v6159_v39 = vadd.f32 %v6158_v37, %v6084_v51  ;;  %v6710_v51 = vsub.f32 %v11413_v33, %v6709_v15  ;;  %6700 = vmatpush.msra.mxu3 %v6699_v10 }
 0x95b   : > { %v6200_v62 = vadd.f32 %v6199_v6, %v6159_v39  ;;  %v6705_v6 = vand.u32 4294901760, %v6704_v55  ;;  %v6711_v37 = vand.u32 4294901760, %v6710_v51  ;;  %v6610_v39 = vld [vmem:[#allocation17 + $0x40] sm:$0xff] }
 0x95c   : > { %v11440_v5 = vand.u32 4294901760, %v6610_v39 }
 0x95d   : > { %v6206_v42 = vmax.f32 %v6200_v62, 0.0  ;;  %6706 = vmatpush.msra.mxu3 %v6705_v6  ;;  %v6609_v62 = vld [vmem:[#allocation17 + $0x38] sm:$0xff] }
 0x95e   : > { %v11443_v52 = vsub.f32 %v6610_v39, %v11440_v5  ;;  %6637 = vmatpush.msra.mxu2 %v11440_v5 }
 0x95f   : > { %v11350_v19 = vand.u32 4294901760, %v6206_v42  ;;  %6712 = vmatpush.msra.mxu3 %v6711_v37 }
 0x960   : > { %v6162_v45 = vpop.f32.mrf.mxu2 }
 0x961   : > { %v6261_v22 = vsub.f32 %v6206_v42, %v11350_v19  ;;  %v6163_v25 = vadd.f32 %v6162_v45, %v6090_v57  ;;  %6374 = vmatmul.f32.vlgmr.msrb.gmra.mxu1 %v11350_v19  ;;  %v11445_v42 = vand.u32 4294901760, %v6609_v62  ;;  %v6715_v57 = vand.u32 4294901760, %v11443_v52 }
 0x962   : > { %6836 = vmatpush.msrb.mxu1 %v11354_v20  ;;  %v11453_v45 = vand.u32 4294901760, %v6608_v26 }
 0x963   : > { %v6262_v1 = vand.u32 4294901760, %v6261_v22  ;;  %v6204_v2 = vadd.f32 %v6203_v34, %v6163_v25  ;;  %6432 = vmatmul.f32.vlgmr.msrb.gmra.mxu2 %v6261_v22  ;;  %v6716_v25 = vsub.f32 %v11443_v52, %v6715_v57  ;;  %v6606_v34 = vld [vmem:[#allocation17 + $0x20] sm:$0xff] }
 0x964   : > { %6838 = vmatpush.msrb.mxu1 %v11356_v7  ;;  %6639 = vmatpush.msra.mxu2 %v11445_v42  ;;  %v11463_v32 = vsub.f32 %v6608_v26, %v11453_v45 }
 0x965   : > { %v6263_v56 = vsub.f32 %v6261_v22, %v6262_v1  ;;  %v6207_v21 = vmax.f32 %v6204_v2, 0.0  ;;  %6476 = vmatmul.f32.vlgmr.msrb.gmra.mxu3 %v6262_v1  ;;  %v6607_v22 = vld [vmem:[#allocation17 + $0x28] sm:$0xff]  ;;  %v6717_v27 = vand.u32 4294901760, %v6716_v25  ;;  %v11479_v2 = vand.u32 4294901760, %v6606_v34 }
 0x966   : > { %6840 = vmatpush.msrb.mxu1 %v11358_v13  ;;  %v11465_v46 = vand.u32 4294901760, %v6607_v22  ;;  %6641 = vmatpush.msra.mxu2 %v11453_v45  ;;  %v6727_v8 = vand.u32 4294901760, %v11463_v32 }
 0x967   : > { %v6264_v23 = vand.u32 4294901760, %v6263_v56  ;;  %v6268_v0 = vand.u32 4294901760, %v6207_v21  ;;  %v6605_v56 = vld [vmem:[#allocation17 + $0x18] sm:$0xff]  ;;  %6718 = vmatpush.msra.mxu3 %v6717_v27  ;;  %v11490_v44 = vsub.f32 %v6606_v34, %v11479_v2 }
 0x968   : > { %6842 = vmatpush.msrb.mxu1 %v11360_v30  ;;  %v11475_v1 = vsub.f32 %v6607_v22, %v11465_v46  ;;  %6643 = vmatpush.msra.mxu2 %v11465_v46  ;;  %v6728_v40 = vsub.f32 %v11463_v32, %v6727_v8 }
 0x969   : > { %6265 = vmatmul.f32.vlgmr.msrb.gmra.mxu0 %v6264_v23  ;;  %6378 = vmatmul.f32.gmra.mxu1 %v6268_v0  ;;  %v6269_v9 = vsub.f32 %v6207_v21, %v6268_v0  ;;  %v6739_v12 = vand.u32 4294901760, %v11490_v44 }
 0x96a   : > { %6778 = vmatpush.msrb.mxu0 %v11365_v48  ;;  %6844 = vmatpush.msrb.mxu1 %v11362_v31  ;;  %v6733_v23 = vand.u32 4294901760, %v11475_v1  ;;  %v6729_v53 = vand.u32 4294901760, %v6728_v40 }
 0x96b   : > { %6437 = vmatmul.f32.gmra.mxu2 %v6269_v9  ;;  %v6270_v36 = vand.u32 4294901760, %v6269_v9  ;;  %v6740_v55 = vsub.f32 %v11490_v44, %v6739_v12 }
 0x96c   : > { %6781 = vmatpush.msrb.mxu0 %v11368_v58  ;;  %6846 = vmatpush.msrb.mxu1 %v11374_v59 }
 0x96d   : > { %6482 = vmatmul.f32.gmra.mxu3 %v6270_v36  ;;  %v6271_v61 = vsub.f32 %v6269_v9, %v6270_v36  ;;  %6645 = vmatpush.msra.mxu2 %v11479_v2  ;;  %v6734_v9 = vsub.f32 %v11475_v1, %v6733_v23  ;;  %v6603_v36 = vld [vmem:[#allocation17 + $0x8] sm:$0xff]  ;;  %v6741_v39 = vand.u32 4294901760, %v6740_v55 }
 0x96e   : > { %6784 = vmatpush.msrb.mxu0 %v11371_v60  ;;  %6848 = vmatpush.msrb.mxu1 %v11404_v16  ;;  %v11507_v29 = vand.u32 4294901760, %v6603_v36 }
 0x96f   : > { %v6272_v4 = vand.u32 4294901760, %v6271_v61  ;;  %v6735_v18 = vand.u32 4294901760, %v6734_v9  ;;  %v6750_v61 = vsub.f32 %v6604_v38, %v11500_v49  ;;  %v7366_v9 = vld [vmem:[%s11649_s15] ss:$0 sm:$0xff] }
 0x970   : > { %6787 = vmatpush.msrb.mxu0 %v11378_v35  ;;  %6850 = vmatpush.msrb.mxu1 %v11440_v5  ;;  %v6756_v6 = vsub.f32 %v6603_v36, %v11507_v29 }
 0x971   : > { %6273 = vmatmul.f32.gmra.mxu0 %v6272_v4  ;;  %6592 = vmatmul.f32.vlgmr.msra.gmra.mxu1 %v11350_v19  ;;  %v6602_v4 = vld [vmem:[#allocation17] sm:$0xff]  ;;  %v6751_v51 = vand.u32 4294901760, %v6750_v61 }
 0x972   : > { %6790 = vmatpush.msrb.mxu0 %v11381_v28  ;;  %6852 = vmatpush.msrb.mxu1 %v11445_v42  ;;  %v11515_v37 = vand.u32 4294901760, %v6602_v4  ;;  %v6757_v22 = vand.u32 4294901760, %v6756_v6 }
 0x973   : > { %v6752_v26 = vsub.f32 %v6750_v61, %v6751_v51 }
 0x974   : > { %6793 = vmatpush.msrb.mxu0 %v11388_v47  ;;  %6854 = vmatpush.msrb.mxu1 %v11453_v45  ;;  %v6762_v25 = vsub.f32 %v6602_v4, %v11515_v37  ;;  %v6758_v27 = vsub.f32 %v6756_v6, %v6757_v22 }
 0x975   : > { %v6753_v34 = vand.u32 4294901760, %v6752_v26 }
 0x976   : > { %6796 = vmatpush.msrb.mxu0 %v11413_v33  ;;  %6856 = vmatpush.msrb.mxu1 %v11465_v46 }
 0x978   : > { %6799 = vmatpush.msrb.mxu0 %v11443_v52  ;;  %6858 = vmatpush.msrb.mxu1 %v11479_v2 }
 0x979   : > { %6551 = vmatmul.f32.vlgmr.msra.gmra.mxu0 %v11350_v19  ;;  %6596 = vmatmul.f32.gmra.mxu1 %v6268_v0  ;;  %v11451_v19 = vsub.f32 %v6609_v62, %v11445_v42 }
 0x97b   : > { %v6721_v43 = vand.u32 4294901760, %v11451_v19  ;;  %6802 = vmatpush.msrb.mxu0 %v11451_v19 }
 0x97d   : > { %v6722_v3 = vsub.f32 %v11451_v19, %v6721_v43  ;;  %6805 = vmatpush.msrb.mxu0 %v11463_v32 }
 0x97f   : > { %v6723_v21 = vand.u32 4294901760, %v6722_v3  ;;  %6808 = vmatpush.msrb.mxu0 %v11475_v1  ;;  %v6763_v3 = vand.u32 4294901760, %v6762_v25 }
 0x981   : > { %6555 = vmatmul.f32.gmra.mxu0 %v6268_v0  ;;  %v11486_v0 = vand.u32 4294901760, %v6605_v56  ;;  %6724 = vmatpush.msra.mxu3 %v6723_v21  ;;  %v6764_v21 = vsub.f32 %v6762_v25, %v6763_v3 }
 0x982   : > { %6811 = vmatpush.msrb.mxu0 %v11490_v44 }
 0x983   : > { %v11498_v17 = vsub.f32 %v6605_v56, %v11486_v0  ;;  %6647 = vmatpush.msra.mxu2 %v11486_v0  ;;  %6730 = vmatpush.msra.mxu3 %v6729_v53  ;;  %v6759_v56 = vand.u32 4294901760, %v6758_v27  ;;  %v6765_v40 = vand.u32 4294901760, %v6764_v21 }
 0x984   : > { %6860 = vmatpush.msrb.mxu1 %v11486_v0 }
 0x985   : > { %v6745_v24 = vand.u32 4294901760, %v11498_v17  ;;  %6649 = vmatpush.msra.mxu2 %v11500_v49  ;;  %6814 = vmatpush.msrb.mxu0 %v11498_v17 }
 0x986   : > { %6736 = vmatpush.msra.mxu3 %v6735_v18  ;;  %6862 = vmatpush.msrb.mxu1 %v11500_v49 }
 0x987   : > { %v6746_v10 = vsub.f32 %v11498_v17, %v6745_v24  ;;  %6651 = vmatpush.msra.mxu2 %v11507_v29  ;;  %6817 = vmatpush.msrb.mxu0 %v6750_v61 }
 0x988   : > { %6864 = vmatpush.msrb.mxu1 %v11507_v29  ;;  %6742 = vmatpush.msra.mxu3 %v6741_v39 }
 0x989   : > { %v6747_v62 = vand.u32 4294901760, %v6746_v10  ;;  %6653 = vmatpush.msra.mxu2 %v11515_v37  ;;  %6820 = vmatpush.msrb.mxu0 %v6756_v6 }
 0x98a   : > { %6866 = vmatpush.msrb.mxu1 %v11515_v37 }
 0x98b   : > { %6883 = vmatpush.msrb.mxu2 %v6673_v63  ;;  %6748 = vmatpush.msra.mxu3 %v6747_v62 }
 0x98c   : > { %6823 = vmatpush.msrb.mxu0 %v6762_v25 }
 0x98d   : > { %6887 = vmatpush.msrb.mxu2 %v6679_v54  ;;  %6754 = vmatpush.msra.mxu3 %v6753_v34 }
 0x98f   : > { %6891 = vmatpush.msrb.mxu2 %v6685_v11  ;;  %6760 = vmatpush.msra.mxu3 %v6759_v56 }
 0x991   : > { %6895 = vmatpush.msrb.mxu2 %v6691_v14  ;;  %6766 = vmatpush.msra.mxu3 %v6765_v40 }
 0x993   : > { %6954 = vmatpush.msrb.mxu3 %v11354_v20  ;;  %6899 = vmatpush.msrb.mxu2 %v6697_v41 }
 0x995   : > { %6956 = vmatpush.msrb.mxu3 %v11356_v7  ;;  %6903 = vmatpush.msrb.mxu2 %v6703_v50  ;;  %v7365_v7 = vld [vmem:[%s11648_s26] ss:$0 sm:$0xff]  ;;  %s7683_s26 = scalar_lea.hbm %s7682_s3, 16 }
 0x996   : > { %p7684_p1 = scmp.ne.s32.totalorder %s7682_s3, %s7683_s26  ;;  %p7689_p8 = scmp.lt.s32.totalorder %s7687_s22, %s7683_s26 }
 0x997   : > { %6958 = vmatpush.msrb.mxu3 %v11358_v13  ;;  %6907 = vmatpush.msrb.mxu2 %v6709_v15 }
 0x998   : > { %p7685_p3 = pnand %p7684_p1, %p7983_p13  ;;  %p7690_p7 = por %p7689_p8, %p7688_p12 }
 0x999   : > { %6960 = vmatpush.msrb.mxu3 %v11360_v30  ;;  %6911 = vmatpush.msrb.mxu2 %v6715_v57 }
 0x99a   : > { %p7686_p5 = pneg %p7685_p3 }
 0x99b   : > { %6962 = vmatpush.msrb.mxu3 %v11362_v31  ;;  %6915 = vmatpush.msrb.mxu2 %v6721_v43 }
 0x99c   : > { %p7691_p9 = pnand %p7690_p7, %p7686_p5 }
 0x99d   : > { %6964 = vmatpush.msrb.mxu3 %v11374_v59  ;;  %6919 = vmatpush.msrb.mxu2 %v6727_v8 }
 0x99f   : > { %6966 = vmatpush.msrb.mxu3 %v11404_v16  ;;  %6923 = vmatpush.msrb.mxu2 %v6733_v23 }
 0x9a1   : > { %6968 = vmatpush.msrb.mxu3 %v11440_v5  ;;  %6927 = vmatpush.msrb.mxu2 %v6739_v12 }
 0x9a3   : > { %6970 = vmatpush.msrb.mxu3 %v11445_v42  ;;  %6931 = vmatpush.msrb.mxu2 %v6745_v24 }
 0x9a5   : > { %6972 = vmatpush.msrb.mxu3 %v11453_v45  ;;  %6935 = vmatpush.msrb.mxu2 %v6751_v51 }
 0x9a7   : > { %6974 = vmatpush.msrb.mxu3 %v11465_v46  ;;  %6939 = vmatpush.msrb.mxu2 %v6757_v22 }
 0x9a9   : > { %6976 = vmatpush.msrb.mxu3 %v11479_v2  ;;  %6943 = vmatpush.msrb.mxu2 %v6763_v3 }
 0x9ab   : > { %6978 = vmatpush.msrb.mxu3 %v11486_v0 }
 0x9ad   : > { %6980 = vmatpush.msrb.mxu3 %v11500_v49 }
 0x9af   : > { %6982 = vmatpush.msrb.mxu3 %v11507_v29 }
 0x9b1   : > { %6984 = vmatpush.msrb.mxu3 %v11515_v37 }
 0x9de   : > { %v6375_v20 = vpop.f32.mrf.mxu1 }
 0x9e6   : > { %v6266_v13 = vpop.f32.mrf.mxu0  ;;  %v6379_v31 = vpop.f32.mrf.mxu1 }
 0x9e7   : > { %v6267_v30 = vadd.f32 %v7365_v7, %v6266_v13  ;;  %v6433_v58 = vpop.f32.mrf.mxu2 }
 0x9e8   : > { %v6477_v28 = vpop.f32.mrf.mxu3 }
 0x9e9   : > { %v6376_v48 = vadd.f32 %v6375_v20, %v6267_v30 }
 0x9eb   : > { %v6434_v59 = vadd.f32 %v6433_v58, %v6376_v48 }
 0x9ed   : > { %v6478_v63 = vadd.f32 %v6477_v28, %v6434_v59 }
 0x9ee   : > { %v6274_v60 = vpop.f32.mrf.mxu0  ;;  %v6593_v11 = vpop.f32.mrf.mxu1 }
 0x9ef   : > { %v6275_v35 = vadd.f32 %v7365_v7, %v6274_v60  ;;  %v6438_v41 = vpop.f32.mrf.mxu2 }
 0x9f0   : > { %v6483_v15 = vpop.f32.mrf.mxu3 }
 0x9f1   : > { %v6380_v54 = vadd.f32 %v6379_v31, %v6275_v35 }
 0x9f3   : > { %v6439_v16 = vadd.f32 %v6438_v41, %v6380_v54 }
 0x9f5   : > { %v6484_v5 = vadd.f32 %v6483_v15, %v6439_v16 }
 0x9f6   : > { %v6552_v47 = vpop.f32.mrf.mxu0  ;;  %v6597_v45 = vpop.f32.mrf.mxu1 }
 0x9f7   : > { %v6553_v14 = vadd.f32 %v6552_v47, %v6478_v63 }
 0x9f9   : > { %v6594_v50 = vadd.f32 %v6593_v11, %v6553_v14 }
 0x9fb   : > { %v6600_v33 = vmax.f32 %v6594_v50, 0.0 }
 0x9fd   : > { %v6654_v52 = vand.u32 4294901760, %v6600_v33 }
 0x9fe   : > { %v6556_v42 = vpop.f32.mrf.mxu0 }
 0x9ff   : > { %v6655_v57 = vsub.f32 %v6600_v33, %v6654_v52  ;;  %v6557_v19 = vadd.f32 %v6556_v42, %v6484_v5  ;;  %6768 = vmatmul.f32.vlgmr.msra.gmra.mxu3 %v6654_v52 }
 0xa01   : > { %v6656_v43 = vand.u32 4294901760, %v6655_v57  ;;  %v6598_v32 = vadd.f32 %v6597_v45, %v6557_v19  ;;  %6826 = vmatmul.f32.vlgmr.msrb.gmra.mxu0 %v6655_v57 }
 0xa03   : > { %v6657_v46 = vsub.f32 %v6655_v57, %v6656_v43  ;;  %v6601_v8 = vmax.f32 %v6598_v32, 0.0  ;;  %6870 = vmatmul.f32.vlgmr.msrb.gmra.mxu1 %v6656_v43 }
 0xa05   : > { %v6658_v1 = vand.u32 4294901760, %v6657_v46  ;;  %v6662_v2 = vand.u32 4294901760, %v6601_v8 }
 0xa07   : > { %6659 = vmatmul.f32.vlgmr.msra.gmra.mxu2 %v6658_v1  ;;  %6772 = vmatmul.f32.gmra.mxu3 %v6662_v2  ;;  %v6663_v23 = vsub.f32 %v6601_v8, %v6662_v2 }
 0xa09   : > { %6831 = vmatmul.f32.gmra.mxu0 %v6663_v23  ;;  %v6664_v0 = vand.u32 4294901760, %v6663_v23 }
 0xa0b   : > { %6876 = vmatmul.f32.gmra.mxu1 %v6664_v0  ;;  %v6665_v44 = vsub.f32 %v6663_v23, %v6664_v0 }
 0xa0d   : > { %v6666_v38 = vand.u32 4294901760, %v6665_v44 }
 0xa0f   : > { %6667 = vmatmul.f32.gmra.mxu2 %v6666_v38  ;;  %6986 = vmatmul.f32.vlgmr.msrb.gmra.mxu3 %v6654_v52 }
 0xa17   : > { %6945 = vmatmul.f32.vlgmr.msrb.gmra.mxu2 %v6654_v52  ;;  %6990 = vmatmul.f32.gmra.mxu3 %v6662_v2 }
 0xa1f   : > { %6949 = vmatmul.f32.gmra.mxu2 %v6662_v2 }
 0xa7e   : > { %v6827_v18 = vpop.f32.mrf.mxu0 }
 0xa80   : > { %v6871_v55 = vpop.f32.mrf.mxu1 }
 0xa82   : > { %v6769_v53 = vpop.f32.mrf.mxu3 }
 0xa86   : > { %v6832_v39 = vpop.f32.mrf.mxu0 }
 0xa88   : > { %v6877_v22 = vpop.f32.mrf.mxu1 }
 0xa8a   : > { %v6660_v17 = vpop.f32.mrf.mxu2  ;;  %v6773_v12 = vpop.f32.mrf.mxu3 }
 0xa8b   : > { %v6661_v49 = vadd.f32 %v7366_v9, %v6660_v17 }
 0xa8d   : > { %v6770_v36 = vadd.f32 %v6769_v53, %v6661_v49 }
 0xa8f   : > { %v6828_v29 = vadd.f32 %v6827_v18, %v6770_v36 }
 0xa91   : > { %v6872_v10 = vadd.f32 %v6871_v55, %v6828_v29 }
 0xa92   : > { %v6668_v24 = vpop.f32.mrf.mxu2  ;;  %v6987_v51 = vpop.f32.mrf.mxu3 }
 0xa93   : > { %v6669_v61 = vadd.f32 %v7366_v9, %v6668_v24 }
 0xa95   : > { %v6774_v4 = vadd.f32 %v6773_v12, %v6669_v61 }
 0xa97   : > { %v6833_v26 = vadd.f32 %v6832_v39, %v6774_v4 }
 0xa99   : > { %v6878_v25 = vadd.f32 %v6877_v22, %v6833_v26 }
 0xa9a   : > { %v6946_v6 = vpop.f32.mrf.mxu2  ;;  %v6991_v3 = vpop.f32.mrf.mxu3 }
 0xa9b   : > { %v6947_v37 = vadd.f32 %v6946_v6, %v6872_v10 }
 0xa9d   : > { %v6988_v62 = vadd.f32 %v6987_v51, %v6947_v37 }
 0xa9f   : > { %6994 = vst [vmem:[%s663_s7] sm:$0xff] %v6988_v62 }
 0xaa2   : > { %v6950_v34 = vpop.f32.mrf.mxu2 }
 0xaa3   : > { %v6951_v27 = vadd.f32 %v6950_v34, %v6878_v25 }
 0xaa5   : > { %v6992_v56 = vadd.f32 %v6991_v3, %v6951_v27 }
 0xaa7   : > { %6995 = vst [vmem:[%s663_s7 + $0x8] sm:$0xff] %v6992_v56 }
 0xaa8   : > { %7694 = shalt.err (!%p7691_p9)
}
 0xaa9   : > { %s7768_s23 = smov 128   ;;  %s7769_s4 = smov 8  }
 0xaaa   : > { %7246 = dma.vmem_to_hbm [thread:$0]  (%p7983_p13), %s7010_s28, 256, %s7012_s1, %s6997_s25, %s7768_s23, %s7768_s23, %s7769_s4  }
 0xaab PF: > { %s7026_s10 = sand.u32 1, %s7741_s18   ;;  %p11651_p10 = scmp.ge.s32.totalorder %s7753_s21, 2 }
 0xaac   : > { %s7027_s30 = scalar_lea.sflag [#allocation4], %s7026_s10 }
 0xaad   : > { %p7281_p11 = pnand %p11651_p10, %p7988_p4 }
 0xaaf   : > { %p7282_p0 = pneg %p7281_p11 }
 0xab1   : > { %7736 = dma.done.wait (%p7282_p0), %s7027_s30, 256  }
 0xab2   : > { %7738 = vsyncadd (%p7282_p0), %s7027_s30, 4294967040  ;;  %p33_p2 = scmp.ge.s32.totalorder %s7963_s12, 4   ;;  %s11652_s18 = smov %s7745_s19 }
 0xab3   : > { %s11653_s19 = smov %s7749_s20  ;;  %s11654_s20 = smov %s7975_s14 }
 0xab4   : > { %s11655_s21 = smov %s7963_s12  ;;  %35 = sbr.rel (!%p33_p2) target bundleno = 20 (0x14), region = 179 }
 0xab9   :  { %7033 = vsyncpa [#allocation3], 1 }
 0xaba   :  { %7035 = vsyncpa [#allocation3 + $0x1], 1 }
 0xabb   :  { %7036 = vsyncpa [#allocation6], 1 }
 0xabc   :  { %7037 = vsyncpa [#allocation9], 1 }
 0xabd   :  { %7038 = vsyncpa [#allocation12], 1 }
 0xabe   :  { %7039 = vsyncpa [#allocation15], 1 }
 0xabf   :  { %7040 = vsyncpa [#allocation18], 1 }
 0xac0   :  { %7041 = vsyncpa [#allocation4], 1 }
 0xac1   :  { %7043 = vsyncpa [#allocation4 + $0x1], 1 }

</bundles_post_ra>
